<compile_context>
chip_gen: v7x
topology: tpu7x:2x2x1
jax: 0.10.0
libtpu: 0.0.40
codegen_flags: <defaults>
</compile_context>

<pallas_src>
import jax
import jax.numpy as jnp
from jax import lax
from jax.experimental import pallas as pl
from jax.experimental.pallas import tpu as pltpu


# ---------------------------------------------------------------------------
# Pallas kernels
# ---------------------------------------------------------------------------
def _conv_relu_pool_kernel(p00_ref, p01_ref, p10_ref, p11_ref, w_ref, b_ref,
                           o_ref):
    """Fused conv (im2col matmul) + bias + ReLU + 2x2 max-pool.

    Each p*_ref holds the im2col patches of one pool quadrant:
    (rows, K) with rows = N * Ho/2 * Wo/2 and K = Cin*kh*kw.  The pooled
    output is the elementwise max over the four quadrant conv outputs
    (ReLU and max commute, so relu-then-pool == pool-then-relu).
    """
    w = w_ref[...]                                    # (K, Cout) bf16
    b = b_ref[...]                                    # (1, Cout) f32

    def quad(p_ref):
        acc = jnp.dot(p_ref[...], w, preferred_element_type=jnp.float32)
        return jnp.maximum(acc + b, 0.0)

    pooled = jnp.maximum(jnp.maximum(quad(p00_ref), quad(p01_ref)),
                         jnp.maximum(quad(p10_ref), quad(p11_ref)))
    o_ref[...] = pooled.astype(o_ref.dtype)


def _dense_head_kernel(x_ref, w1_ref, b1_ref, w2_ref, b2_ref, w3_ref, b3_ref,
                       o_ref):
    """dense1 -> ReLU -> dense2 -> ReLU -> dense3 -> sigmoid, fully fused.

    Weights are bf16, pre-transposed to (K, N) and zero-padded to 128 lanes;
    intermediate activations stay in vregs (no HBM round-trips).
    """
    h = jnp.dot(x_ref[...], w1_ref[...], preferred_element_type=jnp.float32)
    h = jnp.maximum(h + b1_ref[...], 0.0).astype(jnp.bfloat16)
    h = jnp.dot(h, w2_ref[...], preferred_element_type=jnp.float32)
    h = jnp.maximum(h + b2_ref[...], 0.0).astype(jnp.bfloat16)
    z = jnp.dot(h, w3_ref[...], preferred_element_type=jnp.float32)
    z = z + b3_ref[...]
    # sigmoid = 1 / (1 + exp(-z)): exp and the approx reciprocal both run on
    # the EUP, keeping the divide off the vector-ALU slot.
    o_ref[...] = pl.reciprocal(1.0 + jnp.exp(-z), approx=True).astype(o_ref.dtype)


_VMEM = pl.BlockSpec(memory_space=pltpu.MemorySpace.VMEM)


# ---------------------------------------------------------------------------
# Wrappers
# ---------------------------------------------------------------------------
def conv_relu_pool(quad_patches, w, b):
    rows = quad_patches[0].shape[0]
    cout = w.shape[1]
    return pl.pallas_call(
        _conv_relu_pool_kernel,
        out_shape=jax.ShapeDtypeStruct((rows, cout), jnp.bfloat16),
        in_specs=[_VMEM] * 6,
        out_specs=_VMEM,
    )(*quad_patches, w, b)


def dense_head(x, kp):
    n = x.shape[0]
    return pl.pallas_call(
        _dense_head_kernel,
        out_shape=jax.ShapeDtypeStruct((n, 1), jnp.float32),
        in_specs=[_VMEM] * 7,
        out_specs=_VMEM,
    )(x.astype(jnp.bfloat16),
      kp["d1_w"], kp["d1_b"], kp["d2_w"], kp["d2_b"], kp["d3_w"], kp["d3_b"])


def _quadrant_patches(act, kh, kw, ho, wo):
    """Channels-last im2col, one patch matrix per 2x2-pool quadrant.

    act: (N, Hp, Wp, Cin) (already spatially padded).  Returns 4 matrices of
    shape (N * ho/2 * wo/2, Cin*kh*kw), quadrant order (qy, qx).  Feature
    order is (cin, dy, dx), matching the OIHW weight flattening; row order is
    (n, h', w').  Pure layout plumbing (XLA glue), no compute.
    """
    n, _, _, c = act.shape
    hq, wq = ho // 2, wo // 2
    quads = []
    for qy in (0, 1):
        for qx in (0, 1):
            wins = [act[:,
                        qy + dy: qy + dy + 2 * (hq - 1) + 1: 2,
                        qx + dx: qx + dx + 2 * (wq - 1) + 1: 2,
                        :]
                    for dy in range(kh) for dx in range(kw)]
            stk = jnp.stack(wins, axis=-1)             # (N, hq, wq, C, kh*kw)
            quads.append(stk.reshape(n * hq * wq, c * kh * kw))
    return quads


def malan_net_forward(x, kp):
    """x: (N, 1, 32, 32) f32 NCHW.  kp: output of prepare_params()."""
    n = x.shape[0]

    # conv1 (3x3, pad 1) + ReLU + pool  -> (N*16*16, 32) channels-last rows.
    xcl = jnp.pad(x, ((0, 0), (0, 0), (1, 1), (1, 1)))
    xcl = xcl.transpose(0, 2, 3, 1).astype(jnp.bfloat16)          # (N,34,34,1)
    a1 = conv_relu_pool(_quadrant_patches(xcl, 3, 3, 32, 32),
                        kp["c1_w"], kp["c1_b"])                   # (N*256, 32)

    # conv2 (5x5, pad 0) + ReLU + pool  -> (N*6*6, 64).
    a1 = a1.reshape(n, 16, 16, 32)
    a2 = conv_relu_pool(_quadrant_patches(a1, 5, 5, 12, 12),
                        kp["c2_w"], kp["c2_b"])                   # (N*36, 64)

    # Fused dense head.  Features flatten as (h, w, c); dense1's weights were
    # permuted once at prep time to match, preserving PyTorch semantics.
    feats = a2.reshape(n, 6 * 6 * 64)
    return dense_head(feats, kp)


# ---------------------------------------------------------------------------
# One-time parameter prep (hoisted out of the forward pass)
# ---------------------------------------------------------------------------
def prepare_params(p):
    bf16, f32 = jnp.bfloat16, jnp.float32

    def pad_to(a, rows, cols):
        return jnp.pad(a, ((0, rows - a.shape[0]), (0, cols - a.shape[1])))

    # dense1: PyTorch flattens (N, 64, 6, 6) as (c, h, w); the kernel path
    # flattens as (h, w, c) -> permute columns once here.
    d1 = p["dense1_w"].reshape(120, 64, 6, 6).transpose(0, 2, 3, 1)
    d1 = d1.reshape(120, 2304).T                                   # (2304, 120)

    return {
        "c1_w": p["conv1_w"].reshape(32, 9).T.astype(bf16),        # (9, 32)
        "c1_b": p["conv1_b"].reshape(1, 32).astype(f32),
        "c2_w": p["conv2_w"].reshape(64, 800).T.astype(bf16),      # (800, 64)
        "c2_b": p["conv2_b"].reshape(1, 64).astype(f32),
        "d1_w": pad_to(d1, 2304, 128).astype(bf16),                # (2304, 128)
        "d1_b": jnp.pad(p["dense1_b"], (0, 8)).reshape(1, 128).astype(f32),
        "d2_w": pad_to(p["dense2_w"].T, 128, 128).astype(bf16),    # (128, 128)
        "d2_b": jnp.pad(p["dense2_b"], (0, 44)).reshape(1, 128).astype(f32),
        "d3_w": pad_to(p["dense3_w"].T, 128, 1).astype(bf16),      # (128, 1)
        "d3_b": p["dense3_b"].reshape(1, 1).astype(f32),
    }


# ---------------------------------------------------------------------------
# Deterministic parameter init (PyTorch-default-style U(-1/sqrt(fan_in), ...))
# ---------------------------------------------------------------------------
def init_params(key):
    def uni(k, shape, fan_in):
        bound = 1.0 / float(fan_in) ** 0.5
        return jax.random.uniform(k, shape, jnp.float32, -bound, bound)

    ks = jax.random.split(key, 10)
    return {
        "conv1_w": uni(ks[0], (32, 1, 3, 3), 1 * 3 * 3),
        "conv1_b": uni(ks[1], (32,), 1 * 3 * 3),
        "conv2_w": uni(ks[2], (64, 32, 5, 5), 32 * 5 * 5),
        "conv2_b": uni(ks[3], (64,), 32 * 5 * 5),
        "dense1_w": uni(ks[4], (120, 64 * 6 * 6), 64 * 6 * 6),
        "dense1_b": uni(ks[5], (120,), 64 * 6 * 6),
        "dense2_w": uni(ks[6], (84, 120), 120),
        "dense2_b": uni(ks[7], (84,), 120),
        "dense3_w": uni(ks[8], (1, 84), 84),
        "dense3_b": uni(ks[9], (1,), 84),
    }


# ---------------------------------------------------------------------------
# Pure-JAX f32 reference (PyTorch semantics) for the correctness check
# ---------------------------------------------------------------------------
def reference_forward(x, p):
    def conv(x, w, b, pad):
        y = lax.conv_general_dilated(x, w, (1, 1), [(pad, pad), (pad, pad)],
                                     dimension_numbers=("NCHW", "OIHW", "NCHW"))
        return jax.nn.relu(y + b[None, :, None, None])

    def pool(x):
        return lax.reduce_window(x, -jnp.inf, lax.max,
                                 (1, 1, 2, 2), (1, 1, 2, 2), "VALID")

    x = pool(conv(x, p["conv1_w"], p["conv1_b"], 1))
    x = pool(conv(x, p["conv2_w"], p["conv2_b"], 0))
    x = x.reshape(-1, 64 * 6 * 6)
    x = jax.nn.relu(x @ p["dense1_w"].T + p["dense1_b"])
    x = jax.nn.relu(x @ p["dense2_w"].T + p["dense2_b"])
    x = jax.nn.sigmoid(x @ p["dense3_w"].T + p["dense3_b"])
    return x


if __name__ == "__main__":
    key = jax.random.PRNGKey(0)
    kx, kp_key = jax.random.split(key)
    # dense1's 64*6*6 input pins the spatial size: x must be (N, 1, 32, 32).
    x = jax.random.normal(kx, (2, 1, 32, 32), jnp.float32)
    params = init_params(kp_key)
    kparams = prepare_params(params)          # one-time weight prep

    fwd = jax.jit(malan_net_forward)
    out = jax.block_until_ready(fwd(x, kparams))
    ref = reference_forward(x, params)

    assert out.shape == (2, 1), out.shape
    # bf16 matmul operands (f32 accumulation) -> slightly looser tolerance.
    assert jnp.allclose(out, ref, atol=5e-3, rtol=5e-3), (out, ref)
    print("KERNEL_OK")
</pallas_src>

<mosaic_0001>
module attributes {stable_mosaic.version = 11 : i64} {
  func.func @_conv_relu_pool_kernel(%arg0: memref<512x9xbf16, #tpu.memory_space<vmem>>, %arg1: memref<512x9xbf16, #tpu.memory_space<vmem>>, %arg2: memref<512x9xbf16, #tpu.memory_space<vmem>>, %arg3: memref<512x9xbf16, #tpu.memory_space<vmem>>, %arg4: memref<9x32xbf16, #tpu.memory_space<vmem>>, %arg5: memref<1x32xf32, #tpu.memory_space<vmem>>, %arg6: memref<512x32xbf16, #tpu.memory_space<vmem>>) attributes {dimension_semantics = [], scalar_prefetch = 0 : i64, scratch_operands = 0 : i64, tpu.core_type = #tpu.core_type<tc>} {
    %c0 = arith.constant 0 : index
    %c0_0 = arith.constant 0 : index
    %0 = vector.load %arg4[%c0, %c0_0] : memref<9x32xbf16, #tpu.memory_space<vmem>>, vector<9x32xbf16>
    %c0_1 = arith.constant 0 : index
    %c0_2 = arith.constant 0 : index
    %1 = vector.load %arg5[%c0_1, %c0_2] : memref<1x32xf32, #tpu.memory_space<vmem>>, vector<1x32xf32>
    %c0_3 = arith.constant 0 : index
    %c0_4 = arith.constant 0 : index
    %2 = vector.load %arg0[%c0_3, %c0_4] : memref<512x9xbf16, #tpu.memory_space<vmem>>, vector<512x9xbf16>
    %cst = arith.constant dense<0.000000e+00> : vector<512x32xf32>
    %3 = tpu.matmul %2, %0, %cst {dimension_numbers = #tpu.dot_dimension_numbers<[1], [0], [0], [1], [0, 0, 1, 1], [], []>} : vector<512x9xbf16>, vector<9x32xbf16>, vector<512x32xf32> -> vector<512x32xf32>
    %4 = vector.broadcast %1 : vector<1x32xf32> to vector<512x32xf32>
    %5 = arith.addf %3, %4 : vector<512x32xf32>
    %cst_5 = arith.constant 0.000000e+00 : f32
    %6 = vector.broadcast %cst_5 : f32 to vector<512x32xf32>
    %7 = arith.maximumf %5, %6 : vector<512x32xf32>
    %c0_6 = arith.constant 0 : index
    %c0_7 = arith.constant 0 : index
    %8 = vector.load %arg1[%c0_6, %c0_7] : memref<512x9xbf16, #tpu.memory_space<vmem>>, vector<512x9xbf16>
    %cst_8 = arith.constant dense<0.000000e+00> : vector<512x32xf32>
    %9 = tpu.matmul %8, %0, %cst_8 {dimension_numbers = #tpu.dot_dimension_numbers<[1], [0], [0], [1], [0, 0, 1, 1], [], []>} : vector<512x9xbf16>, vector<9x32xbf16>, vector<512x32xf32> -> vector<512x32xf32>
    %10 = vector.broadcast %1 : vector<1x32xf32> to vector<512x32xf32>
    %11 = arith.addf %9, %10 : vector<512x32xf32>
    %cst_9 = arith.constant 0.000000e+00 : f32
    %12 = vector.broadcast %cst_9 : f32 to vector<512x32xf32>
    %13 = arith.maximumf %11, %12 : vector<512x32xf32>
    %14 = arith.maximumf %7, %13 : vector<512x32xf32>
    %c0_10 = arith.constant 0 : index
    %c0_11 = arith.constant 0 : index
    %15 = vector.load %arg2[%c0_10, %c0_11] : memref<512x9xbf16, #tpu.memory_space<vmem>>, vector<512x9xbf16>
    %cst_12 = arith.constant dense<0.000000e+00> : vector<512x32xf32>
    %16 = tpu.matmul %15, %0, %cst_12 {dimension_numbers = #tpu.dot_dimension_numbers<[1], [0], [0], [1], [0, 0, 1, 1], [], []>} : vector<512x9xbf16>, vector<9x32xbf16>, vector<512x32xf32> -> vector<512x32xf32>
    %17 = vector.broadcast %1 : vector<1x32xf32> to vector<512x32xf32>
    %18 = arith.addf %16, %17 : vector<512x32xf32>
    %cst_13 = arith.constant 0.000000e+00 : f32
    %19 = vector.broadcast %cst_13 : f32 to vector<512x32xf32>
    %20 = arith.maximumf %18, %19 : vector<512x32xf32>
    %c0_14 = arith.constant 0 : index
    %c0_15 = arith.constant 0 : index
    %21 = vector.load %arg3[%c0_14, %c0_15] : memref<512x9xbf16, #tpu.memory_space<vmem>>, vector<512x9xbf16>
    %cst_16 = arith.constant dense<0.000000e+00> : vector<512x32xf32>
    %22 = tpu.matmul %21, %0, %cst_16 {dimension_numbers = #tpu.dot_dimension_numbers<[1], [0], [0], [1], [0, 0, 1, 1], [], []>} : vector<512x9xbf16>, vector<9x32xbf16>, vector<512x32xf32> -> vector<512x32xf32>
    %23 = vector.broadcast %1 : vector<1x32xf32> to vector<512x32xf32>
    %24 = arith.addf %22, %23 : vector<512x32xf32>
    %cst_17 = arith.constant 0.000000e+00 : f32
    %25 = vector.broadcast %cst_17 : f32 to vector<512x32xf32>
    %26 = arith.maximumf %24, %25 : vector<512x32xf32>
    %27 = arith.maximumf %20, %26 : vector<512x32xf32>
    %28 = arith.maximumf %14, %27 : vector<512x32xf32>
    %29 = arith.truncf %28 : vector<512x32xf32> to vector<512x32xbf16>
    %c0_18 = arith.constant 0 : index
    %c0_19 = arith.constant 0 : index
    %30 = vector.load %arg6[%c0_18, %c0_19] : memref<512x32xbf16, #tpu.memory_space<vmem>>, vector<512x32xbf16>
    tpu.vector_store %arg6[%c0_18, %c0_19], %29 {strides = array<i32>} : memref<512x32xbf16, #tpu.memory_space<vmem>>, vector<512x32xbf16>,
    return
  }
}

module attributes {stable_mosaic.version = 11 : i64} {
  func.func @_conv_relu_pool_kernel(%arg0: memref<72x800xbf16, #tpu.memory_space<vmem>>, %arg1: memref<72x800xbf16, #tpu.memory_space<vmem>>, %arg2: memref<72x800xbf16, #tpu.memory_space<vmem>>, %arg3: memref<72x800xbf16, #tpu.memory_space<vmem>>, %arg4: memref<800x64xbf16, #tpu.memory_space<vmem>>, %arg5: memref<1x64xf32, #tpu.memory_space<vmem>>, %arg6: memref<72x64xbf16, #tpu.memory_space<vmem>>) attributes {dimension_semantics = [], scalar_prefetch = 0 : i64, scratch_operands = 0 : i64, tpu.core_type = #tpu.core_type<tc>} {
    %c0 = arith.constant 0 : index
    %c0_0 = arith.constant 0 : index
    %0 = vector.load %arg4[%c0, %c0_0] : memref<800x64xbf16, #tpu.memory_space<vmem>>, vector<800x64xbf16>
    %c0_1 = arith.constant 0 : index
    %c0_2 = arith.constant 0 : index
    %1 = vector.load %arg5[%c0_1, %c0_2] : memref<1x64xf32, #tpu.memory_space<vmem>>, vector<1x64xf32>
    %c0_3 = arith.constant 0 : index
    %c0_4 = arith.constant 0 : index
    %2 = vector.load %arg0[%c0_3, %c0_4] : memref<72x800xbf16, #tpu.memory_space<vmem>>, vector<72x800xbf16>
    %cst = arith.constant dense<0.000000e+00> : vector<72x64xf32>
    %3 = tpu.matmul %2, %0, %cst {dimension_numbers = #tpu.dot_dimension_numbers<[1], [0], [0], [1], [0, 0, 1, 1], [], []>} : vector<72x800xbf16>, vector<800x64xbf16>, vector<72x64xf32> -> vector<72x64xf32>
    %4 = vector.broadcast %1 : vector<1x64xf32> to vector<72x64xf32>
    %5 = arith.addf %3, %4 : vector<72x64xf32>
    %cst_5 = arith.constant 0.000000e+00 : f32
    %6 = vector.broadcast %cst_5 : f32 to vector<72x64xf32>
    %7 = arith.maximumf %5, %6 : vector<72x64xf32>
    %c0_6 = arith.constant 0 : index
    %c0_7 = arith.constant 0 : index
    %8 = vector.load %arg1[%c0_6, %c0_7] : memref<72x800xbf16, #tpu.memory_space<vmem>>, vector<72x800xbf16>
    %cst_8 = arith.constant dense<0.000000e+00> : vector<72x64xf32>
    %9 = tpu.matmul %8, %0, %cst_8 {dimension_numbers = #tpu.dot_dimension_numbers<[1], [0], [0], [1], [0, 0, 1, 1], [], []>} : vector<72x800xbf16>, vector<800x64xbf16>, vector<72x64xf32> -> vector<72x64xf32>
    %10 = vector.broadcast %1 : vector<1x64xf32> to vector<72x64xf32>
    %11 = arith.addf %9, %10 : vector<72x64xf32>
    %cst_9 = arith.constant 0.000000e+00 : f32
    %12 = vector.broadcast %cst_9 : f32 to vector<72x64xf32>
    %13 = arith.maximumf %11, %12 : vector<72x64xf32>
    %14 = arith.maximumf %7, %13 : vector<72x64xf32>
    %c0_10 = arith.constant 0 : index
    %c0_11 = arith.constant 0 : index
    %15 = vector.load %arg2[%c0_10, %c0_11] : memref<72x800xbf16, #tpu.memory_space<vmem>>, vector<72x800xbf16>
    %cst_12 = arith.constant dense<0.000000e+00> : vector<72x64xf32>
    %16 = tpu.matmul %15, %0, %cst_12 {dimension_numbers = #tpu.dot_dimension_numbers<[1], [0], [0], [1], [0, 0, 1, 1], [], []>} : vector<72x800xbf16>, vector<800x64xbf16>, vector<72x64xf32> -> vector<72x64xf32>
    %17 = vector.broadcast %1 : vector<1x64xf32> to vector<72x64xf32>
    %18 = arith.addf %16, %17 : vector<72x64xf32>
    %cst_13 = arith.constant 0.000000e+00 : f32
    %19 = vector.broadcast %cst_13 : f32 to vector<72x64xf32>
    %20 = arith.maximumf %18, %19 : vector<72x64xf32>
    %c0_14 = arith.constant 0 : index
    %c0_15 = arith.constant 0 : index
    %21 = vector.load %arg3[%c0_14, %c0_15] : memref<72x800xbf16, #tpu.memory_space<vmem>>, vector<72x800xbf16>
    %cst_16 = arith.constant dense<0.000000e+00> : vector<72x64xf32>
    %22 = tpu.matmul %21, %0, %cst_16 {dimension_numbers = #tpu.dot_dimension_numbers<[1], [0], [0], [1], [0, 0, 1, 1], [], []>} : vector<72x800xbf16>, vector<800x64xbf16>, vector<72x64xf32> -> vector<72x64xf32>
    %23 = vector.broadcast %1 : vector<1x64xf32> to vector<72x64xf32>
    %24 = arith.addf %22, %23 : vector<72x64xf32>
    %cst_17 = arith.constant 0.000000e+00 : f32
    %25 = vector.broadcast %cst_17 : f32 to vector<72x64xf32>
    %26 = arith.maximumf %24, %25 : vector<72x64xf32>
    %27 = arith.maximumf %20, %26 : vector<72x64xf32>
    %28 = arith.maximumf %14, %27 : vector<72x64xf32>
    %29 = arith.truncf %28 : vector<72x64xf32> to vector<72x64xbf16>
    %c0_18 = arith.constant 0 : index
    %c0_19 = arith.constant 0 : index
    %30 = vector.load %arg6[%c0_18, %c0_19] : memref<72x64xbf16, #tpu.memory_space<vmem>>, vector<72x64xbf16>
    tpu.vector_store %arg6[%c0_18, %c0_19], %29 {strides = array<i32>} : memref<72x64xbf16, #tpu.memory_space<vmem>>, vector<72x64xbf16>,
    return
  }
}

module attributes {stable_mosaic.version = 11 : i64} {
  func.func @_dense_head_kernel(%arg0: memref<2x2304xbf16, #tpu.memory_space<vmem>>, %arg1: memref<2304x128xbf16, #tpu.memory_space<vmem>>, %arg2: memref<1x128xf32, #tpu.memory_space<vmem>>, %arg3: memref<128x128xbf16, #tpu.memory_space<vmem>>, %arg4: memref<1x128xf32, #tpu.memory_space<vmem>>, %arg5: memref<128x1xbf16, #tpu.memory_space<vmem>>, %arg6: memref<1x1xf32, #tpu.memory_space<vmem>>, %arg7: memref<2x1xf32, #tpu.memory_space<vmem>>) attributes {dimension_semantics = [], scalar_prefetch = 0 : i64, scratch_operands = 0 : i64, tpu.core_type = #tpu.core_type<tc>} {
    %c0 = arith.constant 0 : index
    %c0_0 = arith.constant 0 : index
    %0 = vector.load %arg0[%c0, %c0_0] : memref<2x2304xbf16, #tpu.memory_space<vmem>>, vector<2x2304xbf16>
    %c0_1 = arith.constant 0 : index
    %c0_2 = arith.constant 0 : index
    %1 = vector.load %arg1[%c0_1, %c0_2] : memref<2304x128xbf16, #tpu.memory_space<vmem>>, vector<2304x128xbf16>
    %cst = arith.constant dense<0.000000e+00> : vector<2x128xf32>
    %2 = tpu.matmul %0, %1, %cst {dimension_numbers = #tpu.dot_dimension_numbers<[1], [0], [0], [1], [0, 0, 1, 1], [], []>} : vector<2x2304xbf16>, vector<2304x128xbf16>, vector<2x128xf32> -> vector<2x128xf32>
    %c0_3 = arith.constant 0 : index
    %c0_4 = arith.constant 0 : index
    %3 = vector.load %arg2[%c0_3, %c0_4] : memref<1x128xf32, #tpu.memory_space<vmem>>, vector<1x128xf32>
    %4 = vector.broadcast %3 : vector<1x128xf32> to vector<2x128xf32>
    %5 = arith.addf %2, %4 : vector<2x128xf32>
    %cst_5 = arith.constant 0.000000e+00 : f32
    %6 = vector.broadcast %cst_5 : f32 to vector<2x128xf32>
    %7 = arith.maximumf %5, %6 : vector<2x128xf32>
    %8 = arith.truncf %7 : vector<2x128xf32> to vector<2x128xbf16>
    %c0_6 = arith.constant 0 : index
    %c0_7 = arith.constant 0 : index
    %9 = vector.load %arg3[%c0_6, %c0_7] : memref<128x128xbf16, #tpu.memory_space<vmem>>, vector<128x128xbf16>
    %cst_8 = arith.constant dense<0.000000e+00> : vector<2x128xf32>
    %10 = tpu.matmul %8, %9, %cst_8 {dimension_numbers = #tpu.dot_dimension_numbers<[1], [0], [0], [1], [0, 0, 1, 1], [], []>} : vector<2x128xbf16>, vector<128x128xbf16>, vector<2x128xf32> -> vector<2x128xf32>
    %c0_9 = arith.constant 0 : index
    %c0_10 = arith.constant 0 : index
    %11 = vector.load %arg4[%c0_9, %c0_10] : memref<1x128xf32, #tpu.memory_space<vmem>>, vector<1x128xf32>
    %12 = vector.broadcast %11 : vector<1x128xf32> to vector<2x128xf32>
    %13 = arith.addf %10, %12 : vector<2x128xf32>
    %cst_11 = arith.constant 0.000000e+00 : f32
    %14 = vector.broadcast %cst_11 : f32 to vector<2x128xf32>
    %15 = arith.maximumf %13, %14 : vector<2x128xf32>
    %16 = arith.truncf %15 : vector<2x128xf32> to vector<2x128xbf16>
    %c0_12 = arith.constant 0 : index
    %c0_13 = arith.constant 0 : index
    %17 = vector.load %arg5[%c0_12, %c0_13] : memref<128x1xbf16, #tpu.memory_space<vmem>>, vector<128x1xbf16>
    %cst_14 = arith.constant dense<0.000000e+00> : vector<2x1xf32>
    %18 = tpu.matmul %16, %17, %cst_14 {dimension_numbers = #tpu.dot_dimension_numbers<[1], [0], [0], [1], [0, 0, 1, 1], [], []>} : vector<2x128xbf16>, vector<128x1xbf16>, vector<2x1xf32> -> vector<2x1xf32>
    %c0_15 = arith.constant 0 : index
    %c0_16 = arith.constant 0 : index
    %19 = vector.load %arg6[%c0_15, %c0_16] : memref<1x1xf32, #tpu.memory_space<vmem>>, vector<1x1xf32>
    %20 = vector.broadcast %19 : vector<1x1xf32> to vector<2x1xf32>
    %21 = arith.addf %18, %20 : vector<2x1xf32>
    %cst_17 = arith.constant 0.000000e+00 : f32
    %22 = vector.broadcast %cst_17 : f32 to vector<2x1xf32>
    %23 = arith.subf %22, %21 : vector<2x1xf32>
    %24 = math.exp %23 : vector<2x1xf32>
    %cst_18 = arith.constant 1.000000e+00 : f32
    %25 = vector.broadcast %cst_18 : f32 to vector<2x1xf32>
    %26 = arith.addf %25, %24 : vector<2x1xf32>
    %27 = tpu.reciprocal %26 {approx = true} : vector<2x1xf32> -> vector<2x1xf32>
    %c0_19 = arith.constant 0 : index
    %c0_20 = arith.constant 0 : index
    %28 = vector.load %arg7[%c0_19, %c0_20] : memref<2x1xf32, #tpu.memory_space<vmem>>, vector<2x1xf32>
    tpu.vector_store %arg7[%c0_19, %c0_20], %27 {strides = array<i32>} : memref<2x1xf32, #tpu.memory_space<vmem>>, vector<2x1xf32>,
    return
  }
}

</mosaic_0001>

<bundles_post_ra>
// kernel: malan_net_forward.3
= control target key start
LH: loop header
LB: loop body
LE: loop exit
PB: predicated region body
PF: predicated region fallthrough
CT: control target
= control target key end

     0   :  { %vm359_vm0 = vcmask 1043456   ;;  %vm360_vm1 = vcmask 1044480   ;;  %vm262_vm2 = vcmask 72704   ;;  %v4169_v1 = vmov 65535   ;;  %s5439_s4 = inlined_call_operand.vmem [shape: bf16[9,32], index: 4, kind: input, shape index: {}]   ;;  %s5440_s0 = inlined_call_operand.vmem [shape: bf16[512,9], index: 0, kind: input, shape index: {}]   ;;  %s5441_s1 = inlined_call_operand.vmem [shape: bf16[512,9], index: 1, kind: input, shape index: {}]   ;;  %s5442_s2 = inlined_call_operand.vmem [shape: bf16[512,9], index: 2, kind: input, shape index: {}]   ;;  %s5443_s3 = inlined_call_operand.vmem [shape: bf16[512,9], index: 3, kind: input, shape index: {}]   ;;  %s5444_s5 = inlined_call_operand.vmem [shape: f32[1,32], index: 5, kind: input, shape index: {}]   ;;  %s5445_s6 = inlined_call_operand.vmem [shape: bf16[512,32], index: 6, kind: output, shape index: {}]  }
   0x1   :  { %v4038_v0 = vld [vmem:[%s5439_s4] sm:$0x1f]   ;;  %v361_v2 = vsel %vm359_vm0, 4294967295, %v4169_v1  ;;  %v4041_v7 = vld [vmem:[%s5440_s0 + $0x8] sm:$0xff]   ;;  %v4043_v9 = vld [vmem:[%s5440_s0 + $0x10] sm:$0xff]   ;;  %vm3186_vm3 = vcmask 257024  }
   0x2   :  { %v4039_v3 = vld [vmem:[%s5440_s0] sm:$0xff]   ;;  %v362_v4 = vsel %vm360_vm1, %v361_v2, 0  ;;  %v4042_v8 = vld [vmem:[%s5441_s1 + $0x8] sm:$0xff]   ;;  %v4044_v10 = vld [vmem:[%s5441_s1 + $0x10] sm:$0xff]  }
   0x3   :  { %v4040_v5 = vld [vmem:[%s5441_s1] sm:$0xff]   ;;  %v364_v6 = vand.u32 %v4038_v0, %v362_v4  ;;  %3775 = vmatprep.mubr.msk.bf16.mxu0 %vm262_vm2, %v4039_v3  ;;  %v4045_v11 = vld [vmem:[%s5440_s0 + $0x18] sm:$0xff]   ;;  %v4049_v15 = vld [vmem:[%s5440_s0 + $0x28] sm:$0xff]  }
   0x4   :  { %3841 = vmatprep.mubr.msk.bf16.mxu1 %vm262_vm2, %v4040_v5  ;;  %v4046_v12 = vld [vmem:[%s5441_s1 + $0x18] sm:$0xff]   ;;  %v4047_v13 = vld [vmem:[%s5440_s0 + $0x20] sm:$0xff]   ;;  %v4050_v16 = vld [vmem:[%s5441_s1 + $0x28] sm:$0xff]  }
   0x5   :  { %3773 = vmatprep.subr.bf16.mxu0 %v364_v6  ;;  %3839 = vmatprep.subr.bf16.mxu1 %v364_v6  ;;  %v4048_v14 = vld [vmem:[%s5441_s1 + $0x20] sm:$0xff]   ;;  %v4051_v17 = vld [vmem:[%s5440_s0 + $0x30] sm:$0xff]   ;;  %v4053_v19 = vld [vmem:[%s5440_s0 + $0x38] sm:$0xff]  }
   0x6   :  { %3774 = vmatpush3.bf16.msra.mxu0 %v364_v6  ;;  %3840 = vmatpush3.bf16.msra.mxu1 %v364_v6  ;;  %v4052_v18 = vld [vmem:[%s5441_s1 + $0x30] sm:$0xff]   ;;  %v4054_v20 = vld [vmem:[%s5441_s1 + $0x38] sm:$0xff]   ;;  %v4055_v21 = vld [vmem:[%s5440_s0 + $0x40] sm:$0xff]  }
   0x7   :  { %3905 = vmatprep.subr.bf16.mxu0 %v364_v6  ;;  %3971 = vmatprep.subr.bf16.mxu1 %v364_v6  ;;  %v4056_v22 = vld [vmem:[%s5441_s1 + $0x40] sm:$0xff]   ;;  %v4057_v23 = vld [vmem:[%s5440_s0 + $0x48] sm:$0xff]   ;;  %v4059_v25 = vld [vmem:[%s5440_s0 + $0x50] sm:$0xff]  }
   0x8   :  { %v4058_v24 = vld [vmem:[%s5441_s1 + $0x48] sm:$0xff]   ;;  %v4060_v26 = vld [vmem:[%s5441_s1 + $0x50] sm:$0xff]   ;;  %v4061_v27 = vld [vmem:[%s5440_s0 + $0x58] sm:$0xff]  }
   0x9   :  { %3776 = vmatmul.mubr.msk.bf16.vlgmr.msra.gmra.mrb[0].mxu0 %vm262_vm2, %v4041_v7  ;;  %3842 = vmatmul.mubr.msk.bf16.vlgmr.msra.gmra.mrb[0].mxu1 %vm262_vm2, %v4042_v8  ;;  %v4062_v28 = vld [vmem:[%s5441_s1 + $0x58] sm:$0xff]   ;;  %v4063_v29 = vld [vmem:[%s5440_s0 + $0x60] sm:$0xff]   ;;  %v4065_v31 = vld [vmem:[%s5440_s0 + $0x68] sm:$0xff]  }
   0xa   :  { %3906 = vmatpush3.bf16.msra.mxu0 %v364_v6  ;;  %3972 = vmatpush3.bf16.msra.mxu1 %v364_v6  ;;  %v4064_v30 = vld [vmem:[%s5441_s1 + $0x60] sm:$0xff]   ;;  %v4066_v32 = vld [vmem:[%s5441_s1 + $0x68] sm:$0xff]   ;;  %v4067_v33 = vld [vmem:[%s5440_s0 + $0x70] sm:$0xff]  }
   0xb   :  { %3779 = vmatprep.mubr.msk.bf16.mxu0 %vm262_vm2, %v4043_v9  ;;  %3845 = vmatprep.mubr.msk.bf16.mxu1 %vm262_vm2, %v4044_v10  ;;  %v4068_v34 = vld [vmem:[%s5441_s1 + $0x70] sm:$0xff]   ;;  %v4069_v35 = vld [vmem:[%s5440_s0 + $0x78] sm:$0xff]   ;;  %v4071_v37 = vld [vmem:[%s5440_s0 + $0x80] sm:$0xff]  }
   0xc   :  { %v4070_v36 = vld [vmem:[%s5441_s1 + $0x78] sm:$0xff]   ;;  %v4072_v38 = vld [vmem:[%s5441_s1 + $0x80] sm:$0xff]   ;;  %v4073_v39 = vld [vmem:[%s5440_s0 + $0x88] sm:$0xff]  }
   0xd   :  { %v4074_v40 = vld [vmem:[%s5441_s1 + $0x88] sm:$0xff]   ;;  %v4075_v41 = vld [vmem:[%s5440_s0 + $0x90] sm:$0xff]   ;;  %v4077_v43 = vld [vmem:[%s5440_s0 + $0x98] sm:$0xff]  }
   0xe   :  { %v4076_v42 = vld [vmem:[%s5441_s1 + $0x90] sm:$0xff]   ;;  %v4078_v44 = vld [vmem:[%s5441_s1 + $0x98] sm:$0xff]   ;;  %v4079_v45 = vld [vmem:[%s5440_s0 + $0xa0] sm:$0xff]  }
   0xf   :  { %v4080_v46 = vld [vmem:[%s5441_s1 + $0xa0] sm:$0xff]   ;;  %v4081_v47 = vld [vmem:[%s5440_s0 + $0xa8] sm:$0xff]   ;;  %v4083_v49 = vld [vmem:[%s5440_s0 + $0xb0] sm:$0xff]  }
  0x10   :  { %v4082_v48 = vld [vmem:[%s5441_s1 + $0xa8] sm:$0xff]   ;;  %v4084_v50 = vld [vmem:[%s5441_s1 + $0xb0] sm:$0xff]   ;;  %v4085_v51 = vld [vmem:[%s5440_s0 + $0xb8] sm:$0xff]  }
  0x11   :  { %3780 = vmatmul.mubr.msk.bf16.gmra.mrb[4].mxu0 %vm262_vm2, %v4045_v11  ;;  %3846 = vmatmul.mubr.msk.bf16.gmra.mrb[4].mxu1 %vm262_vm2, %v4046_v12  ;;  %v4086_v52 = vld [vmem:[%s5441_s1 + $0xb8] sm:$0xff]   ;;  %v4087_v53 = vld [vmem:[%s5440_s0 + $0xc0] sm:$0xff]   ;;  %v4089_v55 = vld [vmem:[%s5440_s0 + $0xc8] sm:$0xff]  }
  0x12   :  { %3783 = vmatprep.mubr.msk.bf16.mxu0 %vm262_vm2, %v4047_v13  ;;  %3849 = vmatprep.mubr.msk.bf16.mxu1 %vm262_vm2, %v4048_v14  ;;  %v4088_v54 = vld [vmem:[%s5441_s1 + $0xc0] sm:$0xff]   ;;  %v4090_v56 = vld [vmem:[%s5441_s1 + $0xc8] sm:$0xff]   ;;  %v4091_v57 = vld [vmem:[%s5440_s0 + $0xd0] sm:$0xff]  }
  0x13   :  { %v4092_v58 = vld [vmem:[%s5441_s1 + $0xd0] sm:$0xff]   ;;  %v4093_v59 = vld [vmem:[%s5440_s0 + $0xd8] sm:$0xff]   ;;  %v4095_v61 = vld [vmem:[%s5440_s0 + $0xe0] sm:$0xff]  }
  0x14   :  { %v4094_v60 = vld [vmem:[%s5441_s1 + $0xd8] sm:$0xff]   ;;  %v4096_v62 = vld [vmem:[%s5441_s1 + $0xe0] sm:$0xff]   ;;  %v4097_v63 = vld [vmem:[%s5440_s0 + $0xe8] sm:$0xff]  }
  0x15   :  { %v4098_v0 = vld [vmem:[%s5441_s1 + $0xe8] sm:$0xff]   ;;  %v4099_v1 = vld [vmem:[%s5440_s0 + $0xf0] sm:$0xff]   ;;  %v4101_v3 = vld [vmem:[%s5440_s0 + $0xf8] sm:$0xff]  }
  0x16   :  { %v4100_v2 = vld [vmem:[%s5441_s1 + $0xf0] sm:$0xff]   ;;  %v4102_v4 = vld [vmem:[%s5441_s1 + $0xf8] sm:$0xff]   ;;  %v4103_v5 = vld [vmem:[%s5442_s2] sm:$0xff]  }
  0x17   :  { %v4104_v6 = vld [vmem:[%s5443_s3] sm:$0xff]   ;;  %v4105_v7 = vld [vmem:[%s5442_s2 + $0x8] sm:$0xff]   ;;  %v4107_v9 = vld [vmem:[%s5442_s2 + $0x10] sm:$0xff]  }
  0x18   :  { %v4106_v8 = vld [vmem:[%s5443_s3 + $0x8] sm:$0xff]   ;;  %v4108_v10 = vld [vmem:[%s5443_s3 + $0x10] sm:$0xff]   ;;  %v4109_v11 = vld [vmem:[%s5442_s2 + $0x18] sm:$0xff]  }
  0x19   :  { %3784 = vmatmul.mubr.msk.bf16.gmra.mrb[8].mxu0 %vm262_vm2, %v4049_v15  ;;  %3850 = vmatmul.mubr.msk.bf16.gmra.mrb[8].mxu1 %vm262_vm2, %v4050_v16  ;;  %v4110_v12 = vld [vmem:[%s5443_s3 + $0x18] sm:$0xff]   ;;  %v4111_v13 = vld [vmem:[%s5442_s2 + $0x20] sm:$0xff]   ;;  %v4113_v15 = vld [vmem:[%s5442_s2 + $0x28] sm:$0xff]  }
  0x1a   :  { %3787 = vmatprep.mubr.msk.bf16.mxu0 %vm262_vm2, %v4051_v17  ;;  %3853 = vmatprep.mubr.msk.bf16.mxu1 %vm262_vm2, %v4052_v18  ;;  %v4112_v14 = vld [vmem:[%s5443_s3 + $0x20] sm:$0xff]   ;;  %v4114_v16 = vld [vmem:[%s5443_s3 + $0x28] sm:$0xff]   ;;  %v4115_v17 = vld [vmem:[%s5442_s2 + $0x30] sm:$0xff]  }
  0x1b   :  { %v4116_v18 = vld [vmem:[%s5443_s3 + $0x30] sm:$0xff]  }
  0x21   :  { %3788 = vmatmul.mubr.msk.bf16.gmra.mrb[12].mxu0 %vm262_vm2, %v4053_v19  ;;  %3854 = vmatmul.mubr.msk.bf16.gmra.mrb[12].mxu1 %vm262_vm2, %v4054_v20  ;;  %v4117_v19 = vld [vmem:[%s5442_s2 + $0x38] sm:$0xff]  }
  0x22   :  { %3791 = vmatprep.mubr.msk.bf16.mxu0 %vm262_vm2, %v4055_v21  ;;  %3857 = vmatprep.mubr.msk.bf16.mxu1 %vm262_vm2, %v4056_v22  ;;  %v4118_v20 = vld [vmem:[%s5443_s3 + $0x38] sm:$0xff]   ;;  %v4119_v21 = vld [vmem:[%s5442_s2 + $0x40] sm:$0xff]  }
  0x23   :  { %v4120_v22 = vld [vmem:[%s5443_s3 + $0x40] sm:$0xff]  }
  0x29   :  { %3792 = vmatmul.mubr.msk.bf16.gmra.mrb[16].mxu0 %vm262_vm2, %v4057_v23  ;;  %3858 = vmatmul.mubr.msk.bf16.gmra.mrb[16].mxu1 %vm262_vm2, %v4058_v24  ;;  %v4121_v23 = vld [vmem:[%s5442_s2 + $0x48] sm:$0xff]  }
  0x2a   :  { %3795 = vmatprep.mubr.msk.bf16.mxu0 %vm262_vm2, %v4059_v25  ;;  %3861 = vmatprep.mubr.msk.bf16.mxu1 %vm262_vm2, %v4060_v26  ;;  %v4122_v24 = vld [vmem:[%s5443_s3 + $0x48] sm:$0xff]   ;;  %v4123_v25 = vld [vmem:[%s5442_s2 + $0x50] sm:$0xff]  }
  0x2b   :  { %v4124_v26 = vld [vmem:[%s5443_s3 + $0x50] sm:$0xff]  }
  0x31   :  { %3796 = vmatmul.mubr.msk.bf16.gmra.mrb[20].mxu0 %vm262_vm2, %v4061_v27  ;;  %3862 = vmatmul.mubr.msk.bf16.gmra.mrb[20].mxu1 %vm262_vm2, %v4062_v28  ;;  %v4125_v27 = vld [vmem:[%s5442_s2 + $0x58] sm:$0xff]  }
  0x32   :  { %3799 = vmatprep.mubr.msk.bf16.mxu0 %vm262_vm2, %v4063_v29  ;;  %3865 = vmatprep.mubr.msk.bf16.mxu1 %vm262_vm2, %v4064_v30  ;;  %v4126_v28 = vld [vmem:[%s5443_s3 + $0x58] sm:$0xff]   ;;  %v4127_v29 = vld [vmem:[%s5442_s2 + $0x60] sm:$0xff]  }
  0x33   :  { %v4128_v30 = vld [vmem:[%s5443_s3 + $0x60] sm:$0xff]  }
  0x39   :  { %3800 = vmatmul.mubr.msk.bf16.gmra.mrb[24].mxu0 %vm262_vm2, %v4065_v31  ;;  %3866 = vmatmul.mubr.msk.bf16.gmra.mrb[24].mxu1 %vm262_vm2, %v4066_v32  ;;  %v4129_v31 = vld [vmem:[%s5442_s2 + $0x68] sm:$0xff]  }
  0x3a   :  { %3803 = vmatprep.mubr.msk.bf16.mxu0 %vm262_vm2, %v4067_v33  ;;  %3869 = vmatprep.mubr.msk.bf16.mxu1 %vm262_vm2, %v4068_v34  ;;  %v4130_v32 = vld [vmem:[%s5443_s3 + $0x68] sm:$0xff]   ;;  %v4131_v33 = vld [vmem:[%s5442_s2 + $0x70] sm:$0xff]  }
  0x3b   :  { %v4132_v34 = vld [vmem:[%s5443_s3 + $0x70] sm:$0xff]  }
  0x41   :  { %3804 = vmatmul.mubr.msk.bf16.gmra.mrb[28].mxu0 %vm262_vm2, %v4069_v35  ;;  %3870 = vmatmul.mubr.msk.bf16.gmra.mrb[28].mxu1 %vm262_vm2, %v4070_v36  ;;  %v4133_v35 = vld [vmem:[%s5442_s2 + $0x78] sm:$0xff]  }
  0x42   :  { %3807 = vmatprep.mubr.msk.bf16.mxu0 %vm262_vm2, %v4071_v37  ;;  %3873 = vmatprep.mubr.msk.bf16.mxu1 %vm262_vm2, %v4072_v38  ;;  %v4134_v36 = vld [vmem:[%s5443_s3 + $0x78] sm:$0xff]   ;;  %v4135_v37 = vld [vmem:[%s5442_s2 + $0x80] sm:$0xff]  }
  0x43   :  { %v4136_v38 = vld [vmem:[%s5443_s3 + $0x80] sm:$0xff]  }
  0x49   :  { %3808 = vmatmul.mubr.msk.bf16.gmra.mrb[32].mxu0 %vm262_vm2, %v4073_v39  ;;  %3874 = vmatmul.mubr.msk.bf16.gmra.mrb[32].mxu1 %vm262_vm2, %v4074_v40  ;;  %v4137_v39 = vld [vmem:[%s5442_s2 + $0x88] sm:$0xff]  }
  0x4a   :  { %3811 = vmatprep.mubr.msk.bf16.mxu0 %vm262_vm2, %v4075_v41  ;;  %3877 = vmatprep.mubr.msk.bf16.mxu1 %vm262_vm2, %v4076_v42  ;;  %v4138_v40 = vld [vmem:[%s5443_s3 + $0x88] sm:$0xff]   ;;  %v4139_v41 = vld [vmem:[%s5442_s2 + $0x90] sm:$0xff]  }
  0x4b   :  { %v4140_v42 = vld [vmem:[%s5443_s3 + $0x90] sm:$0xff]  }
  0x51   :  { %3812 = vmatmul.mubr.msk.bf16.gmra.mrb[36].mxu0 %vm262_vm2, %v4077_v43  ;;  %3878 = vmatmul.mubr.msk.bf16.gmra.mrb[36].mxu1 %vm262_vm2, %v4078_v44  ;;  %v4141_v43 = vld [vmem:[%s5442_s2 + $0x98] sm:$0xff]  }
  0x52   :  { %3815 = vmatprep.mubr.msk.bf16.mxu0 %vm262_vm2, %v4079_v45  ;;  %3881 = vmatprep.mubr.msk.bf16.mxu1 %vm262_vm2, %v4080_v46  ;;  %v4142_v44 = vld [vmem:[%s5443_s3 + $0x98] sm:$0xff]   ;;  %v4143_v45 = vld [vmem:[%s5442_s2 + $0xa0] sm:$0xff]  }
  0x53   :  { %v4144_v46 = vld [vmem:[%s5443_s3 + $0xa0] sm:$0xff]  }
  0x59   :  { %3816 = vmatmul.mubr.msk.bf16.gmra.mrb[40].mxu0 %vm262_vm2, %v4081_v47  ;;  %3882 = vmatmul.mubr.msk.bf16.gmra.mrb[40].mxu1 %vm262_vm2, %v4082_v48  ;;  %v4145_v47 = vld [vmem:[%s5442_s2 + $0xa8] sm:$0xff]  }
  0x5a   :  { %3819 = vmatprep.mubr.msk.bf16.mxu0 %vm262_vm2, %v4083_v49  ;;  %3885 = vmatprep.mubr.msk.bf16.mxu1 %vm262_vm2, %v4084_v50  ;;  %v4146_v48 = vld [vmem:[%s5443_s3 + $0xa8] sm:$0xff]   ;;  %v4147_v49 = vld [vmem:[%s5442_s2 + $0xb0] sm:$0xff]  }
  0x5b   :  { %v4148_v50 = vld [vmem:[%s5443_s3 + $0xb0] sm:$0xff]  }
  0x61   :  { %3820 = vmatmul.mubr.msk.bf16.gmra.mrb[44].mxu0 %vm262_vm2, %v4085_v51  ;;  %3886 = vmatmul.mubr.msk.bf16.gmra.mrb[44].mxu1 %vm262_vm2, %v4086_v52  ;;  %v4649_v51 = vld [vmem:[%s5444_s5] ss:$0 sm:$0xff] }
  0x62   :  { %3823 = vmatprep.mubr.msk.bf16.mxu0 %vm262_vm2, %v4087_v53  ;;  %3889 = vmatprep.mubr.msk.bf16.mxu1 %vm262_vm2, %v4088_v54 }
  0x69   :  { %3824 = vmatmul.mubr.msk.bf16.gmra.mrb[48].mxu0 %vm262_vm2, %v4089_v55  ;;  %3890 = vmatmul.mubr.msk.bf16.gmra.mrb[48].mxu1 %vm262_vm2, %v4090_v56 }
  0x6a   :  { %3827 = vmatprep.mubr.msk.bf16.mxu0 %vm262_vm2, %v4091_v57  ;;  %3893 = vmatprep.mubr.msk.bf16.mxu1 %vm262_vm2, %v4092_v58  ;;  %v4149_v58 = vld [vmem:[%s5442_s2 + $0xb8] sm:$0xff]  }
  0x71   :  { %3828 = vmatmul.mubr.msk.bf16.gmra.mrb[52].mxu0 %vm262_vm2, %v4093_v59  ;;  %3894 = vmatmul.mubr.msk.bf16.gmra.mrb[52].mxu1 %vm262_vm2, %v4094_v60  ;;  %v4150_v59 = vld [vmem:[%s5443_s3 + $0xb8] sm:$0xff]  }
  0x72   :  { %3831 = vmatprep.mubr.msk.bf16.mxu0 %vm262_vm2, %v4095_v61  ;;  %3897 = vmatprep.mubr.msk.bf16.mxu1 %vm262_vm2, %v4096_v62 }
  0x79   :  { %3832 = vmatmul.mubr.msk.bf16.gmra.mrb[56].mxu0 %vm262_vm2, %v4097_v63  ;;  %3898 = vmatmul.mubr.msk.bf16.gmra.mrb[56].mxu1 %vm262_vm2, %v4098_v0  ;;  %v4151_v0 = vld [vmem:[%s5442_s2 + $0xc0] sm:$0xff]  }
  0x7a   :  { %3835 = vmatprep.mubr.msk.bf16.mxu0 %vm262_vm2, %v4099_v1  ;;  %3901 = vmatprep.mubr.msk.bf16.mxu1 %vm262_vm2, %v4100_v2  ;;  %v4152_v1 = vld [vmem:[%s5443_s3 + $0xc0] sm:$0xff]  }
  0x81   :  { %3836 = vmatmul.mubr.msk.bf16.gmra.mrb[60].mxu0 %vm262_vm2, %v4101_v3  ;;  %3902 = vmatmul.mubr.msk.bf16.gmra.mrb[60].mxu1 %vm262_vm2, %v4102_v4 }
  0x82   :  { %3907 = vmatprep.mubr.msk.bf16.mxu0 %vm262_vm2, %v4103_v5  ;;  %3973 = vmatprep.mubr.msk.bf16.mxu1 %vm262_vm2, %v4104_v6 }
  0x89   :  { %3908 = vmatmul.mubr.msk.bf16.vlgmr.msra.gmra.mrb[64].mxu0 %vm262_vm2, %v4105_v7  ;;  %3974 = vmatmul.mubr.msk.bf16.vlgmr.msra.gmra.mrb[64].mxu1 %vm262_vm2, %v4106_v8 }
  0x8a   :  { %3911 = vmatprep.mubr.msk.bf16.mxu0 %vm262_vm2, %v4107_v9  ;;  %3977 = vmatprep.mubr.msk.bf16.mxu1 %vm262_vm2, %v4108_v10 }
  0x91   :  { %3912 = vmatmul.mubr.msk.bf16.gmra.mrb[68].mxu0 %vm262_vm2, %v4109_v11  ;;  %3978 = vmatmul.mubr.msk.bf16.gmra.mrb[68].mxu1 %vm262_vm2, %v4110_v12 }
  0x92   :  { %3915 = vmatprep.mubr.msk.bf16.mxu0 %vm262_vm2, %v4111_v13  ;;  %3981 = vmatprep.mubr.msk.bf16.mxu1 %vm262_vm2, %v4112_v14 }
  0x99   :  { %3916 = vmatmul.mubr.msk.bf16.gmra.mrb[72].mxu0 %vm262_vm2, %v4113_v15  ;;  %3982 = vmatmul.mubr.msk.bf16.gmra.mrb[72].mxu1 %vm262_vm2, %v4114_v16 }
  0x9a   :  { %3919 = vmatprep.mubr.msk.bf16.mxu0 %vm262_vm2, %v4115_v17  ;;  %3985 = vmatprep.mubr.msk.bf16.mxu1 %vm262_vm2, %v4116_v18 }
  0xa1   :  { %3920 = vmatmul.mubr.msk.bf16.gmra.mrb[76].mxu0 %vm262_vm2, %v4117_v19  ;;  %3986 = vmatmul.mubr.msk.bf16.gmra.mrb[76].mxu1 %vm262_vm2, %v4118_v20 }
  0xa2   :  { %3923 = vmatprep.mubr.msk.bf16.mxu0 %vm262_vm2, %v4119_v21  ;;  %3989 = vmatprep.mubr.msk.bf16.mxu1 %vm262_vm2, %v4120_v22 }
  0xa9   :  { %3924 = vmatmul.mubr.msk.bf16.gmra.mrb[80].mxu0 %vm262_vm2, %v4121_v23  ;;  %3990 = vmatmul.mubr.msk.bf16.gmra.mrb[80].mxu1 %vm262_vm2, %v4122_v24 }
  0xaa   :  { %3927 = vmatprep.mubr.msk.bf16.mxu0 %vm262_vm2, %v4123_v25  ;;  %3993 = vmatprep.mubr.msk.bf16.mxu1 %vm262_vm2, %v4124_v26  ;;  %v4153_v26 = vld [vmem:[%s5442_s2 + $0xc8] sm:$0xff]  }
  0xb1   :  { %3928 = vmatmul.mubr.msk.bf16.gmra.mrb[84].mxu0 %vm262_vm2, %v4125_v27  ;;  %3994 = vmatmul.mubr.msk.bf16.gmra.mrb[84].mxu1 %vm262_vm2, %v4126_v28  ;;  %v4154_v27 = vld [vmem:[%s5443_s3 + $0xc8] sm:$0xff]  }
  0xb2   :  { %3931 = vmatprep.mubr.msk.bf16.mxu0 %vm262_vm2, %v4127_v29  ;;  %3997 = vmatprep.mubr.msk.bf16.mxu1 %vm262_vm2, %v4128_v30 }
  0xb9   :  { %3932 = vmatmul.mubr.msk.bf16.gmra.mrb[88].mxu0 %vm262_vm2, %v4129_v31  ;;  %3998 = vmatmul.mubr.msk.bf16.gmra.mrb[88].mxu1 %vm262_vm2, %v4130_v32  ;;  %v4155_v32 = vld [vmem:[%s5442_s2 + $0xd0] sm:$0xff]  }
  0xba   :  { %3935 = vmatprep.mubr.msk.bf16.mxu0 %vm262_vm2, %v4131_v33  ;;  %4001 = vmatprep.mubr.msk.bf16.mxu1 %vm262_vm2, %v4132_v34  ;;  %v4156_v33 = vld [vmem:[%s5443_s3 + $0xd0] sm:$0xff]  }
  0xc1   :  { %3936 = vmatmul.mubr.msk.bf16.gmra.mrb[92].mxu0 %vm262_vm2, %v4133_v35  ;;  %4002 = vmatmul.mubr.msk.bf16.gmra.mrb[92].mxu1 %vm262_vm2, %v4134_v36 }
  0xc2   :  { %3939 = vmatprep.mubr.msk.bf16.mxu0 %vm262_vm2, %v4135_v37  ;;  %4005 = vmatprep.mubr.msk.bf16.mxu1 %vm262_vm2, %v4136_v38 }
  0xc9   :  { %3940 = vmatmul.mubr.msk.bf16.gmra.mrb[96].mxu0 %vm262_vm2, %v4137_v39  ;;  %4006 = vmatmul.mubr.msk.bf16.gmra.mrb[96].mxu1 %vm262_vm2, %v4138_v40 }
  0xca   :  { %3943 = vmatprep.mubr.msk.bf16.mxu0 %vm262_vm2, %v4139_v41  ;;  %4009 = vmatprep.mubr.msk.bf16.mxu1 %vm262_vm2, %v4140_v42 }
  0xd1   :  { %3944 = vmatmul.mubr.msk.bf16.gmra.mrb[100].mxu0 %vm262_vm2, %v4141_v43  ;;  %4010 = vmatmul.mubr.msk.bf16.gmra.mrb[100].mxu1 %vm262_vm2, %v4142_v44 }
  0xd2   :  { %3947 = vmatprep.mubr.msk.bf16.mxu0 %vm262_vm2, %v4143_v45  ;;  %4013 = vmatprep.mubr.msk.bf16.mxu1 %vm262_vm2, %v4144_v46 }
  0xd9   :  { %3948 = vmatmul.mubr.msk.bf16.gmra.mrb[104].mxu0 %vm262_vm2, %v4145_v47  ;;  %4014 = vmatmul.mubr.msk.bf16.gmra.mrb[104].mxu1 %vm262_vm2, %v4146_v48 }
  0xda   :  { %3951 = vmatprep.mubr.msk.bf16.mxu0 %vm262_vm2, %v4147_v49  ;;  %4017 = vmatprep.mubr.msk.bf16.mxu1 %vm262_vm2, %v4148_v50 }
  0xdc   :  { %v3777_v52 = vpop.f32.mrb[0].mxu0  ;;  %v3843_v53 = vpop.f32.mrb[0].mxu1 }
  0xdd   :  { %v409_v54 = vadd.f32 %v3777_v52, %v4649_v51  ;;  %v1082_v55 = vadd.f32 %v3843_v53, %v4649_v51  ;;  %v400_v56 = vpop.f32.mrb[1].mxu0  ;;  %v1073_v57 = vpop.f32.mrb[1].mxu1 }
  0xde   :  { %v401_v60 = vadd.f32 %v4649_v51, %v400_v56  ;;  %v1074_v61 = vadd.f32 %v4649_v51, %v1073_v57  ;;  %v3778_v62 = vpop.f32.mrb[2].mxu0  ;;  %v3844_v63 = vpop.f32.mrb[2].mxu1 }
  0xdf   :  { %v657_v2 = vmax.f32 %v409_v54, 0.0  ;;  %v1330_v3 = vmax.f32 %v1082_v55, 0.0  ;;  %v412_v4 = vadd.f32 %v3778_v62, %v4649_v51  ;;  %v1085_v5 = vadd.f32 %v3844_v63, %v4649_v51  ;;  %v403_v6 = vpop.f32.mrb[3].mxu0  ;;  %v1076_v7 = vpop.f32.mrb[3].mxu1 }
  0xe0   :  { %v655_v8 = vmax.f32 %v401_v60, 0.0  ;;  %v1328_v9 = vmax.f32 %v1074_v61, 0.0  ;;  %v404_v10 = vadd.f32 %v4649_v51, %v403_v6  ;;  %v1077_v11 = vadd.f32 %v4649_v51, %v1076_v7  ;;  %v4158_v60 = vld [vmem:[%s5443_s3 + $0xd8] sm:$0xff]  }
  0xe1   :  { %v4673_v12 = vmax.f32 %v657_v2, %v1330_v3  ;;  %v658_v13 = vmax.f32 %v412_v4, 0.0  ;;  %v1331_v14 = vmax.f32 %v1085_v5, 0.0  ;;  %3952 = vmatmul.mubr.msk.bf16.gmra.mrb[108].mxu0 %vm262_vm2, %v4149_v58  ;;  %4018 = vmatmul.mubr.msk.bf16.gmra.mrb[108].mxu1 %vm262_vm2, %v4150_v59  ;;  %v4157_v59 = vld [vmem:[%s5442_s2 + $0xd8] sm:$0xff]   ;;  %v4160_v2 = vld [vmem:[%s5443_s3 + $0xe0] sm:$0xff]  }
  0xe2   :  { %v4677_v15 = vmax.f32 %v655_v8, %v1328_v9  ;;  %v656_v16 = vmax.f32 %v404_v10, 0.0  ;;  %v1329_v17 = vmax.f32 %v1077_v11, 0.0  ;;  %3955 = vmatprep.mubr.msk.bf16.mxu0 %vm262_vm2, %v4151_v0  ;;  %4021 = vmatprep.mubr.msk.bf16.mxu1 %vm262_vm2, %v4152_v1  ;;  %v4159_v1 = vld [vmem:[%s5442_s2 + $0xe0] sm:$0xff]  }
  0xe3   :  { %v4681_v18 = vmax.f32 %v658_v13, %v1331_v14 }
  0xe4   :  { %v4683_v19 = vmax.f32 %v656_v16, %v1329_v17  ;;  %v3781_v20 = vpop.f32.mrb[4].mxu0  ;;  %v3847_v21 = vpop.f32.mrb[4].mxu1 }
  0xe5   :  { %v425_v22 = vadd.f32 %v3781_v20, %v4649_v51  ;;  %v1098_v23 = vadd.f32 %v3847_v21, %v4649_v51  ;;  %v416_v24 = vpop.f32.mrb[5].mxu0  ;;  %v1089_v25 = vpop.f32.mrb[5].mxu1 }
  0xe6   :  { %v417_v28 = vadd.f32 %v4649_v51, %v416_v24  ;;  %v1090_v29 = vadd.f32 %v4649_v51, %v1089_v25  ;;  %v3782_v30 = vpop.f32.mrb[6].mxu0  ;;  %v3848_v31 = vpop.f32.mrb[6].mxu1 }
  0xe7   :  { %v661_v34 = vmax.f32 %v425_v22, 0.0  ;;  %v1334_v35 = vmax.f32 %v1098_v23, 0.0  ;;  %v428_v36 = vadd.f32 %v3782_v30, %v4649_v51  ;;  %v1101_v37 = vadd.f32 %v3848_v31, %v4649_v51  ;;  %v419_v38 = vpop.f32.mrb[7].mxu0  ;;  %v1092_v39 = vpop.f32.mrb[7].mxu1  ;;  %v4161_v31 = vld [vmem:[%s5442_s2 + $0xe8] sm:$0xff]  }
  0xe8   :  { %v659_v40 = vmax.f32 %v417_v28, 0.0  ;;  %v1332_v41 = vmax.f32 %v1090_v29, 0.0  ;;  %v420_v42 = vadd.f32 %v4649_v51, %v419_v38  ;;  %v1093_v43 = vadd.f32 %v4649_v51, %v1092_v39  ;;  %v4164_v38 = vld [vmem:[%s5443_s3 + $0xf0] sm:$0xff]  }
  0xe9   :  { %v4705_v44 = vmax.f32 %v661_v34, %v1334_v35  ;;  %v662_v45 = vmax.f32 %v428_v36, 0.0  ;;  %v1335_v46 = vmax.f32 %v1101_v37, 0.0  ;;  %3956 = vmatmul.mubr.msk.bf16.gmra.mrb[112].mxu0 %vm262_vm2, %v4153_v26  ;;  %4022 = vmatmul.mubr.msk.bf16.gmra.mrb[112].mxu1 %vm262_vm2, %v4154_v27  ;;  %v4163_v37 = vld [vmem:[%s5442_s2 + $0xf0] sm:$0xff]  }
  0xea   :  { %v4709_v47 = vmax.f32 %v659_v40, %v1332_v41  ;;  %v660_v48 = vmax.f32 %v420_v42, 0.0  ;;  %v1333_v49 = vmax.f32 %v1093_v43, 0.0  ;;  %3959 = vmatprep.mubr.msk.bf16.mxu0 %vm262_vm2, %v4155_v32  ;;  %4025 = vmatprep.mubr.msk.bf16.mxu1 %vm262_vm2, %v4156_v33  ;;  %v4162_v32 = vld [vmem:[%s5443_s3 + $0xe8] sm:$0xff]  }
  0xeb   :  { %v4713_v50 = vmax.f32 %v662_v45, %v1335_v46 }
  0xec   :  { %v4715_v52 = vmax.f32 %v660_v48, %v1333_v49  ;;  %v3785_v53 = vpop.f32.mrb[8].mxu0  ;;  %v3851_v54 = vpop.f32.mrb[8].mxu1 }
  0xed   :  { %v441_v55 = vadd.f32 %v3785_v53, %v4649_v51  ;;  %v1114_v56 = vadd.f32 %v3851_v54, %v4649_v51  ;;  %v432_v57 = vpop.f32.mrb[9].mxu0  ;;  %v1105_v58 = vpop.f32.mrb[9].mxu1 }
  0xee   :  { %v433_v61 = vadd.f32 %v4649_v51, %v432_v57  ;;  %v1106_v62 = vadd.f32 %v4649_v51, %v1105_v58  ;;  %v3786_v63 = vpop.f32.mrb[10].mxu0  ;;  %v3852_v0 = vpop.f32.mrb[10].mxu1 }
  0xef   :  { %v665_v3 = vmax.f32 %v441_v55, 0.0  ;;  %v1338_v4 = vmax.f32 %v1114_v56, 0.0  ;;  %v444_v5 = vadd.f32 %v3786_v63, %v4649_v51  ;;  %v1117_v6 = vadd.f32 %v3852_v0, %v4649_v51  ;;  %v435_v7 = vpop.f32.mrb[11].mxu0  ;;  %v1108_v8 = vpop.f32.mrb[11].mxu1 }
  0xf0   :  { %v663_v9 = vmax.f32 %v433_v61, 0.0  ;;  %v1336_v10 = vmax.f32 %v1106_v62, 0.0  ;;  %v436_v11 = vadd.f32 %v4649_v51, %v435_v7  ;;  %v1109_v13 = vadd.f32 %v4649_v51, %v1108_v8 }
  0xf1   :  { %v4737_v14 = vmax.f32 %v665_v3, %v1338_v4  ;;  %v666_v16 = vmax.f32 %v444_v5, 0.0  ;;  %v1339_v17 = vmax.f32 %v1117_v6, 0.0  ;;  %3960 = vmatmul.mubr.msk.bf16.gmra.mrb[116].mxu0 %vm262_vm2, %v4157_v59  ;;  %4026 = vmatmul.mubr.msk.bf16.gmra.mrb[116].mxu1 %vm262_vm2, %v4158_v60  ;;  %v4165_v4 = vld [vmem:[%s5442_s2 + $0xf8] sm:$0xff]  }
  0xf2   :  { %v4741_v20 = vmax.f32 %v663_v9, %v1336_v10  ;;  %v664_v21 = vmax.f32 %v436_v11, 0.0  ;;  %v1337_v22 = vmax.f32 %v1109_v13, 0.0  ;;  %3963 = vmatprep.mubr.msk.bf16.mxu0 %vm262_vm2, %v4159_v1  ;;  %4029 = vmatprep.mubr.msk.bf16.mxu1 %vm262_vm2, %v4160_v2  ;;  %v4166_v5 = vld [vmem:[%s5443_s3 + $0xf8] sm:$0xff]  }
  0xf3   :  { %v4745_v23 = vmax.f32 %v666_v16, %v1339_v17 }
  0xf4   :  { %v4747_v24 = vmax.f32 %v664_v21, %v1337_v22  ;;  %v3789_v25 = vpop.f32.mrb[12].mxu0  ;;  %v3855_v26 = vpop.f32.mrb[12].mxu1 }
  0xf5   :  { %v457_v27 = vadd.f32 %v3789_v25, %v4649_v51  ;;  %v1130_v28 = vadd.f32 %v3855_v26, %v4649_v51  ;;  %v448_v29 = vpop.f32.mrb[13].mxu0  ;;  %v1121_v30 = vpop.f32.mrb[13].mxu1 }
  0xf6   :  { %v449_v33 = vadd.f32 %v4649_v51, %v448_v29  ;;  %v1122_v34 = vadd.f32 %v4649_v51, %v1121_v30  ;;  %v3790_v35 = vpop.f32.mrb[14].mxu0  ;;  %v3856_v36 = vpop.f32.mrb[14].mxu1 }
  0xf7   :  { %v669_v39 = vmax.f32 %v457_v27, 0.0  ;;  %v1342_v40 = vmax.f32 %v1130_v28, 0.0  ;;  %v460_v41 = vadd.f32 %v3790_v35, %v4649_v51  ;;  %v1133_v42 = vadd.f32 %v3856_v36, %v4649_v51  ;;  %v451_v43 = vpop.f32.mrb[15].mxu0  ;;  %v1124_v45 = vpop.f32.mrb[15].mxu1 }
  0xf8   :  { %v667_v46 = vmax.f32 %v449_v33, 0.0  ;;  %v1340_v48 = vmax.f32 %v1122_v34, 0.0  ;;  %v452_v49 = vadd.f32 %v4649_v51, %v451_v43  ;;  %v1125_v53 = vadd.f32 %v4649_v51, %v1124_v45 }
  0xf9   :  { %v4769_v54 = vmax.f32 %v669_v39, %v1342_v40  ;;  %v670_v55 = vmax.f32 %v460_v41, 0.0  ;;  %v1343_v56 = vmax.f32 %v1133_v42, 0.0  ;;  %3964 = vmatmul.mubr.msk.bf16.gmra.mrb[120].mxu0 %vm262_vm2, %v4161_v31  ;;  %4030 = vmatmul.mubr.msk.bf16.gmra.mrb[120].mxu1 %vm262_vm2, %v4162_v32 }
  0xfa   :  { %v4773_v57 = vmax.f32 %v667_v46, %v1340_v48  ;;  %v668_v58 = vmax.f32 %v452_v49, 0.0  ;;  %v1341_v59 = vmax.f32 %v1125_v53, 0.0  ;;  %3967 = vmatprep.mubr.msk.bf16.mxu0 %vm262_vm2, %v4163_v37  ;;  %4033 = vmatprep.mubr.msk.bf16.mxu1 %vm262_vm2, %v4164_v38 }
  0xfb   :  { %v4777_v60 = vmax.f32 %v670_v55, %v1343_v56 }
  0xfc   :  { %v4779_v61 = vmax.f32 %v668_v58, %v1341_v59  ;;  %v3793_v62 = vpop.f32.mrb[16].mxu0  ;;  %v3859_v63 = vpop.f32.mrb[16].mxu1 }
  0xfd   :  { %v473_v0 = vadd.f32 %v3793_v62, %v4649_v51  ;;  %v1146_v1 = vadd.f32 %v3859_v63, %v4649_v51  ;;  %v464_v2 = vpop.f32.mrb[17].mxu0  ;;  %v1137_v3 = vpop.f32.mrb[17].mxu1 }
  0xfe   :  { %v465_v6 = vadd.f32 %v4649_v51, %v464_v2  ;;  %v1138_v7 = vadd.f32 %v4649_v51, %v1137_v3  ;;  %v3794_v8 = vpop.f32.mrb[18].mxu0  ;;  %v3860_v9 = vpop.f32.mrb[18].mxu1 }
  0xff   :  { %v673_v10 = vmax.f32 %v473_v0, 0.0  ;;  %v1346_v11 = vmax.f32 %v1146_v1, 0.0  ;;  %v476_v13 = vadd.f32 %v3794_v8, %v4649_v51  ;;  %v1149_v16 = vadd.f32 %v3860_v9, %v4649_v51  ;;  %v467_v17 = vpop.f32.mrb[19].mxu0  ;;  %v1140_v21 = vpop.f32.mrb[19].mxu1 }
 0x100   :  { %v671_v22 = vmax.f32 %v465_v6, 0.0  ;;  %v1344_v25 = vmax.f32 %v1138_v7, 0.0  ;;  %v468_v26 = vadd.f32 %v4649_v51, %v467_v17  ;;  %v1141_v27 = vadd.f32 %v4649_v51, %v1140_v21 }
 0x101   :  { %v4795_v28 = vmax.f32 %v673_v10, %v1346_v11  ;;  %v674_v29 = vmax.f32 %v476_v13, 0.0  ;;  %v1347_v30 = vmax.f32 %v1149_v16, 0.0  ;;  %3968 = vmatmul.mubr.msk.bf16.gmra.mrb[124].mxu0 %vm262_vm2, %v4165_v4  ;;  %4034 = vmatmul.mubr.msk.bf16.gmra.mrb[124].mxu1 %vm262_vm2, %v4166_v5 }
 0x102   :  { %v4799_v31 = vmax.f32 %v671_v22, %v1344_v25  ;;  %v672_v32 = vmax.f32 %v468_v26, 0.0  ;;  %v1345_v33 = vmax.f32 %v1141_v27, 0.0 }
 0x103   :  { %v4801_v34 = vmax.f32 %v674_v29, %v1347_v30 }
 0x104   :  { %v4803_v35 = vmax.f32 %v672_v32, %v1345_v33  ;;  %v3797_v36 = vpop.f32.mrb[20].mxu0  ;;  %v3863_v37 = vpop.f32.mrb[20].mxu1 }
 0x105   :  { %v489_v38 = vadd.f32 %v3797_v36, %v4649_v51  ;;  %v1162_v39 = vadd.f32 %v3863_v37, %v4649_v51  ;;  %v480_v40 = vpop.f32.mrb[21].mxu0  ;;  %v1153_v41 = vpop.f32.mrb[21].mxu1 }
 0x106   :  { %v481_v42 = vadd.f32 %v4649_v51, %v480_v40  ;;  %v1154_v43 = vadd.f32 %v4649_v51, %v1153_v41  ;;  %v3798_v45 = vpop.f32.mrb[22].mxu0  ;;  %v3864_v46 = vpop.f32.mrb[22].mxu1 }
 0x107   :  { %v677_v48 = vmax.f32 %v489_v38, 0.0  ;;  %v1350_v49 = vmax.f32 %v1162_v39, 0.0  ;;  %v492_v53 = vadd.f32 %v3798_v45, %v4649_v51  ;;  %v1165_v55 = vadd.f32 %v3864_v46, %v4649_v51  ;;  %v483_v56 = vpop.f32.mrb[23].mxu0  ;;  %v1156_v58 = vpop.f32.mrb[23].mxu1 }
 0x108   :  { %v675_v59 = vmax.f32 %v481_v42, 0.0  ;;  %v1348_v62 = vmax.f32 %v1154_v43, 0.0  ;;  %v484_v63 = vadd.f32 %v4649_v51, %v483_v56  ;;  %v1157_v0 = vadd.f32 %v4649_v51, %v1156_v58 }
 0x109   :  { %v4813_v1 = vmax.f32 %v677_v48, %v1350_v49  ;;  %v678_v2 = vmax.f32 %v492_v53, 0.0  ;;  %v1351_v3 = vmax.f32 %v1165_v55, 0.0 }
 0x10a   :  { %v4815_v4 = vmax.f32 %v675_v59, %v1348_v62  ;;  %v676_v5 = vmax.f32 %v484_v63, 0.0  ;;  %v1349_v6 = vmax.f32 %v1157_v0, 0.0 }
 0x10b   :  { %v4817_v7 = vmax.f32 %v678_v2, %v1351_v3 }
 0x10c   :  { %v4819_v8 = vmax.f32 %v676_v5, %v1349_v6  ;;  %v3801_v9 = vpop.f32.mrb[24].mxu0  ;;  %v3867_v10 = vpop.f32.mrb[24].mxu1 }
 0x10d   :  { %v505_v11 = vadd.f32 %v3801_v9, %v4649_v51  ;;  %v1178_v13 = vadd.f32 %v3867_v10, %v4649_v51  ;;  %v496_v16 = vpop.f32.mrb[25].mxu0  ;;  %v1169_v17 = vpop.f32.mrb[25].mxu1 }
 0x10e   :  { %v497_v21 = vadd.f32 %v4649_v51, %v496_v16  ;;  %v1170_v22 = vadd.f32 %v4649_v51, %v1169_v17  ;;  %v3802_v25 = vpop.f32.mrb[26].mxu0  ;;  %v3868_v26 = vpop.f32.mrb[26].mxu1 }
 0x10f   :  { %v681_v27 = vmax.f32 %v505_v11, 0.0  ;;  %v1354_v29 = vmax.f32 %v1178_v13, 0.0  ;;  %v508_v30 = vadd.f32 %v3802_v25, %v4649_v51  ;;  %v1181_v32 = vadd.f32 %v3868_v26, %v4649_v51  ;;  %v499_v33 = vpop.f32.mrb[27].mxu0  ;;  %v1172_v36 = vpop.f32.mrb[27].mxu1 }
 0x110   :  { %v679_v37 = vmax.f32 %v497_v21, 0.0  ;;  %v1352_v38 = vmax.f32 %v1170_v22, 0.0  ;;  %v500_v39 = vadd.f32 %v4649_v51, %v499_v33  ;;  %v1173_v40 = vadd.f32 %v4649_v51, %v1172_v36 }
 0x111   :  { %v4829_v41 = vmax.f32 %v681_v27, %v1354_v29  ;;  %v682_v42 = vmax.f32 %v508_v30, 0.0  ;;  %v1355_v43 = vmax.f32 %v1181_v32, 0.0 }
 0x112   :  { %v4831_v45 = vmax.f32 %v679_v37, %v1352_v38  ;;  %v680_v46 = vmax.f32 %v500_v39, 0.0  ;;  %v1353_v48 = vmax.f32 %v1173_v40, 0.0 }
 0x113   :  { %v4833_v49 = vmax.f32 %v682_v42, %v1355_v43 }
 0x114   :  { %v4835_v53 = vmax.f32 %v680_v46, %v1353_v48  ;;  %v3805_v55 = vpop.f32.mrb[28].mxu0  ;;  %v3871_v56 = vpop.f32.mrb[28].mxu1 }
 0x115   :  { %v521_v58 = vadd.f32 %v3805_v55, %v4649_v51  ;;  %v1194_v59 = vadd.f32 %v3871_v56, %v4649_v51  ;;  %v512_v62 = vpop.f32.mrb[29].mxu0  ;;  %v1185_v63 = vpop.f32.mrb[29].mxu1 }
 0x116   :  { %v513_v0 = vadd.f32 %v4649_v51, %v512_v62  ;;  %v1186_v2 = vadd.f32 %v4649_v51, %v1185_v63  ;;  %v3806_v3 = vpop.f32.mrb[30].mxu0  ;;  %v3872_v5 = vpop.f32.mrb[30].mxu1 }
 0x117   :  { %v685_v6 = vmax.f32 %v521_v58, 0.0  ;;  %v1358_v9 = vmax.f32 %v1194_v59, 0.0  ;;  %v524_v10 = vadd.f32 %v3806_v3, %v4649_v51  ;;  %v1197_v11 = vadd.f32 %v3872_v5, %v4649_v51  ;;  %v515_v13 = vpop.f32.mrb[31].mxu0  ;;  %v1188_v16 = vpop.f32.mrb[31].mxu1 }
 0x118   :  { %v683_v17 = vmax.f32 %v513_v0, 0.0  ;;  %v1356_v21 = vmax.f32 %v1186_v2, 0.0  ;;  %v516_v22 = vadd.f32 %v4649_v51, %v515_v13  ;;  %v1189_v25 = vadd.f32 %v4649_v51, %v1188_v16 }
 0x119   :  { %v4845_v26 = vmax.f32 %v685_v6, %v1358_v9  ;;  %v686_v27 = vmax.f32 %v524_v10, 0.0  ;;  %v1359_v29 = vmax.f32 %v1197_v11, 0.0 }
 0x11a   :  { %v4847_v30 = vmax.f32 %v683_v17, %v1356_v21  ;;  %v684_v32 = vmax.f32 %v516_v22, 0.0  ;;  %v1357_v33 = vmax.f32 %v1189_v25, 0.0 }
 0x11b   :  { %v4849_v36 = vmax.f32 %v686_v27, %v1359_v29 }
 0x11c   :  { %v4851_v37 = vmax.f32 %v684_v32, %v1357_v33  ;;  %v3809_v38 = vpop.f32.mrb[32].mxu0  ;;  %v3875_v39 = vpop.f32.mrb[32].mxu1 }
 0x11d   :  { %v537_v40 = vadd.f32 %v3809_v38, %v4649_v51  ;;  %v1210_v42 = vadd.f32 %v3875_v39, %v4649_v51  ;;  %v528_v43 = vpop.f32.mrb[33].mxu0  ;;  %v1201_v46 = vpop.f32.mrb[33].mxu1 }
 0x11e   :  { %v529_v48 = vadd.f32 %v4649_v51, %v528_v43  ;;  %v1202_v55 = vadd.f32 %v4649_v51, %v1201_v46  ;;  %v3810_v56 = vpop.f32.mrb[34].mxu0  ;;  %v3876_v58 = vpop.f32.mrb[34].mxu1 }
 0x11f   :  { %v689_v59 = vmax.f32 %v537_v40, 0.0  ;;  %v1362_v62 = vmax.f32 %v1210_v42, 0.0  ;;  %v540_v63 = vadd.f32 %v3810_v56, %v4649_v51  ;;  %v1213_v0 = vadd.f32 %v3876_v58, %v4649_v51  ;;  %v531_v2 = vpop.f32.mrb[35].mxu0  ;;  %v1204_v3 = vpop.f32.mrb[35].mxu1 }
 0x120   :  { %v687_v5 = vmax.f32 %v529_v48, 0.0  ;;  %v1360_v6 = vmax.f32 %v1202_v55, 0.0  ;;  %v532_v9 = vadd.f32 %v4649_v51, %v531_v2  ;;  %v1205_v10 = vadd.f32 %v4649_v51, %v1204_v3 }
 0x121   :  { %v4861_v11 = vmax.f32 %v689_v59, %v1362_v62  ;;  %v690_v13 = vmax.f32 %v540_v63, 0.0  ;;  %v1363_v16 = vmax.f32 %v1213_v0, 0.0 }
 0x122   :  { %v4863_v17 = vmax.f32 %v687_v5, %v1360_v6  ;;  %v688_v21 = vmax.f32 %v532_v9, 0.0  ;;  %v1361_v22 = vmax.f32 %v1205_v10, 0.0 }
 0x123   :  { %v4865_v25 = vmax.f32 %v690_v13, %v1363_v16 }
 0x124   :  { %v4867_v27 = vmax.f32 %v688_v21, %v1361_v22  ;;  %v3813_v29 = vpop.f32.mrb[36].mxu0  ;;  %v3879_v32 = vpop.f32.mrb[36].mxu1 }
 0x125   :  { %v553_v33 = vadd.f32 %v3813_v29, %v4649_v51  ;;  %v1226_v38 = vadd.f32 %v3879_v32, %v4649_v51  ;;  %v544_v39 = vpop.f32.mrb[37].mxu0  ;;  %v1217_v40 = vpop.f32.mrb[37].mxu1 }
 0x126   :  { %v545_v42 = vadd.f32 %v4649_v51, %v544_v39  ;;  %v1218_v43 = vadd.f32 %v4649_v51, %v1217_v40  ;;  %v3814_v46 = vpop.f32.mrb[38].mxu0  ;;  %v3880_v48 = vpop.f32.mrb[38].mxu1 }
 0x127   :  { %v693_v55 = vmax.f32 %v553_v33, 0.0  ;;  %v1366_v56 = vmax.f32 %v1226_v38, 0.0  ;;  %v556_v58 = vadd.f32 %v3814_v46, %v4649_v51  ;;  %v1229_v59 = vadd.f32 %v3880_v48, %v4649_v51  ;;  %v547_v62 = vpop.f32.mrb[39].mxu0  ;;  %v1220_v63 = vpop.f32.mrb[39].mxu1 }
 0x128   :  { %v691_v0 = vmax.f32 %v545_v42, 0.0  ;;  %v1364_v2 = vmax.f32 %v1218_v43, 0.0  ;;  %v548_v3 = vadd.f32 %v4649_v51, %v547_v62  ;;  %v1221_v5 = vadd.f32 %v4649_v51, %v1220_v63 }
 0x129   :  { %v4877_v6 = vmax.f32 %v693_v55, %v1366_v56  ;;  %v694_v9 = vmax.f32 %v556_v58, 0.0  ;;  %v1367_v10 = vmax.f32 %v1229_v59, 0.0 }
 0x12a   :  { %v4879_v13 = vmax.f32 %v691_v0, %v1364_v2  ;;  %v692_v16 = vmax.f32 %v548_v3, 0.0  ;;  %v1365_v21 = vmax.f32 %v1221_v5, 0.0 }
 0x12b   :  { %v4881_v22 = vmax.f32 %v694_v9, %v1367_v10 }
 0x12c   :  { %v4883_v29 = vmax.f32 %v692_v16, %v1365_v21  ;;  %v3817_v32 = vpop.f32.mrb[40].mxu0  ;;  %v3883_v33 = vpop.f32.mrb[40].mxu1 }
 0x12d   :  { %v569_v38 = vadd.f32 %v3817_v32, %v4649_v51  ;;  %v1242_v39 = vadd.f32 %v3883_v33, %v4649_v51  ;;  %v560_v40 = vpop.f32.mrb[41].mxu0  ;;  %v1233_v42 = vpop.f32.mrb[41].mxu1 }
 0x12e   :  { %v561_v43 = vadd.f32 %v4649_v51, %v560_v40  ;;  %v1234_v46 = vadd.f32 %v4649_v51, %v1233_v42  ;;  %v3818_v48 = vpop.f32.mrb[42].mxu0  ;;  %v3884_v55 = vpop.f32.mrb[42].mxu1 }
 0x12f   :  { %v697_v56 = vmax.f32 %v569_v38, 0.0  ;;  %v1370_v58 = vmax.f32 %v1242_v39, 0.0  ;;  %v572_v59 = vadd.f32 %v3818_v48, %v4649_v51  ;;  %v1245_v62 = vadd.f32 %v3884_v55, %v4649_v51  ;;  %v563_v63 = vpop.f32.mrb[43].mxu0  ;;  %v1236_v0 = vpop.f32.mrb[43].mxu1 }
 0x130   :  { %v695_v2 = vmax.f32 %v561_v43, 0.0  ;;  %v1368_v3 = vmax.f32 %v1234_v46, 0.0  ;;  %v564_v5 = vadd.f32 %v4649_v51, %v563_v63  ;;  %v1237_v9 = vadd.f32 %v4649_v51, %v1236_v0 }
 0x131   :  { %v4893_v10 = vmax.f32 %v697_v56, %v1370_v58  ;;  %v698_v16 = vmax.f32 %v572_v59, 0.0  ;;  %v1371_v21 = vmax.f32 %v1245_v62, 0.0 }
 0x132   :  { %v4895_v32 = vmax.f32 %v695_v2, %v1368_v3  ;;  %v696_v33 = vmax.f32 %v564_v5, 0.0  ;;  %v1369_v38 = vmax.f32 %v1237_v9, 0.0 }
 0x133   :  { %5446 = vst [vmem:[#allocation2_spill] sm:$0xff] %v4893_v10  ;;  %v4897_v39 = vmax.f32 %v698_v16, %v1371_v21 }
 0x134   :  { %5447 = vst [vmem:[#allocation3_spill] sm:$0xff] %v4895_v32  ;;  %v4899_v40 = vmax.f32 %v696_v33, %v1369_v38  ;;  %v3821_v42 = vpop.f32.mrb[44].mxu0  ;;  %v3887_v48 = vpop.f32.mrb[44].mxu1 }
 0x135   :  { %5448 = vst [vmem:[#allocation4_spill] sm:$0xff] %v4897_v39  ;;  %v585_v43 = vadd.f32 %v3821_v42, %v4649_v51  ;;  %v1258_v46 = vadd.f32 %v3887_v48, %v4649_v51  ;;  %v576_v55 = vpop.f32.mrb[45].mxu0  ;;  %v1249_v63 = vpop.f32.mrb[45].mxu1 }
 0x136   :  { %5449 = vst [vmem:[#allocation5_spill] sm:$0xff] %v4899_v40  ;;  %v577_v56 = vadd.f32 %v4649_v51, %v576_v55  ;;  %v1250_v58 = vadd.f32 %v4649_v51, %v1249_v63  ;;  %v3822_v59 = vpop.f32.mrb[46].mxu0  ;;  %v3888_v62 = vpop.f32.mrb[46].mxu1 }
 0x137   :  { %v701_v0 = vmax.f32 %v585_v43, 0.0  ;;  %v1374_v2 = vmax.f32 %v1258_v46, 0.0  ;;  %v588_v3 = vadd.f32 %v3822_v59, %v4649_v51  ;;  %v1261_v5 = vadd.f32 %v3888_v62, %v4649_v51  ;;  %v579_v9 = vpop.f32.mrb[47].mxu0  ;;  %v1252_v16 = vpop.f32.mrb[47].mxu1 }
 0x138   :  { %v699_v21 = vmax.f32 %v577_v56, 0.0  ;;  %v1372_v33 = vmax.f32 %v1250_v58, 0.0  ;;  %v580_v38 = vadd.f32 %v4649_v51, %v579_v9  ;;  %v1253_v42 = vadd.f32 %v4649_v51, %v1252_v16 }
 0x139   :  { %v4909_v48 = vmax.f32 %v701_v0, %v1374_v2  ;;  %v702_v55 = vmax.f32 %v588_v3, 0.0  ;;  %v1375_v63 = vmax.f32 %v1261_v5, 0.0 }
 0x13a   :  { %v4911_v40 = vmax.f32 %v699_v21, %v1372_v33  ;;  %v700_v43 = vmax.f32 %v580_v38, 0.0  ;;  %v1373_v46 = vmax.f32 %v1253_v42, 0.0 }
 0x13b   :  { %5450 = vst [vmem:[#allocation6_spill] sm:$0xff] %v4909_v48  ;;  %v4913_v39 = vmax.f32 %v702_v55, %v1375_v63 }
 0x13c   :  { %5451 = vst [vmem:[#allocation7_spill] sm:$0xff] %v4911_v40  ;;  %v4915_v59 = vmax.f32 %v700_v43, %v1373_v46  ;;  %v3825_v62 = vpop.f32.mrb[48].mxu0  ;;  %v3891_v32 = vpop.f32.mrb[48].mxu1 }
 0x13d   :  { %5452 = vst [vmem:[#allocation8_spill] sm:$0xff] %v4913_v39  ;;  %v601_v56 = vadd.f32 %v3825_v62, %v4649_v51  ;;  %v1274_v58 = vadd.f32 %v3891_v32, %v4649_v51  ;;  %v592_v9 = vpop.f32.mrb[49].mxu0  ;;  %v1265_v16 = vpop.f32.mrb[49].mxu1 }
 0x13e   :  { %5453 = vst [vmem:[#allocation9_spill] sm:$0xff] %v4915_v59  ;;  %v593_v0 = vadd.f32 %v4649_v51, %v592_v9  ;;  %v1266_v2 = vadd.f32 %v4649_v51, %v1265_v16  ;;  %v3826_v3 = vpop.f32.mrb[50].mxu0  ;;  %v3892_v5 = vpop.f32.mrb[50].mxu1 }
 0x13f   :  { %v705_v21 = vmax.f32 %v601_v56, 0.0  ;;  %v1378_v33 = vmax.f32 %v1274_v58, 0.0  ;;  %v604_v38 = vadd.f32 %v3826_v3, %v4649_v51  ;;  %v1277_v42 = vadd.f32 %v3892_v5, %v4649_v51  ;;  %v595_v55 = vpop.f32.mrb[51].mxu0  ;;  %v1268_v63 = vpop.f32.mrb[51].mxu1 }
 0x140   :  { %v703_v43 = vmax.f32 %v593_v0, 0.0  ;;  %v1376_v46 = vmax.f32 %v1266_v2, 0.0  ;;  %v596_v32 = vadd.f32 %v4649_v51, %v595_v55  ;;  %v1269_v62 = vadd.f32 %v4649_v51, %v1268_v63 }
 0x141   :  { %v4925_v59 = vmax.f32 %v705_v21, %v1378_v33  ;;  %v706_v9 = vmax.f32 %v604_v38, 0.0  ;;  %v1379_v16 = vmax.f32 %v1277_v42, 0.0 }
 0x142   :  { %v4927_v39 = vmax.f32 %v703_v43, %v1376_v46  ;;  %v704_v56 = vmax.f32 %v596_v32, 0.0  ;;  %v1377_v58 = vmax.f32 %v1269_v62, 0.0 }
 0x143   :  { %5454 = vst [vmem:[#allocation10_spill] sm:$0xff] %v4925_v59  ;;  %v4929_v40 = vmax.f32 %v706_v9, %v1379_v16 }
 0x144   :  { %5455 = vst [vmem:[#allocation11_spill] sm:$0xff] %v4927_v39  ;;  %v4931_v3 = vmax.f32 %v704_v56, %v1377_v58  ;;  %v3829_v5 = vpop.f32.mrb[52].mxu0  ;;  %v3895_v48 = vpop.f32.mrb[52].mxu1 }
 0x145   :  { %5456 = vst [vmem:[#allocation12_spill] sm:$0xff] %v4929_v40  ;;  %v617_v0 = vadd.f32 %v3829_v5, %v4649_v51  ;;  %v1290_v2 = vadd.f32 %v3895_v48, %v4649_v51  ;;  %v608_v55 = vpop.f32.mrb[53].mxu0  ;;  %v1281_v63 = vpop.f32.mrb[53].mxu1 }
 0x146   :  { %5457 = vst [vmem:[#allocation13_spill] sm:$0xff] %v4931_v3  ;;  %v609_v21 = vadd.f32 %v4649_v51, %v608_v55  ;;  %v1282_v33 = vadd.f32 %v4649_v51, %v1281_v63  ;;  %v3830_v38 = vpop.f32.mrb[54].mxu0  ;;  %v3896_v42 = vpop.f32.mrb[54].mxu1 }
 0x147   :  { %v709_v43 = vmax.f32 %v617_v0, 0.0  ;;  %v1382_v46 = vmax.f32 %v1290_v2, 0.0  ;;  %v620_v32 = vadd.f32 %v3830_v38, %v4649_v51  ;;  %v1293_v62 = vadd.f32 %v3896_v42, %v4649_v51  ;;  %v611_v9 = vpop.f32.mrb[55].mxu0  ;;  %v1284_v16 = vpop.f32.mrb[55].mxu1 }
 0x148   :  { %v707_v56 = vmax.f32 %v609_v21, 0.0  ;;  %v1380_v58 = vmax.f32 %v1282_v33, 0.0  ;;  %v612_v48 = vadd.f32 %v4649_v51, %v611_v9  ;;  %v1285_v5 = vadd.f32 %v4649_v51, %v1284_v16 }
 0x149   :  { %v4941_v3 = vmax.f32 %v709_v43, %v1382_v46  ;;  %v710_v55 = vmax.f32 %v620_v32, 0.0  ;;  %v1383_v63 = vmax.f32 %v1293_v62, 0.0 }
 0x14a   :  { %v4943_v40 = vmax.f32 %v707_v56, %v1380_v58  ;;  %v708_v0 = vmax.f32 %v612_v48, 0.0  ;;  %v1381_v2 = vmax.f32 %v1285_v5, 0.0 }
 0x14b   :  { %5458 = vst [vmem:[#allocation14_spill] sm:$0xff] %v4941_v3  ;;  %v4945_v39 = vmax.f32 %v710_v55, %v1383_v63 }
 0x14c   :  { %5459 = vst [vmem:[#allocation15_spill] sm:$0xff] %v4943_v40  ;;  %v4947_v38 = vmax.f32 %v708_v0, %v1381_v2  ;;  %v3833_v42 = vpop.f32.mrb[56].mxu0  ;;  %v3899_v59 = vpop.f32.mrb[56].mxu1 }
 0x14d   :  { %5460 = vst [vmem:[#allocation16_spill] sm:$0xff] %v4945_v39  ;;  %v633_v21 = vadd.f32 %v3833_v42, %v4649_v51  ;;  %v1306_v33 = vadd.f32 %v3899_v59, %v4649_v51  ;;  %v624_v9 = vpop.f32.mrb[57].mxu0  ;;  %v1297_v16 = vpop.f32.mrb[57].mxu1 }
 0x14e   :  { %5461 = vst [vmem:[#allocation17_spill] sm:$0xff] %v4947_v38  ;;  %v625_v43 = vadd.f32 %v4649_v51, %v624_v9  ;;  %v1298_v46 = vadd.f32 %v4649_v51, %v1297_v16  ;;  %v3834_v32 = vpop.f32.mrb[58].mxu0  ;;  %v3900_v62 = vpop.f32.mrb[58].mxu1 }
 0x14f   :  { %v713_v56 = vmax.f32 %v633_v21, 0.0  ;;  %v1386_v58 = vmax.f32 %v1306_v33, 0.0  ;;  %v636_v48 = vadd.f32 %v3834_v32, %v4649_v51  ;;  %v1309_v5 = vadd.f32 %v3900_v62, %v4649_v51  ;;  %v627_v55 = vpop.f32.mrb[59].mxu0  ;;  %v1300_v63 = vpop.f32.mrb[59].mxu1 }
 0x150   :  { %v711_v0 = vmax.f32 %v625_v43, 0.0  ;;  %v1384_v2 = vmax.f32 %v1298_v46, 0.0  ;;  %v628_v59 = vadd.f32 %v4649_v51, %v627_v55  ;;  %v1301_v42 = vadd.f32 %v4649_v51, %v1300_v63 }
 0x151   :  { %v4957_v38 = vmax.f32 %v713_v56, %v1386_v58  ;;  %v714_v9 = vmax.f32 %v636_v48, 0.0  ;;  %v1387_v16 = vmax.f32 %v1309_v5, 0.0 }
 0x152   :  { %v4959_v39 = vmax.f32 %v711_v0, %v1384_v2  ;;  %v712_v21 = vmax.f32 %v628_v59, 0.0  ;;  %v1385_v33 = vmax.f32 %v1301_v42, 0.0 }
 0x153   :  { %5462 = vst [vmem:[#allocation18_spill] sm:$0xff] %v4957_v38  ;;  %v4961_v40 = vmax.f32 %v714_v9, %v1387_v16 }
 0x154   :  { %5463 = vst [vmem:[#allocation19_spill] sm:$0xff] %v4959_v39  ;;  %v4963_v32 = vmax.f32 %v712_v21, %v1385_v33  ;;  %v3837_v62 = vpop.f32.mrb[60].mxu0  ;;  %v3903_v3 = vpop.f32.mrb[60].mxu1 }
 0x155   :  { %5464 = vst [vmem:[#allocation20_spill] sm:$0xff] %v4961_v40  ;;  %v649_v43 = vadd.f32 %v3837_v62, %v4649_v51  ;;  %v1322_v46 = vadd.f32 %v3903_v3, %v4649_v51  ;;  %v640_v55 = vpop.f32.mrb[61].mxu0  ;;  %v1313_v63 = vpop.f32.mrb[61].mxu1 }
 0x156   :  { %5465 = vst [vmem:[#allocation21_spill] sm:$0xff] %v4963_v32  ;;  %v641_v56 = vadd.f32 %v4649_v51, %v640_v55  ;;  %v1314_v58 = vadd.f32 %v4649_v51, %v1313_v63  ;;  %v3838_v48 = vpop.f32.mrb[62].mxu0  ;;  %v3904_v5 = vpop.f32.mrb[62].mxu1 }
 0x157   :  { %v717_v0 = vmax.f32 %v649_v43, 0.0  ;;  %v1390_v2 = vmax.f32 %v1322_v46, 0.0  ;;  %v652_v59 = vadd.f32 %v3838_v48, %v4649_v51  ;;  %v1325_v42 = vadd.f32 %v3904_v5, %v4649_v51  ;;  %v643_v9 = vpop.f32.mrb[63].mxu0  ;;  %v1316_v16 = vpop.f32.mrb[63].mxu1 }
 0x158   :  { %v715_v21 = vmax.f32 %v641_v56, 0.0  ;;  %v1388_v33 = vmax.f32 %v1314_v58, 0.0  ;;  %v644_v3 = vadd.f32 %v4649_v51, %v643_v9  ;;  %v1317_v62 = vadd.f32 %v4649_v51, %v1316_v16 }
 0x159   :  { %v4973_v32 = vmax.f32 %v717_v0, %v1390_v2  ;;  %v718_v55 = vmax.f32 %v652_v59, 0.0  ;;  %v1391_v63 = vmax.f32 %v1325_v42, 0.0 }
 0x15a   :  { %v4975_v40 = vmax.f32 %v715_v21, %v1388_v33  ;;  %v716_v43 = vmax.f32 %v644_v3, 0.0  ;;  %v1389_v46 = vmax.f32 %v1317_v62, 0.0 }
 0x15b   :  { %5466 = vst [vmem:[#allocation22_spill] sm:$0xff] %v4973_v32  ;;  %v4977_v39 = vmax.f32 %v718_v55, %v1391_v63 }
 0x15c   :  { %5467 = vst [vmem:[#allocation23_spill] sm:$0xff] %v4975_v40  ;;  %v4979_v48 = vmax.f32 %v716_v43, %v1389_v46  ;;  %v3909_v5 = vpop.f32.mrb[64].mxu0  ;;  %v3975_v38 = vpop.f32.mrb[64].mxu1 }
 0x15d   :  { %5468 = vst [vmem:[#allocation24_spill] sm:$0xff] %v4977_v39  ;;  %v1819_v56 = vadd.f32 %v3909_v5, %v4649_v51  ;;  %v2492_v58 = vadd.f32 %v3975_v38, %v4649_v51  ;;  %v1810_v9 = vpop.f32.mrb[65].mxu0  ;;  %v2483_v16 = vpop.f32.mrb[65].mxu1 }
 0x15e   :  { %5469 = vst [vmem:[#allocation25_spill] sm:$0xff] %v4979_v48  ;;  %v1811_v0 = vadd.f32 %v4649_v51, %v1810_v9  ;;  %v2484_v2 = vadd.f32 %v4649_v51, %v2483_v16  ;;  %v3910_v59 = vpop.f32.mrb[66].mxu0  ;;  %v3976_v42 = vpop.f32.mrb[66].mxu1 }
 0x15f   :  { %v2067_v21 = vmax.f32 %v1819_v56, 0.0  ;;  %v2740_v33 = vmax.f32 %v2492_v58, 0.0  ;;  %v1822_v3 = vadd.f32 %v3910_v59, %v4649_v51  ;;  %v2495_v62 = vadd.f32 %v3976_v42, %v4649_v51  ;;  %v1813_v55 = vpop.f32.mrb[67].mxu0  ;;  %v2486_v63 = vpop.f32.mrb[67].mxu1 }
 0x160   :  { %v2065_v43 = vmax.f32 %v1811_v0, 0.0  ;;  %v2738_v46 = vmax.f32 %v2484_v2, 0.0  ;;  %v1814_v38 = vadd.f32 %v4649_v51, %v1813_v55  ;;  %v2487_v5 = vadd.f32 %v4649_v51, %v2486_v63  ;;  %v4995_v51 = vld [vmem:[%s5444_s5] ss:$0 sm:$0xff] }
 0x161   :  { %v2804_v48 = vmax.f32 %v2067_v21, %v2740_v33  ;;  %v2068_v9 = vmax.f32 %v1822_v3, 0.0  ;;  %v2741_v39 = vmax.f32 %v2495_v62, 0.0 }
 0x162   :  { %v2802_v16 = vmax.f32 %v2065_v43, %v2738_v46  ;;  %v2066_v40 = vmax.f32 %v1814_v38, 0.0  ;;  %v2739_v32 = vmax.f32 %v2487_v5, 0.0 }
 0x163   :  { %v2868_v56 = vmax.f32 %v4673_v12, %v2804_v48  ;;  %v2805_v58 = vmax.f32 %v2068_v9, %v2741_v39 }
 0x164   :  { %v2866_v59 = vmax.f32 %v4677_v15, %v2802_v16  ;;  %v2803_v42 = vmax.f32 %v2066_v40, %v2739_v32  ;;  %v3913_v10 = vpop.f32.mrb[68].mxu0  ;;  %v3979_v0 = vpop.f32.mrb[68].mxu1 }
 0x165   :  { %v3579_v2 = vpack.c.bf16 %v2868_v56, %v2868_v56  ;;  %v2869_v55 = vmax.f32 %v4681_v18, %v2805_v58  ;;  %v1835_v21 = vadd.f32 %v4995_v51, %v3913_v10  ;;  %v2508_v33 = vadd.f32 %v4995_v51, %v3979_v0  ;;  %v1826_v12 = vpop.f32.mrb[69].mxu0  ;;  %v2499_v39 = vpop.f32.mrb[69].mxu1 }
 0x166   :  { %v3577_v48 = vpack.c.bf16 %v2866_v59, %v2866_v59  ;;  %v2867_v15 = vmax.f32 %v4683_v19, %v2803_v42  ;;  %v1827_v40 = vadd.f32 %v4995_v51, %v1826_v12  ;;  %v2500_v32 = vadd.f32 %v4995_v51, %v2499_v39  ;;  %v3914_v3 = vpop.f32.mrb[70].mxu0  ;;  %v3980_v18 = vpop.f32.mrb[70].mxu1 }
 0x167   :  { %3189 = vst.msk [vmem:[%s5445_s6 + $0x8] sm:$0xf] %vm3186_vm3, %v3579_v2  ;;  %v3580_v62 = vpack.c.bf16 %v2869_v55, %v2869_v55  ;;  %v2071_v10 = vmax.f32 %v1835_v21, 0.0  ;;  %v2744_v63 = vmax.f32 %v2508_v33, 0.0  ;;  %v1838_v43 = vadd.f32 %v4995_v51, %v3914_v3  ;;  %v1829_v46 = vpop.f32.mrb[71].mxu0  ;;  %v2502_v38 = vpop.f32.mrb[71].mxu1 }
 0x168   :  { %3187 = vst.msk [vmem:[%s5445_s6] sm:$0xf] %vm3186_vm3, %v3577_v48  ;;  %v3578_v19 = vpack.c.bf16 %v2867_v15, %v2867_v15  ;;  %v2069_v5 = vmax.f32 %v1827_v40, 0.0  ;;  %v2742_v9 = vmax.f32 %v2500_v32, 0.0  ;;  %v2511_v16 = vadd.f32 %v4995_v51, %v3980_v18 }
 0x169   :  { %3190 = vst.msk [vmem:[%s5445_s6 + $0xc] sm:$0xf] %vm3186_vm3, %v3580_v62  ;;  %v2808_v56 = vmax.f32 %v2071_v10, %v2744_v63  ;;  %v2072_v58 = vmax.f32 %v1838_v43, 0.0  ;;  %v1830_v59 = vadd.f32 %v4995_v51, %v1829_v46  ;;  %v2503_v42 = vadd.f32 %v4995_v51, %v2502_v38 }
 0x16a   :  { %3188 = vst.msk [vmem:[%s5445_s6 + $0x4] sm:$0xf] %vm3186_vm3, %v3578_v19  ;;  %v2806_v0 = vmax.f32 %v2069_v5, %v2742_v9  ;;  %v2745_v2 = vmax.f32 %v2511_v16, 0.0 }
 0x16b   :  { %v2872_v55 = vmax.f32 %v4705_v44, %v2808_v56  ;;  %v2070_v21 = vmax.f32 %v1830_v59, 0.0  ;;  %v2743_v33 = vmax.f32 %v2503_v42, 0.0 }
 0x16c   :  { %v2870_v12 = vmax.f32 %v4709_v47, %v2806_v0  ;;  %v2809_v39 = vmax.f32 %v2072_v58, %v2745_v2  ;;  %v3917_v48 = vpop.f32.mrb[72].mxu0  ;;  %v3983_v15 = vpop.f32.mrb[72].mxu1 }
 0x16d   :  { %v3583_v40 = vpack.c.bf16 %v2872_v55, %v2872_v55  ;;  %v2807_v32 = vmax.f32 %v2070_v21, %v2743_v33  ;;  %v1851_v3 = vadd.f32 %v4995_v51, %v3917_v48  ;;  %v2524_v18 = vadd.f32 %v4995_v51, %v3983_v15  ;;  %v1842_v62 = vpop.f32.mrb[73].mxu0  ;;  %v2515_v10 = vpop.f32.mrb[73].mxu1 }
 0x16e   :  { %v3581_v63 = vpack.c.bf16 %v2870_v12, %v2870_v12  ;;  %v2873_v43 = vmax.f32 %v4713_v50, %v2809_v39  ;;  %v1843_v44 = vadd.f32 %v4995_v51, %v1842_v62  ;;  %v2516_v46 = vadd.f32 %v4995_v51, %v2515_v10  ;;  %v3918_v38 = vpop.f32.mrb[74].mxu0  ;;  %v3984_v47 = vpop.f32.mrb[74].mxu1 }
 0x16f   :  { %3193 = vst.msk [vmem:[%s5445_s6 + $0x18] sm:$0xf] %vm3186_vm3, %v3583_v40  ;;  %v2871_v19 = vmax.f32 %v4715_v52, %v2807_v32  ;;  %v2075_v5 = vmax.f32 %v1851_v3, 0.0  ;;  %v2748_v9 = vmax.f32 %v2524_v18, 0.0  ;;  %v1854_v16 = vadd.f32 %v4995_v51, %v3918_v38  ;;  %v1845_v56 = vpop.f32.mrb[75].mxu0  ;;  %v2518_v58 = vpop.f32.mrb[75].mxu1 }
 0x170   :  { %3191 = vst.msk [vmem:[%s5445_s6 + $0x10] sm:$0xf] %vm3186_vm3, %v3581_v63  ;;  %v3584_v50 = vpack.c.bf16 %v2873_v43, %v2873_v43  ;;  %v2073_v59 = vmax.f32 %v1843_v44, 0.0  ;;  %v2746_v42 = vmax.f32 %v2516_v46, 0.0  ;;  %v2527_v0 = vadd.f32 %v4995_v51, %v3984_v47 }
 0x171   :  { %v3582_v2 = vpack.c.bf16 %v2871_v19, %v2871_v19  ;;  %v2812_v55 = vmax.f32 %v2075_v5, %v2748_v9  ;;  %v2076_v21 = vmax.f32 %v1854_v16, 0.0  ;;  %v1846_v52 = vadd.f32 %v4995_v51, %v1845_v56 }
 0x172   :  { %3194 = vst.msk [vmem:[%s5445_s6 + $0x1c] sm:$0xf] %vm3186_vm3, %v3584_v50  ;;  %v2810_v33 = vmax.f32 %v2073_v59, %v2746_v42  ;;  %v2749_v12 = vmax.f32 %v2527_v0, 0.0  ;;  %v2519_v39 = vadd.f32 %v4995_v51, %v2518_v58 }
 0x173   :  { %3192 = vst.msk [vmem:[%s5445_s6 + $0x14] sm:$0xf] %vm3186_vm3, %v3582_v2  ;;  %v2876_v48 = vmax.f32 %v4737_v14, %v2812_v55  ;;  %v2074_v15 = vmax.f32 %v1846_v52, 0.0 }
 0x174   :  { %v2874_v40 = vmax.f32 %v4741_v20, %v2810_v33  ;;  %v2813_v32 = vmax.f32 %v2076_v21, %v2749_v12  ;;  %v2747_v3 = vmax.f32 %v2519_v39, 0.0  ;;  %v3921_v18 = vpop.f32.mrb[76].mxu0  ;;  %v3987_v62 = vpop.f32.mrb[76].mxu1 }
 0x175   :  { %v3587_v10 = vpack.c.bf16 %v2876_v48, %v2876_v48  ;;  %v1867_v63 = vadd.f32 %v4995_v51, %v3921_v18  ;;  %v2540_v43 = vadd.f32 %v4995_v51, %v3987_v62  ;;  %v1858_v44 = vpop.f32.mrb[77].mxu0  ;;  %v2531_v46 = vpop.f32.mrb[77].mxu1 }
 0x176   :  { %v3585_v38 = vpack.c.bf16 %v2874_v40, %v2874_v40  ;;  %v2877_v47 = vmax.f32 %v4745_v23, %v2813_v32  ;;  %v2811_v19 = vmax.f32 %v2074_v15, %v2747_v3  ;;  %v1859_v14 = vadd.f32 %v4995_v51, %v1858_v44  ;;  %v3922_v5 = vpop.f32.mrb[78].mxu0  ;;  %v3988_v9 = vpop.f32.mrb[78].mxu1 }
 0x177   :  { %3197 = vst.msk [vmem:[%s5445_s6 + $0x28] sm:$0xf] %vm3186_vm3, %v3587_v10  ;;  %v2079_v20 = vmax.f32 %v1867_v63, 0.0  ;;  %v2752_v16 = vmax.f32 %v2540_v43, 0.0  ;;  %v2532_v56 = vadd.f32 %v4995_v51, %v2531_v46  ;;  %v1870_v58 = vadd.f32 %v4995_v51, %v3922_v5  ;;  %v1861_v50 = vpop.f32.mrb[79].mxu0  ;;  %v2534_v59 = vpop.f32.mrb[79].mxu1 }
 0x178   :  { %3195 = vst.msk [vmem:[%s5445_s6 + $0x20] sm:$0xf] %vm3186_vm3, %v3585_v38  ;;  %v3588_v23 = vpack.c.bf16 %v2877_v47, %v2877_v47  ;;  %v2875_v42 = vmax.f32 %v4747_v24, %v2811_v19  ;;  %v2077_v0 = vmax.f32 %v1859_v14, 0.0  ;;  %v2543_v2 = vadd.f32 %v4995_v51, %v3988_v9 }
 0x179   :  { %v2816_v55 = vmax.f32 %v2079_v20, %v2752_v16  ;;  %v2750_v21 = vmax.f32 %v2532_v56, 0.0  ;;  %v2080_v52 = vmax.f32 %v1870_v58, 0.0  ;;  %v1862_v33 = vadd.f32 %v4995_v51, %v1861_v50 }
 0x17a   :  { %3198 = vst.msk [vmem:[%s5445_s6 + $0x2c] sm:$0xf] %vm3186_vm3, %v3588_v23  ;;  %v3586_v12 = vpack.c.bf16 %v2875_v42, %v2875_v42  ;;  %v2753_v39 = vmax.f32 %v2543_v2, 0.0  ;;  %v2535_v48 = vadd.f32 %v4995_v51, %v2534_v59 }
 0x17b   :  { %v2880_v15 = vmax.f32 %v4769_v54, %v2816_v55  ;;  %v2814_v24 = vmax.f32 %v2077_v0, %v2750_v21  ;;  %v2078_v40 = vmax.f32 %v1862_v33, 0.0 }
 0x17c   :  { %3196 = vst.msk [vmem:[%s5445_s6 + $0x24] sm:$0xf] %vm3186_vm3, %v3586_v12  ;;  %v2817_v32 = vmax.f32 %v2080_v52, %v2753_v39  ;;  %v2751_v3 = vmax.f32 %v2535_v48, 0.0  ;;  %v3925_v18 = vpop.f32.mrb[80].mxu0  ;;  %v3991_v62 = vpop.f32.mrb[80].mxu1 }
 0x17d   :  { %v3591_v10 = vpack.c.bf16 %v2880_v15, %v2880_v15  ;;  %v2878_v63 = vmax.f32 %v4773_v57, %v2814_v24  ;;  %v1883_v43 = vadd.f32 %v4995_v51, %v3925_v18  ;;  %v2556_v44 = vadd.f32 %v4995_v51, %v3991_v62  ;;  %v1874_v46 = vpop.f32.mrb[81].mxu0  ;;  %v2547_v54 = vpop.f32.mrb[81].mxu1 }
 0x17e   :  { %v2881_v38 = vmax.f32 %v4777_v60, %v2817_v32  ;;  %v2815_v47 = vmax.f32 %v2078_v40, %v2751_v3  ;;  %v1875_v19 = vadd.f32 %v4995_v51, %v1874_v46  ;;  %v2548_v14 = vadd.f32 %v4995_v51, %v2547_v54  ;;  %v3926_v5 = vpop.f32.mrb[82].mxu0  ;;  %v3992_v9 = vpop.f32.mrb[82].mxu1 }
 0x17f   :  { %3201 = vst.msk [vmem:[%s5445_s6 + $0x38] sm:$0xf] %vm3186_vm3, %v3591_v10  ;;  %v3589_v57 = vpack.c.bf16 %v2878_v63, %v2878_v63  ;;  %v2083_v20 = vmax.f32 %v1883_v43, 0.0  ;;  %v2756_v16 = vmax.f32 %v2556_v44, 0.0  ;;  %v1886_v56 = vadd.f32 %v4995_v51, %v3926_v5  ;;  %v1877_v58 = vpop.f32.mrb[83].mxu0  ;;  %v2550_v50 = vpop.f32.mrb[83].mxu1 }
 0x180   :  { %v3592_v60 = vpack.c.bf16 %v2881_v38, %v2881_v38  ;;  %v2879_v59 = vmax.f32 %v4779_v61, %v2815_v47  ;;  %v2081_v23 = vmax.f32 %v1875_v19, 0.0  ;;  %v2754_v42 = vmax.f32 %v2548_v14, 0.0 }
 0x181   :  { %3199 = vst.msk [vmem:[%s5445_s6 + $0x30] sm:$0xf] %vm3186_vm3, %v3589_v57  ;;  %v2820_v0 = vmax.f32 %v2083_v20, %v2756_v16  ;;  %v2084_v2 = vmax.f32 %v1886_v56, 0.0  ;;  %v2559_v55 = vadd.f32 %v4995_v51, %v3992_v9  ;;  %v1878_v21 = vadd.f32 %v4995_v51, %v1877_v58 }
 0x182   :  { %3202 = vst.msk [vmem:[%s5445_s6 + $0x3c] sm:$0xf] %vm3186_vm3, %v3592_v60  ;;  %v3590_v52 = vpack.c.bf16 %v2879_v59, %v2879_v59  ;;  %v2818_v61 = vmax.f32 %v2081_v23, %v2754_v42  ;;  %v2551_v33 = vadd.f32 %v4995_v51, %v2550_v50 }
 0x183   :  { %v2884_v12 = vmax.f32 %v4795_v28, %v2820_v0  ;;  %v2757_v39 = vmax.f32 %v2559_v55, 0.0  ;;  %v2082_v48 = vmax.f32 %v1878_v21, 0.0 }
 0x184   :  { %3200 = vst.msk [vmem:[%s5445_s6 + $0x34] sm:$0xf] %vm3186_vm3, %v3590_v52  ;;  %v2882_v15 = vmax.f32 %v4799_v31, %v2818_v61  ;;  %v2755_v24 = vmax.f32 %v2551_v33, 0.0  ;;  %v3929_v40 = vpop.f32.mrb[84].mxu0  ;;  %v3995_v32 = vpop.f32.mrb[84].mxu1 }
 0x185   :  { %v3595_v3 = vpack.c.bf16 %v2884_v12, %v2884_v12  ;;  %v2821_v18 = vmax.f32 %v2084_v2, %v2757_v39  ;;  %v1899_v62 = vadd.f32 %v4995_v51, %v3929_v40  ;;  %v2572_v10 = vadd.f32 %v4995_v51, %v3995_v32  ;;  %v1890_v63 = vpop.f32.mrb[85].mxu0  ;;  %v2563_v28 = vpop.f32.mrb[85].mxu1 }
 0x186   :  { %v3593_v43 = vpack.c.bf16 %v2882_v15, %v2882_v15  ;;  %v2819_v44 = vmax.f32 %v2082_v48, %v2755_v24  ;;  %v1891_v46 = vadd.f32 %v4995_v51, %v1890_v63  ;;  %v2564_v54 = vadd.f32 %v4995_v51, %v2563_v28  ;;  %v3930_v38 = vpop.f32.mrb[86].mxu0  ;;  %v3996_v47 = vpop.f32.mrb[86].mxu1 }
 0x187   :  { %3205 = vst.msk [vmem:[%s5445_s6 + $0x48] sm:$0xf] %vm3186_vm3, %v3595_v3  ;;  %v2885_v31 = vmax.f32 %v4801_v34, %v2821_v18  ;;  %v2087_v19 = vmax.f32 %v1899_v62, 0.0  ;;  %v2760_v14 = vmax.f32 %v2572_v10, 0.0  ;;  %v1902_v5 = vadd.f32 %v4995_v51, %v3930_v38  ;;  %v1893_v9 = vpop.f32.mrb[87].mxu0  ;;  %v2566_v57 = vpop.f32.mrb[87].mxu1 }
 0x188   :  { %3203 = vst.msk [vmem:[%s5445_s6 + $0x40] sm:$0xf] %vm3186_vm3, %v3593_v43  ;;  %v2883_v20 = vmax.f32 %v4803_v35, %v2819_v44  ;;  %v2085_v16 = vmax.f32 %v1891_v46, 0.0  ;;  %v2758_v56 = vmax.f32 %v2564_v54, 0.0  ;;  %v2575_v58 = vadd.f32 %v4995_v51, %v3996_v47 }
 0x189   :  { %v3596_v50 = vpack.c.bf16 %v2885_v31, %v2885_v31  ;;  %v2824_v60 = vmax.f32 %v2087_v19, %v2760_v14  ;;  %v2088_v34 = vmax.f32 %v1902_v5, 0.0  ;;  %v1894_v59 = vadd.f32 %v4995_v51, %v1893_v9 }
 0x18a   :  { %v3594_v23 = vpack.c.bf16 %v2883_v20, %v2883_v20  ;;  %v2822_v42 = vmax.f32 %v2085_v16, %v2758_v56  ;;  %v2761_v0 = vmax.f32 %v2575_v58, 0.0  ;;  %v2567_v2 = vadd.f32 %v4995_v51, %v2566_v57 }
 0x18b   :  { %3206 = vst.msk [vmem:[%s5445_s6 + $0x4c] sm:$0xf] %vm3186_vm3, %v3596_v50  ;;  %v2888_v35 = vmax.f32 %v4813_v1, %v2824_v60  ;;  %v2086_v55 = vmax.f32 %v1894_v59, 0.0 }
 0x18c   :  { %3204 = vst.msk [vmem:[%s5445_s6 + $0x44] sm:$0xf] %vm3186_vm3, %v3594_v23  ;;  %v2886_v21 = vmax.f32 %v4815_v4, %v2822_v42  ;;  %v2825_v52 = vmax.f32 %v2088_v34, %v2761_v0  ;;  %v2759_v61 = vmax.f32 %v2567_v2, 0.0  ;;  %v3933_v33 = vpop.f32.mrb[88].mxu0  ;;  %v3999_v12 = vpop.f32.mrb[88].mxu1 }
 0x18d   :  { %v3599_v39 = vpack.c.bf16 %v2888_v35, %v2888_v35  ;;  %v1915_v48 = vadd.f32 %v4995_v51, %v3933_v33  ;;  %v2588_v15 = vadd.f32 %v4995_v51, %v3999_v12  ;;  %v1906_v24 = vpop.f32.mrb[89].mxu0  ;;  %v2579_v40 = vpop.f32.mrb[89].mxu1 }
 0x18e   :  { %v3597_v1 = vpack.c.bf16 %v2886_v21, %v2886_v21  ;;  %v2889_v32 = vmax.f32 %v4817_v7, %v2825_v52  ;;  %v2823_v3 = vmax.f32 %v2086_v55, %v2759_v61  ;;  %v1907_v18 = vadd.f32 %v4995_v51, %v1906_v24  ;;  %v3934_v62 = vpop.f32.mrb[90].mxu0  ;;  %v4000_v10 = vpop.f32.mrb[90].mxu1 }
 0x18f   :  { %3209 = vst.msk [vmem:[%s5445_s6 + $0x58] sm:$0xf] %vm3186_vm3, %v3599_v39  ;;  %v2091_v4 = vmax.f32 %v1915_v48, 0.0  ;;  %v2764_v63 = vmax.f32 %v2588_v15, 0.0  ;;  %v2580_v28 = vadd.f32 %v4995_v51, %v2579_v40  ;;  %v1918_v43 = vadd.f32 %v4995_v51, %v3934_v62  ;;  %v1909_v44 = vpop.f32.mrb[91].mxu0  ;;  %v2582_v46 = vpop.f32.mrb[91].mxu1 }
 0x190   :  { %3207 = vst.msk [vmem:[%s5445_s6 + $0x50] sm:$0xf] %vm3186_vm3, %v3597_v1  ;;  %v3600_v7 = vpack.c.bf16 %v2889_v32, %v2889_v32  ;;  %v2887_v54 = vmax.f32 %v4819_v8, %v2823_v3  ;;  %v2089_v38 = vmax.f32 %v1907_v18, 0.0  ;;  %v2591_v47 = vadd.f32 %v4995_v51, %v4000_v10 }
 0x191   :  { %v2828_v31 = vmax.f32 %v2091_v4, %v2764_v63  ;;  %v2762_v19 = vmax.f32 %v2580_v28, 0.0  ;;  %v2092_v14 = vmax.f32 %v1918_v43, 0.0  ;;  %v1910_v5 = vadd.f32 %v4995_v51, %v1909_v44 }
 0x192   :  { %3210 = vst.msk [vmem:[%s5445_s6 + $0x5c] sm:$0xf] %vm3186_vm3, %v3600_v7  ;;  %v3598_v9 = vpack.c.bf16 %v2887_v54, %v2887_v54  ;;  %v2765_v57 = vmax.f32 %v2591_v47, 0.0  ;;  %v2583_v20 = vadd.f32 %v4995_v51, %v2582_v46 }
 0x193   :  { %v2892_v16 = vmax.f32 %v4829_v41, %v2828_v31  ;;  %v2826_v8 = vmax.f32 %v2089_v38, %v2762_v19  ;;  %v2090_v56 = vmax.f32 %v1910_v5, 0.0 }
 0x194   :  { %3208 = vst.msk [vmem:[%s5445_s6 + $0x54] sm:$0xf] %vm3186_vm3, %v3598_v9  ;;  %v2829_v58 = vmax.f32 %v2092_v14, %v2765_v57  ;;  %v2763_v50 = vmax.f32 %v2583_v20, 0.0  ;;  %v3937_v60 = vpop.f32.mrb[92].mxu0  ;;  %v4003_v34 = vpop.f32.mrb[92].mxu1 }
 0x195   :  { %v3603_v59 = vpack.c.bf16 %v2892_v16, %v2892_v16  ;;  %v2890_v23 = vmax.f32 %v4831_v45, %v2826_v8  ;;  %v1931_v42 = vadd.f32 %v4995_v51, %v3937_v60  ;;  %v2604_v0 = vadd.f32 %v4995_v51, %v4003_v34  ;;  %v1922_v2 = vpop.f32.mrb[93].mxu0  ;;  %v2595_v41 = vpop.f32.mrb[93].mxu1 }
 0x196   :  { %v2893_v35 = vmax.f32 %v4833_v49, %v2829_v58  ;;  %v2827_v55 = vmax.f32 %v2090_v56, %v2763_v50  ;;  %v1923_v21 = vadd.f32 %v4995_v51, %v1922_v2  ;;  %v2596_v52 = vadd.f32 %v4995_v51, %v2595_v41  ;;  %v3938_v61 = vpop.f32.mrb[94].mxu0  ;;  %v4004_v33 = vpop.f32.mrb[94].mxu1 }
 0x197   :  { %3213 = vst.msk [vmem:[%s5445_s6 + $0x68] sm:$0xf] %vm3186_vm3, %v3603_v59  ;;  %v3601_v45 = vpack.c.bf16 %v2890_v23, %v2890_v23  ;;  %v2095_v12 = vmax.f32 %v1931_v42, 0.0  ;;  %v2768_v39 = vmax.f32 %v2604_v0, 0.0  ;;  %v1934_v48 = vadd.f32 %v4995_v51, %v3938_v61  ;;  %v1925_v15 = vpop.f32.mrb[95].mxu0  ;;  %v2598_v24 = vpop.f32.mrb[95].mxu1 }
 0x198   :  { %v3604_v49 = vpack.c.bf16 %v2893_v35, %v2893_v35  ;;  %v2891_v40 = vmax.f32 %v4835_v53, %v2827_v55  ;;  %v2093_v1 = vmax.f32 %v1923_v21, 0.0  ;;  %v2766_v32 = vmax.f32 %v2596_v52, 0.0 }
 0x199   :  { %3211 = vst.msk [vmem:[%s5445_s6 + $0x60] sm:$0xf] %vm3186_vm3, %v3601_v45  ;;  %v2832_v3 = vmax.f32 %v2095_v12, %v2768_v39  ;;  %v2096_v18 = vmax.f32 %v1934_v48, 0.0  ;;  %v2607_v62 = vadd.f32 %v4995_v51, %v4004_v33  ;;  %v1926_v10 = vadd.f32 %v4995_v51, %v1925_v15 }
 0x19a   :  { %3214 = vst.msk [vmem:[%s5445_s6 + $0x6c] sm:$0xf] %vm3186_vm3, %v3604_v49  ;;  %v3602_v4 = vpack.c.bf16 %v2891_v40, %v2891_v40  ;;  %v2830_v53 = vmax.f32 %v2093_v1, %v2766_v32  ;;  %v2599_v63 = vadd.f32 %v4995_v51, %v2598_v24 }
 0x19b   :  { %v2896_v28 = vmax.f32 %v4845_v26, %v2832_v3  ;;  %v2769_v43 = vmax.f32 %v2607_v62, 0.0  ;;  %v2094_v44 = vmax.f32 %v1926_v10, 0.0 }
 0x19c   :  { %3212 = vst.msk [vmem:[%s5445_s6 + $0x64] sm:$0xf] %vm3186_vm3, %v3602_v4  ;;  %v2894_v46 = vmax.f32 %v4847_v30, %v2830_v53  ;;  %v2767_v7 = vmax.f32 %v2599_v63, 0.0  ;;  %v3941_v54 = vpop.f32.mrb[96].mxu0  ;;  %v4007_v38 = vpop.f32.mrb[96].mxu1 }
 0x19d   :  { %v3607_v47 = vpack.c.bf16 %v2896_v28, %v2896_v28  ;;  %v2833_v31 = vmax.f32 %v2096_v18, %v2769_v43  ;;  %v1947_v19 = vadd.f32 %v4995_v51, %v3941_v54  ;;  %v2620_v14 = vadd.f32 %v4995_v51, %v4007_v38  ;;  %v1938_v5 = vpop.f32.mrb[97].mxu0  ;;  %v2611_v26 = vpop.f32.mrb[97].mxu1 }
 0x19e   :  { %v3605_v9 = vpack.c.bf16 %v2894_v46, %v2894_v46  ;;  %v2831_v57 = vmax.f32 %v2094_v44, %v2767_v7  ;;  %v1939_v20 = vadd.f32 %v4995_v51, %v1938_v5  ;;  %v2612_v16 = vadd.f32 %v4995_v51, %v2611_v26  ;;  %v3942_v8 = vpop.f32.mrb[98].mxu0  ;;  %v4008_v56 = vpop.f32.mrb[98].mxu1 }
 0x19f   :  { %3217 = vst.msk [vmem:[%s5445_s6 + $0x78] sm:$0xf] %vm3186_vm3, %v3607_v47  ;;  %v2897_v30 = vmax.f32 %v4849_v36, %v2833_v31  ;;  %v2099_v58 = vmax.f32 %v1947_v19, 0.0  ;;  %v2772_v50 = vmax.f32 %v2620_v14, 0.0  ;;  %v1950_v60 = vadd.f32 %v4995_v51, %v3942_v8  ;;  %v1941_v34 = vpop.f32.mrb[99].mxu0  ;;  %v2614_v59 = vpop.f32.mrb[99].mxu1 }
 0x1a0   :  { %3215 = vst.msk [vmem:[%s5445_s6 + $0x70] sm:$0xf] %vm3186_vm3, %v3605_v9  ;;  %v2895_v23 = vmax.f32 %v4851_v37, %v2831_v57  ;;  %v2097_v42 = vmax.f32 %v1939_v20, 0.0  ;;  %v2770_v0 = vmax.f32 %v2612_v16, 0.0  ;;  %v2623_v2 = vadd.f32 %v4995_v51, %v4008_v56 }
 0x1a1   :  { %v3608_v41 = vpack.c.bf16 %v2897_v30, %v2897_v30  ;;  %v2836_v35 = vmax.f32 %v2099_v58, %v2772_v50  ;;  %v2100_v36 = vmax.f32 %v1950_v60, 0.0  ;;  %v1942_v55 = vadd.f32 %v4995_v51, %v1941_v34 }
 0x1a2   :  { %v3606_v21 = vpack.c.bf16 %v2895_v23, %v2895_v23  ;;  %v2834_v52 = vmax.f32 %v2097_v42, %v2770_v0  ;;  %v2773_v61 = vmax.f32 %v2623_v2, 0.0  ;;  %v2615_v33 = vadd.f32 %v4995_v51, %v2614_v59 }
 0x1a3   :  { %3218 = vst.msk [vmem:[%s5445_s6 + $0x7c] sm:$0xf] %vm3186_vm3, %v3608_v41  ;;  %v2900_v37 = vmax.f32 %v4861_v11, %v2836_v35  ;;  %v2098_v45 = vmax.f32 %v1942_v55, 0.0 }
 0x1a4   :  { %3216 = vst.msk [vmem:[%s5445_s6 + $0x74] sm:$0xf] %vm3186_vm3, %v3606_v21  ;;  %v2898_v12 = vmax.f32 %v4863_v17, %v2834_v52  ;;  %v2837_v39 = vmax.f32 %v2100_v36, %v2773_v61  ;;  %v2771_v48 = vmax.f32 %v2615_v33, 0.0  ;;  %v3945_v15 = vpop.f32.mrb[100].mxu0  ;;  %v4011_v24 = vpop.f32.mrb[100].mxu1 }
 0x1a5   :  { %v3611_v49 = vpack.c.bf16 %v2900_v37, %v2900_v37  ;;  %v1963_v40 = vadd.f32 %v4995_v51, %v3945_v15  ;;  %v2636_v1 = vadd.f32 %v4995_v51, %v4011_v24  ;;  %v1954_v32 = vpop.f32.mrb[101].mxu0  ;;  %v2627_v3 = vpop.f32.mrb[101].mxu1 }
 0x1a6   :  { %v3609_v11 = vpack.c.bf16 %v2898_v12, %v2898_v12  ;;  %v2901_v18 = vmax.f32 %v4865_v25, %v2837_v39  ;;  %v2835_v62 = vmax.f32 %v2098_v45, %v2771_v48  ;;  %v1955_v10 = vadd.f32 %v4995_v51, %v1954_v32  ;;  %v3946_v4 = vpop.f32.mrb[102].mxu0  ;;  %v4012_v53 = vpop.f32.mrb[102].mxu1 }
 0x1a7   :  { %3221 = vst.msk [vmem:[%s5445_s6 + $0x88] sm:$0xf] %vm3186_vm3, %v3611_v49  ;;  %v2103_v17 = vmax.f32 %v1963_v40, 0.0  ;;  %v2776_v63 = vmax.f32 %v2636_v1, 0.0  ;;  %v2628_v28 = vadd.f32 %v4995_v51, %v2627_v3  ;;  %v1966_v43 = vadd.f32 %v4995_v51, %v3946_v4  ;;  %v1957_v44 = vpop.f32.mrb[103].mxu0  ;;  %v2630_v46 = vpop.f32.mrb[103].mxu1 }
 0x1a8   :  { %3219 = vst.msk [vmem:[%s5445_s6 + $0x80] sm:$0xf] %vm3186_vm3, %v3609_v11  ;;  %v3612_v25 = vpack.c.bf16 %v2901_v18, %v2901_v18  ;;  %v2899_v7 = vmax.f32 %v4867_v27, %v2835_v62  ;;  %v2101_v54 = vmax.f32 %v1955_v10, 0.0  ;;  %v2639_v38 = vadd.f32 %v4995_v51, %v4012_v53  ;;  %v5470_v40 = vld [vmem:[#allocation2_spill] sm:$0xff]  ;;  %v5471_v11 = vld [vmem:[#allocation3_spill] sm:$0xff] }
 0x1a9   :  { %v2840_v47 = vmax.f32 %v2103_v17, %v2776_v63  ;;  %v2774_v31 = vmax.f32 %v2628_v28, 0.0  ;;  %v2104_v19 = vmax.f32 %v1966_v43, 0.0  ;;  %v1958_v14 = vadd.f32 %v4995_v51, %v1957_v44 }
 0x1aa   :  { %3222 = vst.msk [vmem:[%s5445_s6 + $0x8c] sm:$0xf] %vm3186_vm3, %v3612_v25  ;;  %v3610_v5 = vpack.c.bf16 %v2899_v7, %v2899_v7  ;;  %v2777_v26 = vmax.f32 %v2639_v38, 0.0  ;;  %v2631_v9 = vadd.f32 %v4995_v51, %v2630_v46 }
 0x1ab   :  { %v2904_v57 = vmax.f32 %v4877_v6, %v2840_v47  ;;  %v2838_v27 = vmax.f32 %v2101_v54, %v2774_v31  ;;  %v2102_v20 = vmax.f32 %v1958_v14, 0.0  ;;  %v5472_v31 = vld [vmem:[#allocation4_spill] sm:$0xff] }
 0x1ac   :  { %3220 = vst.msk [vmem:[%s5445_s6 + $0x84] sm:$0xf] %vm3186_vm3, %v3610_v5  ;;  %v2841_v16 = vmax.f32 %v2104_v19, %v2777_v26  ;;  %v2775_v8 = vmax.f32 %v2631_v9, 0.0  ;;  %v3949_v56 = vpop.f32.mrb[104].mxu0  ;;  %v4015_v30 = vpop.f32.mrb[104].mxu1 }
 0x1ad   :  { %v3615_v58 = vpack.c.bf16 %v2904_v57, %v2904_v57  ;;  %v2902_v50 = vmax.f32 %v4879_v13, %v2838_v27  ;;  %v1979_v60 = vadd.f32 %v4995_v51, %v3949_v56  ;;  %v2652_v34 = vadd.f32 %v4995_v51, %v4015_v30  ;;  %v1970_v59 = vpop.f32.mrb[105].mxu0  ;;  %v2643_v6 = vpop.f32.mrb[105].mxu1  ;;  %v5473_v27 = vld [vmem:[#allocation5_spill] sm:$0xff] }
 0x1ae   :  { %v2905_v23 = vmax.f32 %v4881_v22, %v2841_v16  ;;  %v2839_v42 = vmax.f32 %v2102_v20, %v2775_v8  ;;  %v1971_v0 = vadd.f32 %v4995_v51, %v1970_v59  ;;  %v2644_v2 = vadd.f32 %v4995_v51, %v2643_v6  ;;  %v3950_v41 = vpop.f32.mrb[106].mxu0  ;;  %v4016_v35 = vpop.f32.mrb[106].mxu1 }
 0x1af   :  { %3225 = vst.msk [vmem:[%s5445_s6 + $0x98] sm:$0xf] %vm3186_vm3, %v3615_v58  ;;  %v3613_v13 = vpack.c.bf16 %v2902_v50, %v2902_v50  ;;  %v2107_v36 = vmax.f32 %v1979_v60, 0.0  ;;  %v2780_v55 = vmax.f32 %v2652_v34, 0.0  ;;  %v1982_v21 = vadd.f32 %v4995_v51, %v3950_v41  ;;  %v1973_v52 = vpop.f32.mrb[107].mxu0  ;;  %v2646_v61 = vpop.f32.mrb[107].mxu1 }
 0x1b0   :  { %v3616_v22 = vpack.c.bf16 %v2905_v23, %v2905_v23  ;;  %v2903_v33 = vmax.f32 %v4883_v29, %v2839_v42  ;;  %v2105_v37 = vmax.f32 %v1971_v0, 0.0  ;;  %v2778_v45 = vmax.f32 %v2644_v2, 0.0  ;;  %v5474_v42 = vld [vmem:[#allocation6_spill] sm:$0xff]  ;;  %v5475_v41 = vld [vmem:[#allocation7_spill] sm:$0xff] }
 0x1b1   :  { %3223 = vst.msk [vmem:[%s5445_s6 + $0x90] sm:$0xf] %vm3186_vm3, %v3613_v13  ;;  %v2844_v12 = vmax.f32 %v2107_v36, %v2780_v55  ;;  %v2108_v39 = vmax.f32 %v1982_v21, 0.0  ;;  %v2655_v48 = vadd.f32 %v4995_v51, %v4016_v35  ;;  %v1974_v15 = vadd.f32 %v4995_v51, %v1973_v52 }
 0x1b2   :  { %3226 = vst.msk [vmem:[%s5445_s6 + $0x9c] sm:$0xf] %vm3186_vm3, %v3616_v22  ;;  %v3614_v24 = vpack.c.bf16 %v2903_v33, %v2903_v33  ;;  %v2842_v29 = vmax.f32 %v2105_v37, %v2778_v45  ;;  %v2647_v49 = vadd.f32 %v4995_v51, %v2646_v61 }
 0x1b3   :  { %v2908_v1 = vmax.f32 %v5470_v40, %v2844_v12  ;;  %v2781_v32 = vmax.f32 %v2655_v48, 0.0  ;;  %v2106_v3 = vmax.f32 %v1974_v15, 0.0  ;;  %v5476_v12 = vld [vmem:[#allocation8_spill] sm:$0xff] }
 0x1b4   :  { %3224 = vst.msk [vmem:[%s5445_s6 + $0x94] sm:$0xf] %vm3186_vm3, %v3614_v24  ;;  %v2906_v18 = vmax.f32 %v5471_v11, %v2842_v29  ;;  %v2779_v62 = vmax.f32 %v2647_v49, 0.0  ;;  %v3953_v10 = vpop.f32.mrb[108].mxu0  ;;  %v4019_v4 = vpop.f32.mrb[108].mxu1 }
 0x1b5   :  { %v3619_v53 = vpack.c.bf16 %v2908_v1, %v2908_v1  ;;  %v2845_v17 = vmax.f32 %v2108_v39, %v2781_v32  ;;  %v1995_v63 = vadd.f32 %v4995_v51, %v3953_v10  ;;  %v2668_v28 = vadd.f32 %v4995_v51, %v4019_v4  ;;  %v1986_v43 = vpop.f32.mrb[109].mxu0  ;;  %v2659_v44 = vpop.f32.mrb[109].mxu1 }
 0x1b6   :  { %v3617_v46 = vpack.c.bf16 %v2906_v18, %v2906_v18  ;;  %v2843_v25 = vmax.f32 %v2106_v3, %v2779_v62  ;;  %v1987_v7 = vadd.f32 %v4995_v51, %v1986_v43  ;;  %v2660_v54 = vadd.f32 %v4995_v51, %v2659_v44  ;;  %v3954_v38 = vpop.f32.mrb[110].mxu0  ;;  %v4020_v47 = vpop.f32.mrb[110].mxu1  ;;  %v5477_v62 = vld [vmem:[#allocation9_spill] sm:$0xff] }
 0x1b7   :  { %3229 = vst.msk [vmem:[%s5445_s6 + $0xa8] sm:$0xf] %vm3186_vm3, %v3619_v53  ;;  %v2909_v19 = vmax.f32 %v5472_v31, %v2845_v17  ;;  %v2111_v14 = vmax.f32 %v1995_v63, 0.0  ;;  %v2784_v5 = vmax.f32 %v2668_v28, 0.0  ;;  %v1998_v26 = vadd.f32 %v4995_v51, %v3954_v38  ;;  %v1989_v9 = vpop.f32.mrb[111].mxu0  ;;  %v2662_v57 = vpop.f32.mrb[111].mxu1 }
 0x1b8   :  { %3227 = vst.msk [vmem:[%s5445_s6 + $0xa0] sm:$0xf] %vm3186_vm3, %v3617_v46  ;;  %v2907_v20 = vmax.f32 %v5473_v27, %v2843_v25  ;;  %v2109_v16 = vmax.f32 %v1987_v7, 0.0  ;;  %v2782_v8 = vmax.f32 %v2660_v54, 0.0  ;;  %v2671_v56 = vadd.f32 %v4995_v51, %v4020_v47  ;;  %v5478_v7 = vld [vmem:[#allocation10_spill] sm:$0xff] }
 0x1b9   :  { %v3620_v30 = vpack.c.bf16 %v2909_v19, %v2909_v19  ;;  %v2848_v58 = vmax.f32 %v2111_v14, %v2784_v5  ;;  %v2112_v50 = vmax.f32 %v1998_v26, 0.0  ;;  %v1990_v60 = vadd.f32 %v4995_v51, %v1989_v9  ;;  %v5479_v9 = vld [vmem:[#allocation11_spill] sm:$0xff] }
 0x1ba   :  { %v3618_v34 = vpack.c.bf16 %v2907_v20, %v2907_v20  ;;  %v2846_v59 = vmax.f32 %v2109_v16, %v2782_v8  ;;  %v2785_v6 = vmax.f32 %v2671_v56, 0.0  ;;  %v2663_v23 = vadd.f32 %v4995_v51, %v2662_v57  ;;  %v5480_v56 = vld [vmem:[#allocation12_spill] sm:$0xff] }
 0x1bb   :  { %3230 = vst.msk [vmem:[%s5445_s6 + $0xac] sm:$0xf] %vm3186_vm3, %v3620_v30  ;;  %v2912_v0 = vmax.f32 %v5474_v42, %v2848_v58  ;;  %v2110_v2 = vmax.f32 %v1990_v60, 0.0 }
 0x1bc   :  { %3228 = vst.msk [vmem:[%s5445_s6 + $0xa4] sm:$0xf] %vm3186_vm3, %v3618_v34  ;;  %v2910_v35 = vmax.f32 %v5475_v41, %v2846_v59  ;;  %v2849_v13 = vmax.f32 %v2112_v50, %v2785_v6  ;;  %v2783_v36 = vmax.f32 %v2663_v23, 0.0  ;;  %v3957_v55 = vpop.f32.mrb[112].mxu0  ;;  %v4023_v21 = vpop.f32.mrb[112].mxu1 }
 0x1bd   :  { %v3623_v52 = vpack.c.bf16 %v2912_v0, %v2912_v0  ;;  %v2011_v61 = vadd.f32 %v4995_v51, %v3957_v55  ;;  %v2684_v22 = vadd.f32 %v4995_v51, %v4023_v21  ;;  %v2002_v33 = vpop.f32.mrb[113].mxu0  ;;  %v2675_v37 = vpop.f32.mrb[113].mxu1 }
 0x1be   :  { %v3621_v45 = vpack.c.bf16 %v2910_v35, %v2910_v35  ;;  %v2913_v39 = vmax.f32 %v5476_v12, %v2849_v13  ;;  %v2847_v48 = vmax.f32 %v2110_v2, %v2783_v36  ;;  %v2003_v15 = vadd.f32 %v4995_v51, %v2002_v33  ;;  %v3958_v24 = vpop.f32.mrb[114].mxu0  ;;  %v4024_v29 = vpop.f32.mrb[114].mxu1  ;;  %v5481_v13 = vld [vmem:[#allocation13_spill] sm:$0xff] }
 0x1bf   :  { %3233 = vst.msk [vmem:[%s5445_s6 + $0xb8] sm:$0xf] %vm3186_vm3, %v3623_v52  ;;  %v2115_v49 = vmax.f32 %v2011_v61, 0.0  ;;  %v2788_v40 = vmax.f32 %v2684_v22, 0.0  ;;  %v2676_v1 = vadd.f32 %v4995_v51, %v2675_v37  ;;  %v2014_v32 = vadd.f32 %v4995_v51, %v3958_v24  ;;  %v2005_v3 = vpop.f32.mrb[115].mxu0  ;;  %v2678_v11 = vpop.f32.mrb[115].mxu1 }
 0x1c0   :  { %3231 = vst.msk [vmem:[%s5445_s6 + $0xb0] sm:$0xf] %vm3186_vm3, %v3621_v45  ;;  %v3624_v18 = vpack.c.bf16 %v2913_v39, %v2913_v39  ;;  %v2911_v10 = vmax.f32 %v5477_v62, %v2847_v48  ;;  %v2113_v4 = vmax.f32 %v2003_v15, 0.0  ;;  %v2687_v53 = vadd.f32 %v4995_v51, %v4024_v29  ;;  %v5482_v39 = vld [vmem:[#allocation14_spill] sm:$0xff]  ;;  %v5483_v29 = vld [vmem:[#allocation15_spill] sm:$0xff] }
 0x1c1   :  { %v2852_v17 = vmax.f32 %v2115_v49, %v2788_v40  ;;  %v2786_v63 = vmax.f32 %v2676_v1, 0.0  ;;  %v2116_v28 = vmax.f32 %v2014_v32, 0.0  ;;  %v2006_v43 = vadd.f32 %v4995_v51, %v2005_v3 }
 0x1c2   :  { %3234 = vst.msk [vmem:[%s5445_s6 + $0xbc] sm:$0xf] %vm3186_vm3, %v3624_v18  ;;  %v3622_v44 = vpack.c.bf16 %v2911_v10, %v2911_v10  ;;  %v2789_v46 = vmax.f32 %v2687_v53, 0.0  ;;  %v2679_v25 = vadd.f32 %v4995_v51, %v2678_v11 }
 0x1c3   :  { %v2916_v54 = vmax.f32 %v5478_v7, %v2852_v17  ;;  %v2850_v38 = vmax.f32 %v2113_v4, %v2786_v63  ;;  %v2114_v47 = vmax.f32 %v2006_v43, 0.0 }
 0x1c4   :  { %3232 = vst.msk [vmem:[%s5445_s6 + $0xb4] sm:$0xf] %vm3186_vm3, %v3622_v44  ;;  %v2853_v31 = vmax.f32 %v2116_v28, %v2789_v46  ;;  %v2787_v19 = vmax.f32 %v2679_v25, 0.0  ;;  %v3961_v14 = vpop.f32.mrb[116].mxu0  ;;  %v4027_v5 = vpop.f32.mrb[116].mxu1  ;;  %v5484_v46 = vld [vmem:[#allocation16_spill] sm:$0xff] }
 0x1c5   :  { %v3627_v26 = vpack.c.bf16 %v2916_v54, %v2916_v54  ;;  %v2914_v57 = vmax.f32 %v5479_v9, %v2850_v38  ;;  %v2027_v27 = vadd.f32 %v4995_v51, %v3961_v14  ;;  %v2700_v20 = vadd.f32 %v4995_v51, %v4027_v5  ;;  %v2018_v16 = vpop.f32.mrb[117].mxu0  ;;  %v2691_v8 = vpop.f32.mrb[117].mxu1 }
 0x1c6   :  { %v2917_v30 = vmax.f32 %v5480_v56, %v2853_v31  ;;  %v2851_v58 = vmax.f32 %v2114_v47, %v2787_v19  ;;  %v2019_v50 = vadd.f32 %v4995_v51, %v2018_v16  ;;  %v2692_v60 = vadd.f32 %v4995_v51, %v2691_v8  ;;  %v3962_v34 = vpop.f32.mrb[118].mxu0  ;;  %v4028_v59 = vpop.f32.mrb[118].mxu1  ;;  %v5485_v19 = vld [vmem:[#allocation17_spill] sm:$0xff] }
 0x1c7   :  { %3237 = vst.msk [vmem:[%s5445_s6 + $0xc8] sm:$0xf] %vm3186_vm3, %v3627_v26  ;;  %v3625_v6 = vpack.c.bf16 %v2914_v57, %v2914_v57  ;;  %v2119_v23 = vmax.f32 %v2027_v27, 0.0  ;;  %v2792_v42 = vmax.f32 %v2700_v20, 0.0  ;;  %v2030_v0 = vadd.f32 %v4995_v51, %v3962_v34  ;;  %v2021_v2 = vpop.f32.mrb[119].mxu0  ;;  %v2694_v41 = vpop.f32.mrb[119].mxu1 }
 0x1c8   :  { %v3628_v35 = vpack.c.bf16 %v2917_v30, %v2917_v30  ;;  %v2915_v36 = vmax.f32 %v5481_v13, %v2851_v58  ;;  %v2117_v55 = vmax.f32 %v2019_v50, 0.0  ;;  %v2790_v21 = vmax.f32 %v2692_v60, 0.0  ;;  %v5486_v50 = vld [vmem:[#allocation18_spill] sm:$0xff] }
 0x1c9   :  { %3235 = vst.msk [vmem:[%s5445_s6 + $0xc0] sm:$0xf] %vm3186_vm3, %v3625_v6  ;;  %v2856_v52 = vmax.f32 %v2119_v23, %v2792_v42  ;;  %v2120_v61 = vmax.f32 %v2030_v0, 0.0  ;;  %v2703_v22 = vadd.f32 %v4995_v51, %v4028_v59  ;;  %v2022_v33 = vadd.f32 %v4995_v51, %v2021_v2  ;;  %v5487_v59 = vld [vmem:[#allocation19_spill] sm:$0xff] }
 0x1ca   :  { %3238 = vst.msk [vmem:[%s5445_s6 + $0xcc] sm:$0xf] %vm3186_vm3, %v3628_v35  ;;  %v3626_v37 = vpack.c.bf16 %v2915_v36, %v2915_v36  ;;  %v2854_v45 = vmax.f32 %v2117_v55, %v2790_v21  ;;  %v2695_v12 = vadd.f32 %v4995_v51, %v2694_v41  ;;  %v5363_v51 = vld [vmem:[%s5444_s5] ss:$0 sm:$0xff] }
 0x1cb   :  { %v2920_v48 = vmax.f32 %v5482_v39, %v2856_v52  ;;  %v2793_v15 = vmax.f32 %v2703_v22, 0.0  ;;  %v2118_v24 = vmax.f32 %v2022_v33, 0.0  ;;  %v5488_v52 = vld [vmem:[#allocation20_spill] sm:$0xff] }
 0x1cc   :  { %3236 = vst.msk [vmem:[%s5445_s6 + $0xc4] sm:$0xf] %vm3186_vm3, %v3626_v37  ;;  %v2918_v49 = vmax.f32 %v5483_v29, %v2854_v45  ;;  %v2791_v40 = vmax.f32 %v2695_v12, 0.0  ;;  %v3965_v1 = vpop.f32.mrb[120].mxu0  ;;  %v4031_v32 = vpop.f32.mrb[120].mxu1 }
 0x1cd   :  { %v3631_v3 = vpack.c.bf16 %v2920_v48, %v2920_v48  ;;  %v2857_v11 = vmax.f32 %v2120_v61, %v2793_v15  ;;  %v2043_v18 = vadd.f32 %v5363_v51, %v3965_v1  ;;  %v2716_v62 = vadd.f32 %v5363_v51, %v4031_v32  ;;  %v2034_v10 = vpop.f32.mrb[121].mxu0  ;;  %v2707_v4 = vpop.f32.mrb[121].mxu1 }
 0x1ce   :  { %v3629_v53 = vpack.c.bf16 %v2918_v49, %v2918_v49  ;;  %v2855_v17 = vmax.f32 %v2118_v24, %v2791_v40  ;;  %v2035_v63 = vadd.f32 %v5363_v51, %v2034_v10  ;;  %v2708_v28 = vadd.f32 %v5363_v51, %v2707_v4  ;;  %v3966_v43 = vpop.f32.mrb[122].mxu0  ;;  %v4032_v44 = vpop.f32.mrb[122].mxu1  ;;  %v5489_v40 = vld [vmem:[#allocation21_spill] sm:$0xff] }
 0x1cf   :  { %3241 = vst.msk [vmem:[%s5445_s6 + $0xd8] sm:$0xf] %vm3186_vm3, %v3631_v3  ;;  %v2921_v25 = vmax.f32 %v5484_v46, %v2857_v11  ;;  %v2123_v7 = vmax.f32 %v2043_v18, 0.0  ;;  %v2796_v54 = vmax.f32 %v2716_v62, 0.0  ;;  %v2046_v38 = vadd.f32 %v5363_v51, %v3966_v43  ;;  %v2037_v47 = vpop.f32.mrb[123].mxu0  ;;  %v2710_v31 = vpop.f32.mrb[123].mxu1 }
 0x1d0   :  { %3239 = vst.msk [vmem:[%s5445_s6 + $0xd0] sm:$0xf] %vm3186_vm3, %v3629_v53  ;;  %v2919_v14 = vmax.f32 %v5485_v19, %v2855_v17  ;;  %v2121_v5 = vmax.f32 %v2035_v63, 0.0  ;;  %v2794_v26 = vmax.f32 %v2708_v28, 0.0  ;;  %v2719_v9 = vadd.f32 %v5363_v51, %v4032_v44  ;;  %v5490_v63 = vld [vmem:[#allocation22_spill] sm:$0xff] }
 0x1d1   :  { %v3632_v57 = vpack.c.bf16 %v2921_v25, %v2921_v25  ;;  %v2860_v27 = vmax.f32 %v2123_v7, %v2796_v54  ;;  %v2124_v20 = vmax.f32 %v2046_v38, 0.0  ;;  %v2038_v16 = vadd.f32 %v5363_v51, %v2037_v47  ;;  %v5491_v54 = vld [vmem:[#allocation23_spill] sm:$0xff]  ;;  %v5492_v47 = vld [vmem:[#allocation24_spill] sm:$0xff] }
 0x1d2   :  { %v3630_v8 = vpack.c.bf16 %v2919_v14, %v2919_v14  ;;  %v2858_v56 = vmax.f32 %v2121_v5, %v2794_v26  ;;  %v2797_v30 = vmax.f32 %v2719_v9, 0.0  ;;  %v2711_v58 = vadd.f32 %v5363_v51, %v2710_v31  ;;  %v5493_v5 = vld [vmem:[#allocation25_spill] sm:$0xff] }
 0x1d3   :  { %3242 = vst.msk [vmem:[%s5445_s6 + $0xdc] sm:$0xf] %vm3186_vm3, %v3632_v57  ;;  %v2924_v60 = vmax.f32 %v5486_v50, %v2860_v27  ;;  %v2122_v34 = vmax.f32 %v2038_v16, 0.0 }
 0x1d4   :  { %3240 = vst.msk [vmem:[%s5445_s6 + $0xd4] sm:$0xf] %vm3186_vm3, %v3630_v8  ;;  %v2922_v6 = vmax.f32 %v5487_v59, %v2858_v56  ;;  %v2861_v23 = vmax.f32 %v2124_v20, %v2797_v30  ;;  %v2795_v42 = vmax.f32 %v2711_v58, 0.0  ;;  %v3969_v0 = vpop.f32.mrb[124].mxu0  ;;  %v4035_v2 = vpop.f32.mrb[124].mxu1 }
 0x1d5   :  { %v3635_v41 = vpack.c.bf16 %v2924_v60, %v2924_v60  ;;  %v2059_v35 = vadd.f32 %v5363_v51, %v3969_v0  ;;  %v2732_v13 = vadd.f32 %v5363_v51, %v4035_v2  ;;  %v2050_v36 = vpop.f32.mrb[125].mxu0  ;;  %v2723_v55 = vpop.f32.mrb[125].mxu1 }
 0x1d6   :  { %v3633_v21 = vpack.c.bf16 %v2922_v6, %v2922_v6  ;;  %v2925_v61 = vmax.f32 %v5488_v52, %v2861_v23  ;;  %v2859_v22 = vmax.f32 %v2122_v34, %v2795_v42  ;;  %v2051_v33 = vadd.f32 %v5363_v51, %v2050_v36  ;;  %v3970_v37 = vpop.f32.mrb[126].mxu0  ;;  %v4036_v45 = vpop.f32.mrb[126].mxu1 }
 0x1d7   :  { %3245 = vst.msk [vmem:[%s5445_s6 + $0xe8] sm:$0xf] %vm3186_vm3, %v3635_v41  ;;  %v2127_v12 = vmax.f32 %v2059_v35, 0.0  ;;  %v2800_v39 = vmax.f32 %v2732_v13, 0.0  ;;  %v2724_v48 = vadd.f32 %v5363_v51, %v2723_v55  ;;  %v2062_v15 = vadd.f32 %v5363_v51, %v3970_v37  ;;  %v2053_v24 = vpop.f32.mrb[127].mxu0  ;;  %v2726_v29 = vpop.f32.mrb[127].mxu1 }
 0x1d8   :  { %3243 = vst.msk [vmem:[%s5445_s6 + $0xe0] sm:$0xf] %vm3186_vm3, %v3633_v21  ;;  %v3636_v49 = vpack.c.bf16 %v2925_v61, %v2925_v61  ;;  %v2923_v1 = vmax.f32 %v5489_v40, %v2859_v22  ;;  %v2125_v32 = vmax.f32 %v2051_v33, 0.0  ;;  %v2735_v3 = vadd.f32 %v5363_v51, %v4036_v45 }
 0x1d9   :  { %v2864_v11 = vmax.f32 %v2127_v12, %v2800_v39  ;;  %v2798_v18 = vmax.f32 %v2724_v48, 0.0  ;;  %v2128_v62 = vmax.f32 %v2062_v15, 0.0  ;;  %v2054_v10 = vadd.f32 %v5363_v51, %v2053_v24 }
 0x1da   :  { %3246 = vst.msk [vmem:[%s5445_s6 + $0xec] sm:$0xf] %vm3186_vm3, %v3636_v49  ;;  %v3634_v4 = vpack.c.bf16 %v2923_v1, %v2923_v1  ;;  %v2801_v53 = vmax.f32 %v2735_v3, 0.0  ;;  %v2727_v17 = vadd.f32 %v5363_v51, %v2726_v29 }
 0x1db   :  { %v2928_v28 = vmax.f32 %v5490_v63, %v2864_v11  ;;  %v2862_v43 = vmax.f32 %v2125_v32, %v2798_v18  ;;  %v2126_v44 = vmax.f32 %v2054_v10, 0.0 }
 0x1dc   :  { %3244 = vst.msk [vmem:[%s5445_s6 + $0xe4] sm:$0xf] %vm3186_vm3, %v3634_v4  ;;  %v2865_v46 = vmax.f32 %v2128_v62, %v2801_v53  ;;  %v2799_v25 = vmax.f32 %v2727_v17, 0.0 }
 0x1dd   :  { %v3639_v7 = vpack.c.bf16 %v2928_v28, %v2928_v28  ;;  %v2926_v38 = vmax.f32 %v5491_v54, %v2862_v43 }
 0x1de   :  { %v2929_v31 = vmax.f32 %v5492_v47, %v2865_v46  ;;  %v2863_v19 = vmax.f32 %v2126_v44, %v2799_v25 }
 0x1df   :  { %3249 = vst.msk [vmem:[%s5445_s6 + $0xf8] sm:$0xf] %vm3186_vm3, %v3639_v7  ;;  %v3637_v51 = vpack.c.bf16 %v2926_v38, %v2926_v38 }
 0x1e0   :  { %v3640_v14 = vpack.c.bf16 %v2929_v31, %v2929_v31  ;;  %v2927_v26 = vmax.f32 %v5493_v5, %v2863_v19 }
 0x1e1   :  { %3247 = vst.msk [vmem:[%s5445_s6 + $0xf0] sm:$0xf] %vm3186_vm3, %v3637_v51 }
 0x1e2   :  { %3250 = vst.msk [vmem:[%s5445_s6 + $0xfc] sm:$0xf] %vm3186_vm3, %v3640_v14  ;;  %v3638_v9 = vpack.c.bf16 %v2927_v26, %v2927_v26 }
 0x1e4   :  { %3248 = vst.msk [vmem:[%s5445_s6 + $0xf4] sm:$0xf] %vm3186_vm3, %v3638_v9 }

// kernel: malan_net_forward.4
= control target key start
LH: loop header
LB: loop body
LE: loop exit
PB: predicated region body
PF: predicated region fallthrough
CT: control target
= control target key end

     0   :  { %v3754_v38 = vmov 0.0   ;;  %vm3755_vm0 = vmmov 0   ;;  %vm631_vm1 = vcmask 261120   ;;  %vm2544_vm2 = vcmask 519168   ;;  %s5073_s4 = inlined_call_operand.vmem [shape: bf16[800,64], index: 4, kind: input, shape index: {}]   ;;  %s5074_s0 = inlined_call_operand.vmem [shape: bf16[72,800], index: 0, kind: input, shape index: {}]   ;;  %s5075_s1 = inlined_call_operand.vmem [shape: bf16[72,800], index: 1, kind: input, shape index: {}]   ;;  %s5076_s2 = inlined_call_operand.vmem [shape: bf16[72,800], index: 2, kind: input, shape index: {}]   ;;  %s5077_s3 = inlined_call_operand.vmem [shape: bf16[72,800], index: 3, kind: input, shape index: {}]   ;;  %s5078_s5 = inlined_call_operand.vmem [shape: f32[1,64], index: 5, kind: input, shape index: {}]   ;;  %s5079_s6 = inlined_call_operand.vmem [shape: bf16[72,64], index: 6, kind: output, shape index: {}]  }
   0x1   :  { %v3794_v0 = vld [vmem:[%s5073_s4 + $0x40] sm:$0xff]   ;;  %v3817_v4 = vld [vmem:[%s5073_s4 + $0x48] sm:$0xff]   ;;  %v3841_v8 = vld [vmem:[%s5073_s4 + $0x50] sm:$0xff]  }
   0x2   :  { %v3799_v1 = vld [vmem:[%s5073_s4] sm:$0xff]   ;;  %2787 = vmatprep.subr.bf16.mxu0 %v3794_v0  ;;  %v3823_v5 = vld [vmem:[%s5073_s4 + $0x8] sm:$0xff]   ;;  %v3847_v9 = vld [vmem:[%s5073_s4 + $0x10] sm:$0xff]  }
   0x3   :  { %v3805_v2 = vld [vmem:[%s5073_s4 + $0xc0] sm:$0xff]   ;;  %2788 = vmatpush3.bf16.msra.mxu0 %v3799_v1  ;;  %v3829_v6 = vld [vmem:[%s5073_s4 + $0xc8] sm:$0xff]   ;;  %v3853_v10 = vld [vmem:[%s5073_s4 + $0xd0] sm:$0xff]  }
   0x4   :  { %v3811_v3 = vld [vmem:[%s5073_s4 + $0x80] sm:$0xff]   ;;  %2833 = vmatprep.subr.bf16.mxu1 %v3805_v2  ;;  %2789 = vmatprep.subr.bf16.mxu0 %v3817_v4  ;;  %v3835_v7 = vld [vmem:[%s5073_s4 + $0x88] sm:$0xff]   ;;  %v3859_v11 = vld [vmem:[%s5073_s4 + $0x90] sm:$0xff]  }
   0x5   :  { %2834 = vmatpush3.bf16.msra.mxu1 %v3811_v3  ;;  %v3865_v12 = vld [vmem:[%s5073_s4 + $0x58] sm:$0xff]   ;;  %v3889_v16 = vld [vmem:[%s5073_s4 + $0x60] sm:$0xff]   ;;  %v3913_v20 = vld [vmem:[%s5073_s4 + $0x68] sm:$0xff]  }
   0x6   :  { %2835 = vmatprep.subr.bf16.mxu1 %v3829_v6  ;;  %v3871_v13 = vld [vmem:[%s5073_s4 + $0x18] sm:$0xff]   ;;  %v3895_v17 = vld [vmem:[%s5073_s4 + $0x20] sm:$0xff]   ;;  %v3919_v21 = vld [vmem:[%s5073_s4 + $0x28] sm:$0xff]  }
   0x7   :  { %2790 = vmatpush3.bf16.msra.mxu0 %v3823_v5  ;;  %v3877_v14 = vld [vmem:[%s5073_s4 + $0xd8] sm:$0xff]   ;;  %v3901_v18 = vld [vmem:[%s5073_s4 + $0xe0] sm:$0xff]   ;;  %v3925_v22 = vld [vmem:[%s5073_s4 + $0xe8] sm:$0xff]  }
   0x8   :  { %2791 = vmatprep.subr.bf16.mxu0 %v3841_v8  ;;  %v3883_v15 = vld [vmem:[%s5073_s4 + $0x98] sm:$0xff]   ;;  %v3907_v19 = vld [vmem:[%s5073_s4 + $0xa0] sm:$0xff]   ;;  %v3931_v23 = vld [vmem:[%s5073_s4 + $0xa8] sm:$0xff]  }
   0x9   :  { %2836 = vmatpush3.bf16.msra.mxu1 %v3835_v7  ;;  %v3937_v24 = vld [vmem:[%s5073_s4 + $0x70] sm:$0xff]   ;;  %v3961_v28 = vld [vmem:[%s5073_s4 + $0x78] sm:$0xff]   ;;  %v3498_v32 = vld [vmem:[%s5074_s0 + $0x4] ss:$28 sps:$4 sm:$0xff]  }
   0xa   :  { %2837 = vmatprep.subr.bf16.mxu1 %v3853_v10  ;;  %v3943_v25 = vld [vmem:[%s5073_s4 + $0x30] sm:$0xff]   ;;  %v3967_v29 = vld [vmem:[%s5073_s4 + $0x38] sm:$0xff]   ;;  %679 = vmatprep.mubr.bf16.mxu0 %v3498_v32  ;;  %v3991_v34 = vld [vmem:[%s5073_s4 + $0x140] sm:$0xff]  }
   0xb   :  { %2792 = vmatpush3.bf16.msra.mxu0 %v3847_v9  ;;  %v3949_v26 = vld [vmem:[%s5073_s4 + $0xf0] sm:$0xff]   ;;  %v3973_v30 = vld [vmem:[%s5073_s4 + $0xf8] sm:$0xff]   ;;  %v3501_v35 = vld [vmem:[%s5074_s0 + $0x8] ss:$28 sps:$4 sm:$0xff]  }
   0xc   :  { %2793 = vmatprep.subr.bf16.mxu0 %v3865_v12  ;;  %v3955_v27 = vld [vmem:[%s5073_s4 + $0xb0] sm:$0xff]   ;;  %v3496_v31 = vld [vmem:[%s5074_s0] ss:$28 sps:$4 sm:$0xff]   ;;  %v3503_v36 = vld [vmem:[%s5074_s0 + $0xc] ss:$28 sps:$4 sm:$0xff]  }
   0xd   :  { %2838 = vmatpush3.bf16.msra.mxu1 %v3859_v11  ;;  %v3986_v33 = vld [vmem:[%s5073_s4 + $0xb8] sm:$0xff]   ;;  %v4004_v37 = vld [vmem:[%s5073_s4 + $0x100] sm:$0xff]   ;;  %751 = vmatprep.mubr.bf16.mxu1 %v3503_v36  ;;  %v4010_v39 = vld [vmem:[%s5073_s4 + $0x148] sm:$0xff]  }
   0xe   :  { %2839 = vmatprep.subr.bf16.mxu1 %v3877_v14  ;;  %v4016_v40 = vld [vmem:[%s5073_s4 + $0x108] sm:$0xff]   ;;  %v4022_v41 = vld [vmem:[%s5073_s4 + $0x180] sm:$0xff]   ;;  %v3508_v42 = vld [vmem:[%s5074_s0 + $0x3c] ss:$28 sps:$4 sm:$0xff]  }
   0xf   :  { %2794 = vmatpush3.bf16.msra.mxu0 %v3871_v13  ;;  %v3510_v43 = vld [vmem:[%s5074_s0 + $0x38] ss:$28 sps:$4 sm:$0xff]   ;;  %v3511_v44 = vld [vmem:[%s5074_s0 + $0x44] ss:$28 sps:$4 sm:$0xff]   ;;  %v3519_v50 = vld [vmem:[%s5074_s0 + $0x70] ss:$28 sps:$4 sm:$0xff]  }
  0x10   :  { %2795 = vmatprep.subr.bf16.mxu0 %v3889_v16  ;;  %v3513_v45 = vld [vmem:[%s5074_s0 + $0x40] ss:$28 sps:$4 sm:$0xff]   ;;  %v4041_v46 = vld [vmem:[%s5073_s4 + $0x150] sm:$0xff]   ;;  %v3526_v56 = vld [vmem:[%s5074_s0 + $0xac] ss:$28 sps:$4 sm:$0xff]  }
  0x11   :  { %2840 = vmatpush3.bf16.msra.mxu1 %v3883_v15  ;;  %v4046_v47 = vld [vmem:[%s5073_s4 + $0x110] sm:$0xff]   ;;  %v4057_v49 = vld [vmem:[%s5073_s4 + $0x158] sm:$0xff]   ;;  %v4077_v54 = vld [vmem:[%s5073_s4 + $0x160] sm:$0xff]  }
  0x12   :  { %2841 = vmatprep.subr.bf16.mxu1 %v3901_v18  ;;  %v3516_v48 = vld [vmem:[%s5074_s0 + $0x74] ss:$28 sps:$4 sm:$0xff]   ;;  %v4065_v51 = vld [vmem:[%s5073_s4 + $0x118] sm:$0xff]   ;;  %v4083_v55 = vld [vmem:[%s5073_s4 + $0x120] sm:$0xff]  }
  0x13   :  { %2796 = vmatpush3.bf16.msra.mxu0 %v3895_v17  ;;  %v3521_v52 = vld [vmem:[%s5074_s0 + $0x7c] ss:$28 sps:$4 sm:$0xff]   ;;  %v3529_v57 = vld [vmem:[%s5074_s0 + $0xb4] ss:$28 sps:$4 sm:$0xff]   ;;  %v3528_v58 = vld [vmem:[%s5074_s0 + $0xa8] ss:$28 sps:$4 sm:$0xff]  }
  0x14   :  { %2797 = vmatprep.subr.bf16.mxu0 %v3913_v20  ;;  %v3523_v53 = vld [vmem:[%s5074_s0 + $0x78] ss:$28 sps:$4 sm:$0xff]   ;;  %v4099_v59 = vld [vmem:[%s5073_s4 + $0x168] sm:$0xff]  }
  0x15   :  { %2842 = vmatpush3.bf16.msra.mxu1 %v3907_v19  ;;  %v4104_v60 = vld [vmem:[%s5073_s4 + $0x128] sm:$0xff]   ;;  %v4118_v63 = vld [vmem:[%s5073_s4 + $0x170] sm:$0xff]  }
  0x16   :  { %2843 = vmatprep.subr.bf16.mxu1 %v3925_v22  ;;  %v3532_v61 = vld [vmem:[%s5074_s0 + $0xb0] ss:$28 sps:$4 sm:$0xff]  }
  0x17   :  { %2798 = vmatpush3.bf16.msra.mxu0 %v3919_v21  ;;  %v4113_v62 = vld [vmem:[%s5073_s4 + $0x188] sm:$0xff]  }
  0x18   :  { %2799 = vmatprep.subr.bf16.mxu0 %v3937_v24  ;;  %v158_v36 = vld [vmem:[%s5074_s0 + $0xe8] sm:$0xff] }
  0x19   :  { %2844 = vmatpush3.bf16.msra.mxu1 %v3931_v23 }
  0x1a   :  { %2845 = vmatprep.subr.bf16.mxu1 %v3949_v26 }
  0x1b   :  { %2800 = vmatpush3.bf16.msra.mxu0 %v3943_v25 }
  0x1c   :  { %2801 = vmatprep.subr.bf16.mxu0 %v3961_v28 }
  0x1d   :  { %2846 = vmatpush3.bf16.msra.mxu1 %v3955_v27 }
  0x1e   :  { %2847 = vmatprep.subr.bf16.mxu1 %v3973_v30 }
  0x1f   :  { %2802 = vmatpush3.bf16.msra.mxu0 %v3967_v29 }
  0x20   :  { %2879 = vmatprep.subr.bf16.mxu0 %v3991_v34 }
  0x21   :  { %2848 = vmatpush3.bf16.msra.mxu1 %v3986_v33 }
  0x22   :  { %680 = vmatmul.mubr.bf16.vlgmr.msra.gmra.mrb[0].mxu0 %v3496_v31  ;;  %3367 = vmatprep.subr.bf16.mxu1 %v3754_v38  ;;  %v157_v31 = vld [vmem:[%s5074_s0 + $0xe0] sm:$0xff] }
  0x23   :  { %2880 = vmatpush3.bf16.msra.mxu0 %v4004_v37  ;;  %687 = vmatprep.mubr.bf16.mxu0 %v3508_v42  ;;  %v2588_v32 = vcombine.high %v157_v31, %v157_v31  ;;  %v2590_v42 = vcombine.high %v158_v36, %v158_v36 }
  0x24   :  { %752 = vmatmul.mubr.bf16.vlgmr.msra.gmra.mrb[0].mxu1 %v3501_v35  ;;  %2881 = vmatprep.subr.bf16.mxu0 %v4010_v39  ;;  %v4128_v35 = vld [vmem:[%s5073_s4 + $0x130] sm:$0xff]  }
  0x25   :  { %3368 = vmatpush3.bf16.msra.mxu1 %v4022_v41  ;;  %759 = vmatprep.mubr.bf16.mxu1 %v3511_v44  ;;  %v4144_v44 = vld [vmem:[%s5073_s4 + $0x138] sm:$0xff]  }
  0x26   :  { %3369 = vmatprep.subr.bf16.mxu1 %v3754_v38 }
  0x27   :  { %2882 = vmatpush3.bf16.msra.mxu0 %v4016_v40 }
  0x28   :  { %2883 = vmatprep.subr.bf16.mxu0 %v4041_v46 }
  0x29   :  { %3370 = vmatpush3.bf16.msra.mxu1 %v4113_v62 }
  0x2a   :  { %688 = vmatmul.mubr.bf16.gmra.mrb[4].mxu0 %v3510_v43  ;;  %v4137_v43 = vld [vmem:[%s5073_s4 + $0x178] sm:$0xff]   ;;  %2978 = vmatprep.subr.bf16.mxu1 %v3805_v2 }
  0x2b   :  { %2884 = vmatpush3.bf16.msra.mxu0 %v4046_v47  ;;  %695 = vmatprep.mubr.bf16.mxu0 %v3516_v48  ;;  %v3545_v48 = vld [vmem:[%s5074_s0 + $0x14] ss:$28 sps:$4 sm:$0xff]  }
  0x2c   :  { %760 = vmatmul.mubr.bf16.gmra.mrb[4].mxu1 %v3513_v45  ;;  %2885 = vmatprep.subr.bf16.mxu0 %v4057_v49  ;;  %v2587_v45 = vcombine.low %v157_v31, %v157_v31  ;;  %v3555_v31 = vld [vmem:[%s5074_s0 + $0xbc] ss:$28 sps:$4 sm:$0xff]  }
  0x2d   :  { %767 = vmatprep.mubr.bf16.mxu1 %v3521_v52  ;;  %v3543_v52 = vld [vmem:[%s5074_s0 + $0x10] ss:$28 sps:$4 sm:$0xff]  }
  0x2f   :  { %2886 = vmatpush3.bf16.msra.mxu0 %v4065_v51 }
  0x30   :  { %2887 = vmatprep.subr.bf16.mxu0 %v4077_v54 }
  0x32   :  { %696 = vmatmul.mubr.bf16.gmra.mrb[8].mxu0 %v3519_v50  ;;  %v2589_v50 = vcombine.low %v158_v36, %v158_v36  ;;  %v159_v36 = vld [vmem:[%s5074_s0 + $0xf0] sm:$0xff] }
  0x33   :  { %703 = vmatprep.mubr.bf16.mxu0 %v3526_v56  ;;  %2888 = vmatpush3.bf16.msra.mxu0 %v4083_v55  ;;  %v3546_v56 = vld [vmem:[%s5074_s0 + $0x18] ss:$28 sps:$4 sm:$0xff]  }
  0x34   :  { %768 = vmatmul.mubr.bf16.gmra.mrb[8].mxu1 %v3523_v53  ;;  %2889 = vmatprep.subr.bf16.mxu0 %v4099_v59  ;;  %v3547_v53 = vld [vmem:[%s5074_s0 + $0x4c] ss:$28 sps:$4 sm:$0xff]  }
  0x35   :  { %775 = vmatprep.mubr.bf16.mxu1 %v3529_v57  ;;  %v3549_v57 = vld [vmem:[%s5074_s0 + $0x48] ss:$28 sps:$4 sm:$0xff]  }
  0x37   :  { %2890 = vmatpush3.bf16.msra.mxu0 %v4104_v60 }
  0x38   :  { %2891 = vmatprep.subr.bf16.mxu0 %v4118_v63 }
  0x3a   :  { %704 = vmatmul.mubr.bf16.gmra.mrb[12].mxu0 %v3528_v58  ;;  %v3551_v58 = vld [vmem:[%s5074_s0 + $0x84] ss:$28 sps:$4 sm:$0xff]  }
  0x3b   :  { %711 = vmatprep.mubr.bf16.mxu0 %v2588_v32  ;;  %2892 = vmatpush3.bf16.msra.mxu0 %v4128_v35  ;;  %v3554_v32 = vld [vmem:[%s5074_s0 + $0x88] ss:$28 sps:$4 sm:$0xff]  }
  0x3c   :  { %776 = vmatmul.mubr.bf16.gmra.mrb[12].mxu1 %v3532_v61  ;;  %2893 = vmatprep.subr.bf16.mxu0 %v4137_v43  ;;  %v3553_v61 = vld [vmem:[%s5074_s0 + $0x80] ss:$28 sps:$4 sm:$0xff]  }
  0x3d   :  { %783 = vmatprep.mubr.bf16.mxu1 %v2590_v42  ;;  %v3557_v42 = vld [vmem:[%s5074_s0 + $0xb8] ss:$28 sps:$4 sm:$0xff]  }
  0x3f   :  { %2894 = vmatpush3.bf16.msra.mxu0 %v4144_v44 }
  0x40   :  { %2932 = vmatprep.subr.bf16.mxu0 %v3794_v0 }
  0x42   :  { %712 = vmatmul.mubr.bf16.gmra.mrb[16].mxu0 %v2587_v45  ;;  %v2592_v45 = vcombine.high %v159_v36, %v159_v36 }
  0x43   :  { %823 = vmatprep.mubr.bf16.mxu0 %v3545_v48  ;;  %v3558_v48 = vld [vmem:[%s5074_s0 + $0xc0] ss:$28 sps:$4 sm:$0xff]  }
  0x44   :  { %784 = vmatmul.mubr.bf16.gmra.mrb[16].mxu1 %v2589_v50  ;;  %v2591_v50 = vcombine.low %v159_v36, %v159_v36  ;;  %v3573_v36 = vld [vmem:[%s5075_s1 + $0x40] ss:$28 sps:$4 sm:$0xff]  }
  0x45   :  { %3371 = vmatprep.mubr.msk.bf16.mxu1 %vm3755_vm0, %v3754_v38 }
  0x4a   :  { %824 = vmatmul.mubr.bf16.vlgmr.msra.gmra.mrb[20].mxu0 %v3543_v52  ;;  %v3564_v52 = vld [vmem:[%s5075_s1 + $0x4] ss:$28 sps:$4 sm:$0xff]  }
  0x4b   :  { %2933 = vmatpush3.bf16.msra.mxu0 %v3799_v1  ;;  %831 = vmatprep.mubr.bf16.mxu0 %v3547_v53  ;;  %v3561_v53 = vld [vmem:[%s5074_s0 + $0xf8] ss:$0 sps:$4 sm:$0xff]  }
  0x4c   :  { %2934 = vmatprep.subr.bf16.mxu0 %v3817_v4  ;;  %3372 = vmatmul.mubr.msk.bf16.vlgmr.msra.gmra.mrb[20].mxu1 %vm631_vm1, %v3546_v56  ;;  %v3567_v56 = vld [vmem:[%s5075_s1 + $0xc] ss:$28 sps:$4 sm:$0xff]  }
  0x4d   :  { %2979 = vmatpush3.bf16.msra.mxu1 %v3811_v3  ;;  %3375 = vmatprep.mubr.msk.bf16.mxu1 %vm3755_vm0, %v3754_v38  ;;  %v3550_v3 = vld [vmem:[%s5074_s0 + $0x50] ss:$28 sps:$4 sm:$0xff]  }
  0x4e   :  { %2980 = vmatprep.subr.bf16.mxu1 %v3829_v6 }
  0x4f   :  { %2935 = vmatpush3.bf16.msra.mxu0 %v3823_v5 }
  0x50   :  { %2936 = vmatprep.subr.bf16.mxu0 %v3841_v8 }
  0x51   :  { %2981 = vmatpush3.bf16.msra.mxu1 %v3835_v7 }
  0x52   :  { %832 = vmatmul.mubr.bf16.gmra.mrb[24].mxu0 %v3549_v57  ;;  %2982 = vmatprep.subr.bf16.mxu1 %v3853_v10  ;;  %v3562_v57 = vld [vmem:[%s5075_s1] ss:$28 sps:$4 sm:$0xff]  }
  0x53   :  { %2937 = vmatpush3.bf16.msra.mxu0 %v3847_v9  ;;  %839 = vmatprep.mubr.bf16.mxu0 %v3551_v58  ;;  %v3568_v58 = vld [vmem:[%s5075_s1 + $0x3c] ss:$28 sps:$4 sm:$0xff]  }
  0x54   :  { %2938 = vmatprep.subr.bf16.mxu0 %v3865_v12  ;;  %3376 = vmatmul.mubr.msk.bf16.gmra.mrb[24].mxu1 %vm631_vm1, %v3550_v3  ;;  %v3565_v3 = vld [vmem:[%s5075_s1 + $0x8] ss:$28 sps:$4 sm:$0xff]  }
  0x55   :  { %2983 = vmatpush3.bf16.msra.mxu1 %v3859_v11  ;;  %3379 = vmatprep.mubr.msk.bf16.mxu1 %vm3755_vm0, %v3754_v38 }
  0x56   :  { %2984 = vmatprep.subr.bf16.mxu1 %v3877_v14 }
  0x57   :  { %2939 = vmatpush3.bf16.msra.mxu0 %v3871_v13 }
  0x58   :  { %2940 = vmatprep.subr.bf16.mxu0 %v3889_v16 }
  0x59   :  { %2985 = vmatpush3.bf16.msra.mxu1 %v3883_v15 }
  0x5a   :  { %840 = vmatmul.mubr.bf16.gmra.mrb[28].mxu0 %v3553_v61  ;;  %2986 = vmatprep.subr.bf16.mxu1 %v3901_v18  ;;  %v3571_v61 = vld [vmem:[%s5075_s1 + $0x44] ss:$28 sps:$4 sm:$0xff]  }
  0x5b   :  { %2941 = vmatpush3.bf16.msra.mxu0 %v3895_v17  ;;  %847 = vmatprep.mubr.bf16.mxu0 %v3555_v31  ;;  %v3570_v31 = vld [vmem:[%s5075_s1 + $0x38] ss:$28 sps:$4 sm:$0xff]  }
  0x5c   :  { %2942 = vmatprep.subr.bf16.mxu0 %v3913_v20  ;;  %3380 = vmatmul.mubr.msk.bf16.gmra.mrb[28].mxu1 %vm631_vm1, %v3554_v32  ;;  %v3574_v32 = vld [vmem:[%s5075_s1 + $0x74] ss:$28 sps:$4 sm:$0xff]  }
  0x5d   :  { %3383 = vmatprep.mubr.msk.bf16.mxu1 %vm3755_vm0, %v3754_v38  ;;  %2987 = vmatpush3.bf16.msra.mxu1 %v3907_v19 }
  0x5e   :  { %2988 = vmatprep.subr.bf16.mxu1 %v3925_v22 }
  0x5f   :  { %2943 = vmatpush3.bf16.msra.mxu0 %v3919_v21 }
  0x60   :  { %2944 = vmatprep.subr.bf16.mxu0 %v3937_v24 }
  0x61   :  { %2989 = vmatpush3.bf16.msra.mxu1 %v3931_v23 }
  0x62   :  { %848 = vmatmul.mubr.bf16.gmra.mrb[32].mxu0 %v3557_v42  ;;  %2990 = vmatprep.subr.bf16.mxu1 %v3949_v26  ;;  %v3577_v42 = vld [vmem:[%s5075_s1 + $0x7c] ss:$28 sps:$4 sm:$0xff]  }
  0x63   :  { %855 = vmatprep.mubr.bf16.mxu0 %v2592_v45  ;;  %2945 = vmatpush3.bf16.msra.mxu0 %v3943_v25  ;;  %v3576_v45 = vld [vmem:[%s5075_s1 + $0x70] ss:$28 sps:$4 sm:$0xff]  }
  0x64   :  { %2946 = vmatprep.subr.bf16.mxu0 %v3961_v28  ;;  %3384 = vmatmul.mubr.msk.bf16.gmra.mrb[32].mxu1 %vm631_vm1, %v3558_v48  ;;  %v3580_v48 = vld [vmem:[%s5075_s1 + $0xac] ss:$28 sps:$4 sm:$0xff]  }
  0x65   :  { %3387 = vmatprep.mubr.msk.bf16.mxu1 %vm3755_vm0, %v3754_v38  ;;  %2991 = vmatpush3.bf16.msra.mxu1 %v3955_v27 }
  0x66   :  { %2992 = vmatprep.subr.bf16.mxu1 %v3973_v30 }
  0x67   :  { %2947 = vmatpush3.bf16.msra.mxu0 %v3967_v29 }
  0x68   :  { %3024 = vmatprep.subr.bf16.mxu0 %v3991_v34 }
  0x69   :  { %2993 = vmatpush3.bf16.msra.mxu1 %v3986_v33 }
  0x6a   :  { %856 = vmatmul.mubr.bf16.gmra.mrb[36].mxu0 %v2591_v50  ;;  %3391 = vmatprep.subr.bf16.mxu1 %v3754_v38  ;;  %v3579_v50 = vld [vmem:[%s5075_s1 + $0x78] ss:$28 sps:$4 sm:$0xff]  }
  0x6b   :  { %1191 = vmatprep.mubr.bf16.mxu0 %v3564_v52  ;;  %v976_v52 = vld [vmem:[%s5075_s1 + $0xe0] sm:$0xff] }
  0x6c   :  { %3388 = vmatmul.mubr.msk.bf16.gmra.mrb[36].mxu1 %vm631_vm1, %v3561_v53  ;;  %v3582_v53 = vld [vmem:[%s5075_s1 + $0xa8] ss:$28 sps:$4 sm:$0xff]  }
  0x6d   :  { %1263 = vmatprep.mubr.bf16.mxu1 %v3567_v56  ;;  %v2678_v56 = vcombine.high %v976_v52, %v976_v52 }
  0x72   :  { %1192 = vmatmul.mubr.bf16.vlgmr.msra.gmra.mrb[40].mxu0 %v3562_v57  ;;  %v977_v57 = vld [vmem:[%s5075_s1 + $0xe8] sm:$0xff] }
  0x73   :  { %3025 = vmatpush3.bf16.msra.mxu0 %v4004_v37  ;;  %1199 = vmatprep.mubr.bf16.mxu0 %v3568_v58  ;;  %v3585_v58 = vld [vmem:[%s5075_s1 + $0xb0] ss:$28 sps:$4 sm:$0xff]  }
  0x74   :  { %3026 = vmatprep.subr.bf16.mxu0 %v4010_v39  ;;  %1264 = vmatmul.mubr.bf16.vlgmr.msra.gmra.mrb[40].mxu1 %v3565_v3  ;;  %v2680_v3 = vcombine.high %v977_v57, %v977_v57 }
  0x75   :  { %3392 = vmatpush3.bf16.msra.mxu1 %v4022_v41  ;;  %1271 = vmatprep.mubr.bf16.mxu1 %v3571_v61  ;;  %v2677_v61 = vcombine.low %v976_v52, %v976_v52  ;;  %v3713_v52 = vld [vmem:[%s5073_s4 + $0x58] sm:$0xff]  }
  0x76   :  { %3393 = vmatprep.subr.bf16.mxu1 %v3754_v38 }
  0x77   :  { %3027 = vmatpush3.bf16.msra.mxu0 %v4016_v40 }
  0x78   :  { %3028 = vmatprep.subr.bf16.mxu0 %v4041_v46 }
  0x79   :  { %3394 = vmatpush3.bf16.msra.mxu1 %v4113_v62 }
  0x7a   :  { %1200 = vmatmul.mubr.bf16.gmra.mrb[44].mxu0 %v3570_v31  ;;  %3123 = vmatprep.subr.bf16.mxu1 %v3805_v2  ;;  %v3583_v2 = vld [vmem:[%s5075_s1 + $0xb4] ss:$28 sps:$4 sm:$0xff]  }
  0x7b   :  { %3029 = vmatpush3.bf16.msra.mxu0 %v4046_v47  ;;  %1207 = vmatprep.mubr.bf16.mxu0 %v3574_v32  ;;  %v3592_v31 = vld [vmem:[%s5075_s1 + $0x14] ss:$28 sps:$4 sm:$0xff]   ;;  %v2679_v32 = vcombine.low %v977_v57, %v977_v57  ;;  %v4542_v57 = vld [vmem:[%s5078_s5] ss:$0 sm:$0xff] }
  0x7c   :  { %3030 = vmatprep.subr.bf16.mxu0 %v4057_v49  ;;  %1272 = vmatmul.mubr.bf16.gmra.mrb[44].mxu1 %v3573_v36  ;;  %v3590_v36 = vld [vmem:[%s5075_s1 + $0x10] ss:$28 sps:$4 sm:$0xff]  }
  0x7d   :  { %1279 = vmatprep.mubr.bf16.mxu1 %v3577_v42  ;;  %v3594_v42 = vld [vmem:[%s5075_s1 + $0x4c] ss:$28 sps:$4 sm:$0xff]  }
  0x7f   :  { %3031 = vmatpush3.bf16.msra.mxu0 %v4065_v51 }
  0x80   :  { %3032 = vmatprep.subr.bf16.mxu0 %v4077_v54 }
  0x82   :  { %1208 = vmatmul.mubr.bf16.gmra.mrb[48].mxu0 %v3576_v45  ;;  %v3593_v45 = vld [vmem:[%s5075_s1 + $0x18] ss:$28 sps:$4 sm:$0xff]  }
  0x83   :  { %3033 = vmatpush3.bf16.msra.mxu0 %v4083_v55  ;;  %1215 = vmatprep.mubr.bf16.mxu0 %v3580_v48  ;;  %v3596_v48 = vld [vmem:[%s5075_s1 + $0x48] ss:$28 sps:$4 sm:$0xff]  }
  0x84   :  { %3034 = vmatprep.subr.bf16.mxu0 %v4099_v59  ;;  %1280 = vmatmul.mubr.bf16.gmra.mrb[48].mxu1 %v3579_v50  ;;  %v3711_v50 = vld [vmem:[%s5073_s4 + $0x88] sm:$0xff]  }
  0x85   :  { %1287 = vmatprep.mubr.bf16.mxu1 %v3583_v2  ;;  %v3712_v2 = vld [vmem:[%s5073_s4 + $0x10] sm:$0xff]  }
  0x87   :  { %3035 = vmatpush3.bf16.msra.mxu0 %v4104_v60 }
  0x88   :  { %3036 = vmatprep.subr.bf16.mxu0 %v4118_v63 }
  0x8a   :  { %1216 = vmatmul.mubr.bf16.gmra.mrb[52].mxu0 %v3582_v53  ;;  %v3714_v53 = vld [vmem:[%s5073_s4 + $0xd0] sm:$0xff]  }
  0x8b   :  { %1223 = vmatprep.mubr.bf16.mxu0 %v2678_v56  ;;  %3037 = vmatpush3.bf16.msra.mxu0 %v4128_v35 }
  0x8c   :  { %3038 = vmatprep.subr.bf16.mxu0 %v4137_v43  ;;  %1288 = vmatmul.mubr.bf16.gmra.mrb[52].mxu1 %v3585_v58 }
  0x8d   :  { %1295 = vmatprep.mubr.bf16.mxu1 %v2680_v3  ;;  %v3647_v3 = vld [vmem:[%s5076_s2 + $0x80] ss:$28 sps:$4 sm:$0xff]  }
  0x8f   :  { %3039 = vmatpush3.bf16.msra.mxu0 %v4144_v44 }
  0x90   :  { %3077 = vmatprep.subr.bf16.mxu0 %v3794_v0  ;;  %v4332_v0 = vld [vmem:[%s5073_s4 + $0x80] sm:$0xff]  }
  0x92   :  { %1224 = vmatmul.mubr.bf16.gmra.mrb[56].mxu0 %v2677_v61  ;;  %v3715_v61 = vld [vmem:[%s5073_s4 + $0x90] sm:$0xff]  }
  0x93   :  { %1335 = vmatprep.mubr.bf16.mxu0 %v3592_v31 }
  0x94   :  { %1296 = vmatmul.mubr.bf16.gmra.mrb[56].mxu1 %v2679_v32 }
  0x95   :  { %3395 = vmatprep.mubr.msk.bf16.mxu1 %vm3755_vm0, %v3754_v38 }
  0x9a   :  { %1336 = vmatmul.mubr.bf16.vlgmr.msra.gmra.mrb[60].mxu0 %v3590_v36  ;;  %v3716_v36 = vld [vmem:[%s5073_s4 + $0x18] sm:$0xff]  }
  0x9b   :  { %3078 = vmatpush3.bf16.msra.mxu0 %v3799_v1  ;;  %1343 = vmatprep.mubr.bf16.mxu0 %v3594_v42  ;;  %v3598_v1 = vld [vmem:[%s5075_s1 + $0x84] ss:$28 sps:$4 sm:$0xff]   ;;  %v3717_v42 = vld [vmem:[%s5073_s4 + $0xd8] sm:$0xff]  }
  0x9c   :  { %3079 = vmatprep.subr.bf16.mxu0 %v3817_v4  ;;  %3396 = vmatmul.mubr.msk.bf16.vlgmr.msra.gmra.mrb[60].mxu1 %vm631_vm1, %v3593_v45  ;;  %v3597_v4 = vld [vmem:[%s5075_s1 + $0x50] ss:$28 sps:$4 sm:$0xff]   ;;  %v3649_v45 = vld [vmem:[%s5076_s2 + $0xbc] ss:$28 sps:$4 sm:$0xff]  }
  0x9d   :  { %3124 = vmatpush3.bf16.msra.mxu1 %v4332_v0  ;;  %3399 = vmatprep.mubr.msk.bf16.mxu1 %vm3755_vm0, %v3754_v38 }
  0x9e   :  { %3125 = vmatprep.subr.bf16.mxu1 %v3829_v6  ;;  %v3602_v6 = vld [vmem:[%s5075_s1 + $0xbc] ss:$28 sps:$4 sm:$0xff]  }
  0x9f   :  { %3080 = vmatpush3.bf16.msra.mxu0 %v3823_v5  ;;  %v3600_v5 = vld [vmem:[%s5075_s1 + $0x80] ss:$28 sps:$4 sm:$0xff]  }
  0xa0   :  { %3081 = vmatprep.subr.bf16.mxu0 %v3841_v8  ;;  %v978_v8 = vld [vmem:[%s5075_s1 + $0xf0] sm:$0xff] }
  0xa1   :  { %3126 = vmatpush3.bf16.msra.mxu1 %v3835_v7  ;;  %v3601_v7 = vld [vmem:[%s5075_s1 + $0x88] ss:$28 sps:$4 sm:$0xff]  }
  0xa2   :  { %1344 = vmatmul.mubr.bf16.gmra.mrb[64].mxu0 %v3596_v48  ;;  %3127 = vmatprep.subr.bf16.mxu1 %v3853_v10  ;;  %v2682_v10 = vcombine.high %v978_v8, %v978_v8 }
  0xa3   :  { %3082 = vmatpush3.bf16.msra.mxu0 %v3847_v9  ;;  %1351 = vmatprep.mubr.bf16.mxu0 %v3598_v1  ;;  %v3604_v9 = vld [vmem:[%s5075_s1 + $0xb8] ss:$28 sps:$4 sm:$0xff]   ;;  %v3718_v1 = vld [vmem:[%s5073_s4 + $0x60] sm:$0xff]  }
  0xa4   :  { %3083 = vmatprep.subr.bf16.mxu0 %v3865_v12  ;;  %3400 = vmatmul.mubr.msk.bf16.gmra.mrb[64].mxu1 %vm631_vm1, %v3597_v4  ;;  %v2681_v12 = vcombine.low %v978_v8, %v978_v8 }
  0xa5   :  { %3128 = vmatpush3.bf16.msra.mxu1 %v3859_v11  ;;  %3403 = vmatprep.mubr.msk.bf16.mxu1 %vm3755_vm0, %v3754_v38  ;;  %v3605_v11 = vld [vmem:[%s5075_s1 + $0xc0] ss:$28 sps:$4 sm:$0xff]  }
  0xa6   :  { %3129 = vmatprep.subr.bf16.mxu1 %v3877_v14  ;;  %v3608_v14 = vld [vmem:[%s5075_s1 + $0xf8] ss:$0 sps:$4 sm:$0xff]  }
  0xa7   :  { %3084 = vmatpush3.bf16.msra.mxu0 %v3871_v13  ;;  %v3611_v13 = vld [vmem:[%s5076_s2 + $0x4] ss:$28 sps:$4 sm:$0xff]  }
  0xa8   :  { %3085 = vmatprep.subr.bf16.mxu0 %v3889_v16  ;;  %v3609_v16 = vld [vmem:[%s5076_s2] ss:$28 sps:$4 sm:$0xff]  }
  0xa9   :  { %3130 = vmatpush3.bf16.msra.mxu1 %v3883_v15  ;;  %v3614_v15 = vld [vmem:[%s5076_s2 + $0xc] ss:$28 sps:$4 sm:$0xff]  }
  0xaa   :  { %1352 = vmatmul.mubr.bf16.gmra.mrb[68].mxu0 %v3600_v5  ;;  %3131 = vmatprep.subr.bf16.mxu1 %v3901_v18  ;;  %v3612_v18 = vld [vmem:[%s5076_s2 + $0x8] ss:$28 sps:$4 sm:$0xff]  }
  0xab   :  { %3086 = vmatpush3.bf16.msra.mxu0 %v3895_v17  ;;  %1359 = vmatprep.mubr.bf16.mxu0 %v3602_v6  ;;  %v3615_v17 = vld [vmem:[%s5076_s2 + $0x3c] ss:$28 sps:$4 sm:$0xff]  }
  0xac   :  { %3087 = vmatprep.subr.bf16.mxu0 %v3913_v20  ;;  %3404 = vmatmul.mubr.msk.bf16.gmra.mrb[68].mxu1 %vm631_vm1, %v3601_v7  ;;  %v3617_v20 = vld [vmem:[%s5076_s2 + $0x38] ss:$28 sps:$4 sm:$0xff]   ;;  %v3648_v7 = vld [vmem:[%s5076_s2 + $0x88] ss:$28 sps:$4 sm:$0xff]  }
  0xad   :  { %3407 = vmatprep.mubr.msk.bf16.mxu1 %vm3755_vm0, %v3754_v38  ;;  %3132 = vmatpush3.bf16.msra.mxu1 %v3907_v19  ;;  %v3618_v19 = vld [vmem:[%s5076_s2 + $0x44] ss:$28 sps:$4 sm:$0xff]  }
  0xae   :  { %3133 = vmatprep.subr.bf16.mxu1 %v3925_v22  ;;  %v3620_v22 = vld [vmem:[%s5076_s2 + $0x40] ss:$28 sps:$4 sm:$0xff]  }
  0xaf   :  { %3088 = vmatpush3.bf16.msra.mxu0 %v3919_v21  ;;  %v3621_v21 = vld [vmem:[%s5076_s2 + $0x74] ss:$28 sps:$4 sm:$0xff]  }
  0xb0   :  { %3089 = vmatprep.subr.bf16.mxu0 %v3937_v24  ;;  %v3704_v24 = vld [vmem:[%s5073_s4 + $0xc0] sm:$0xff]  }
  0xb1   :  { %3134 = vmatpush3.bf16.msra.mxu1 %v3931_v23  ;;  %v3624_v23 = vld [vmem:[%s5076_s2 + $0x7c] ss:$28 sps:$4 sm:$0xff]  }
  0xb2   :  { %1360 = vmatmul.mubr.bf16.gmra.mrb[72].mxu0 %v3604_v9  ;;  %3135 = vmatprep.subr.bf16.mxu1 %v3949_v26  ;;  %v3627_v26 = vld [vmem:[%s5076_s2 + $0xac] ss:$28 sps:$4 sm:$0xff]  }
  0xb3   :  { %1367 = vmatprep.mubr.bf16.mxu0 %v2682_v10  ;;  %3090 = vmatpush3.bf16.msra.mxu0 %v3943_v25  ;;  %v3623_v25 = vld [vmem:[%s5076_s2 + $0x70] ss:$28 sps:$4 sm:$0xff]   ;;  %v3719_v10 = vld [vmem:[%s5073_s4 + $0x98] sm:$0xff]  }
  0xb4   :  { %3091 = vmatprep.subr.bf16.mxu0 %v3961_v28  ;;  %3408 = vmatmul.mubr.msk.bf16.gmra.mrb[72].mxu1 %vm631_vm1, %v3605_v11  ;;  %v3630_v28 = vld [vmem:[%s5076_s2 + $0xb4] ss:$28 sps:$4 sm:$0xff]  }
  0xb5   :  { %3411 = vmatprep.mubr.msk.bf16.mxu1 %vm3755_vm0, %v3754_v38  ;;  %3136 = vmatpush3.bf16.msra.mxu1 %v3955_v27  ;;  %v3626_v27 = vld [vmem:[%s5076_s2 + $0x78] ss:$28 sps:$4 sm:$0xff]  }
  0xb6   :  { %3137 = vmatprep.subr.bf16.mxu1 %v3973_v30  ;;  %v3629_v30 = vld [vmem:[%s5076_s2 + $0xa8] ss:$28 sps:$4 sm:$0xff]  }
  0xb7   :  { %3092 = vmatpush3.bf16.msra.mxu0 %v3967_v29  ;;  %v1497_v29 = vld [vmem:[%s5076_s2 + $0xe0] sm:$0xff] }
  0xb8   :  { %3169 = vmatprep.subr.bf16.mxu0 %v3991_v34  ;;  %v1498_v34 = vld [vmem:[%s5076_s2 + $0xe8] sm:$0xff] }
  0xb9   :  { %3138 = vmatpush3.bf16.msra.mxu1 %v3986_v33  ;;  %v2718_v33 = vcombine.high %v1497_v29, %v1497_v29 }
  0xba   :  { %1368 = vmatmul.mubr.bf16.gmra.mrb[76].mxu0 %v2681_v12  ;;  %3415 = vmatprep.subr.bf16.mxu1 %v3754_v38 }
  0xbb   :  { %1712 = vmatprep.mubr.bf16.mxu0 %v3611_v13  ;;  %v3720_v13 = vld [vmem:[%s5073_s4 + $0x20] sm:$0xff]  }
  0xbc   :  { %3412 = vmatmul.mubr.msk.bf16.gmra.mrb[76].mxu1 %vm631_vm1, %v3608_v14 }
  0xbd   :  { %1784 = vmatprep.mubr.bf16.mxu1 %v3614_v15 }
  0xc2   :  { %1713 = vmatmul.mubr.bf16.vlgmr.msra.gmra.mrb[80].mxu0 %v3609_v16  ;;  %v3721_v16 = vld [vmem:[%s5073_s4 + $0x68] sm:$0xff]  }
  0xc3   :  { %3170 = vmatpush3.bf16.msra.mxu0 %v4004_v37  ;;  %1720 = vmatprep.mubr.bf16.mxu0 %v3615_v17  ;;  %v3632_v37 = vld [vmem:[%s5076_s2 + $0xb0] ss:$28 sps:$4 sm:$0xff]   ;;  %v3722_v17 = vld [vmem:[%s5073_s4 + $0xe0] sm:$0xff]  }
  0xc4   :  { %3171 = vmatprep.subr.bf16.mxu0 %v4010_v39  ;;  %1785 = vmatmul.mubr.bf16.vlgmr.msra.gmra.mrb[80].mxu1 %v3612_v18  ;;  %v2720_v39 = vcombine.high %v1498_v34, %v1498_v34  ;;  %v4586_v18 = vld [vmem:[%s5076_s2 + $0xf0] sm:$0xff] }
  0xc5   :  { %3416 = vmatpush3.bf16.msra.mxu1 %v4022_v41  ;;  %1792 = vmatprep.mubr.bf16.mxu1 %v3618_v19  ;;  %v3639_v41 = vld [vmem:[%s5076_s2 + $0x14] ss:$28 sps:$4 sm:$0xff]  }
  0xc6   :  { %3417 = vmatprep.subr.bf16.mxu1 %v3754_v38 }
  0xc7   :  { %3172 = vmatpush3.bf16.msra.mxu0 %v4016_v40  ;;  %v2717_v40 = vcombine.low %v1497_v29, %v1497_v29 }
  0xc8   :  { %3173 = vmatprep.subr.bf16.mxu0 %v4041_v46  ;;  %v3705_v46 = vld [vmem:[%s5073_s4 + $0x40] sm:$0xff]  }
  0xc9   :  { %3418 = vmatpush3.bf16.msra.mxu1 %v4113_v62  ;;  %v3708_v62 = vld [vmem:[%s5073_s4 + $0x8] sm:$0xff]  }
  0xca   :  { %1721 = vmatmul.mubr.bf16.gmra.mrb[84].mxu0 %v3617_v20  ;;  %3268 = vmatprep.subr.bf16.mxu1 %v3704_v24 }
  0xcb   :  { %3174 = vmatpush3.bf16.msra.mxu0 %v4046_v47  ;;  %1728 = vmatprep.mubr.bf16.mxu0 %v3621_v21  ;;  %v2719_v47 = vcombine.low %v1498_v34, %v1498_v34 }
  0xcc   :  { %3175 = vmatprep.subr.bf16.mxu0 %v4057_v49  ;;  %1793 = vmatmul.mubr.bf16.gmra.mrb[84].mxu1 %v3620_v22  ;;  %v3637_v49 = vld [vmem:[%s5076_s2 + $0x10] ss:$28 sps:$4 sm:$0xff]   ;;  %v3651_v22 = vld [vmem:[%s5076_s2 + $0xb8] ss:$28 sps:$4 sm:$0xff]  }
  0xcd   :  { %1800 = vmatprep.mubr.bf16.mxu1 %v3624_v23  ;;  %v3723_v23 = vld [vmem:[%s5073_s4 + $0xa0] sm:$0xff]  }
  0xcf   :  { %3176 = vmatpush3.bf16.msra.mxu0 %v4065_v51  ;;  %v3641_v51 = vld [vmem:[%s5076_s2 + $0x4c] ss:$28 sps:$4 sm:$0xff]  }
  0xd0   :  { %3177 = vmatprep.subr.bf16.mxu0 %v4077_v54  ;;  %v3640_v54 = vld [vmem:[%s5076_s2 + $0x18] ss:$28 sps:$4 sm:$0xff]  }
  0xd2   :  { %1729 = vmatmul.mubr.bf16.gmra.mrb[88].mxu0 %v3623_v25 }
  0xd3   :  { %3178 = vmatpush3.bf16.msra.mxu0 %v4083_v55  ;;  %1736 = vmatprep.mubr.bf16.mxu0 %v3627_v26  ;;  %v3706_v55 = vld [vmem:[%s5073_s4] sm:$0xff]   ;;  %v3724_v26 = vld [vmem:[%s5073_s4 + $0x28] sm:$0xff]  }
  0xd4   :  { %3179 = vmatprep.subr.bf16.mxu0 %v4099_v59  ;;  %1801 = vmatmul.mubr.bf16.gmra.mrb[88].mxu1 %v3626_v27  ;;  %v3707_v59 = vld [vmem:[%s5073_s4 + $0x48] sm:$0xff]  }
  0xd5   :  { %1808 = vmatprep.mubr.bf16.mxu1 %v3630_v28  ;;  %v3725_v27 = vld [vmem:[%s5073_s4 + $0xe8] sm:$0xff]   ;;  %v2722_v28 = vcombine.high %v4586_v18, %v4586_v18 }
  0xd7   :  { %3180 = vmatpush3.bf16.msra.mxu0 %v4104_v60  ;;  %v3643_v60 = vld [vmem:[%s5076_s2 + $0x48] ss:$28 sps:$4 sm:$0xff]  }
  0xd8   :  { %3181 = vmatprep.subr.bf16.mxu0 %v4118_v63  ;;  %v3709_v63 = vld [vmem:[%s5073_s4 + $0xc8] sm:$0xff]  }
  0xda   :  { %1737 = vmatmul.mubr.bf16.gmra.mrb[92].mxu0 %v3629_v30 }
  0xdb   :  { %1744 = vmatprep.mubr.bf16.mxu0 %v2718_v33  ;;  %3182 = vmatpush3.bf16.msra.mxu0 %v4128_v35  ;;  %v3645_v35 = vld [vmem:[%s5076_s2 + $0x84] ss:$28 sps:$4 sm:$0xff]   ;;  %v3726_v33 = vld [vmem:[%s5073_s4 + $0x70] sm:$0xff]  }
  0xdc   :  { %3183 = vmatprep.subr.bf16.mxu0 %v4137_v43  ;;  %1809 = vmatmul.mubr.bf16.gmra.mrb[92].mxu1 %v3632_v37  ;;  %v3710_v43 = vld [vmem:[%s5073_s4 + $0x50] sm:$0xff]  }
  0xdd   :  { %1816 = vmatprep.mubr.bf16.mxu1 %v2720_v39 }
  0xdf   :  { %3184 = vmatpush3.bf16.msra.mxu0 %v4144_v44  ;;  %v3644_v44 = vld [vmem:[%s5076_s2 + $0x50] ss:$28 sps:$4 sm:$0xff]  }
  0xe0   :  { %3222 = vmatprep.subr.bf16.mxu0 %v3705_v46 }
  0xe2   :  { %1745 = vmatmul.mubr.bf16.gmra.mrb[96].mxu0 %v2717_v40  ;;  %v3652_v40 = vld [vmem:[%s5076_s2 + $0xc0] ss:$28 sps:$4 sm:$0xff]  }
  0xe3   :  { %1856 = vmatprep.mubr.bf16.mxu0 %v3639_v41 }
  0xe4   :  { %1817 = vmatmul.mubr.bf16.gmra.mrb[96].mxu1 %v2719_v47  ;;  %v3727_v47 = vld [vmem:[%s5073_s4 + $0xa8] sm:$0xff]  }
  0xe5   :  { %3419 = vmatprep.mubr.msk.bf16.mxu1 %vm3755_vm0, %v3754_v38 }
  0xea   :  { %1857 = vmatmul.mubr.bf16.vlgmr.msra.gmra.mrb[100].mxu0 %v3637_v49 }
  0xeb   :  { %3223 = vmatpush3.bf16.msra.mxu0 %v3706_v55  ;;  %1864 = vmatprep.mubr.bf16.mxu0 %v3641_v51 }
  0xec   :  { %3224 = vmatprep.subr.bf16.mxu0 %v3707_v59  ;;  %3420 = vmatmul.mubr.msk.bf16.vlgmr.msra.gmra.mrb[100].mxu1 %vm631_vm1, %v3640_v54  ;;  %v3728_v54 = vld [vmem:[%s5073_s4 + $0x30] sm:$0xff]  }
  0xed   :  { %3269 = vmatpush3.bf16.msra.mxu1 %v4332_v0  ;;  %3423 = vmatprep.mubr.msk.bf16.mxu1 %vm3755_vm0, %v3754_v38 }
  0xee   :  { %3270 = vmatprep.subr.bf16.mxu1 %v3709_v63 }
  0xef   :  { %3225 = vmatpush3.bf16.msra.mxu0 %v3708_v62  ;;  %v3730_v62 = vld [vmem:[%s5073_s4 + $0x78] sm:$0xff]  }
  0xf0   :  { %3226 = vmatprep.subr.bf16.mxu0 %v3710_v43 }
  0xf1   :  { %3271 = vmatpush3.bf16.msra.mxu1 %v3711_v50  ;;  %v3731_v50 = vld [vmem:[%s5073_s4 + $0xb0] sm:$0xff]  }
  0xf2   :  { %1865 = vmatmul.mubr.bf16.gmra.mrb[104].mxu0 %v3643_v60  ;;  %3272 = vmatprep.subr.bf16.mxu1 %v3714_v53  ;;  %v3729_v60 = vld [vmem:[%s5073_s4 + $0xf0] sm:$0xff]   ;;  %v3732_v53 = vld [vmem:[%s5073_s4 + $0x38] sm:$0xff]  }
  0xf3   :  { %3227 = vmatpush3.bf16.msra.mxu0 %v3712_v2  ;;  %1872 = vmatprep.mubr.bf16.mxu0 %v3645_v35 }
  0xf4   :  { %3228 = vmatprep.subr.bf16.mxu0 %v3713_v52  ;;  %3424 = vmatmul.mubr.msk.bf16.gmra.mrb[104].mxu1 %vm631_vm1, %v3644_v44  ;;  %v2721_v44 = vcombine.low %v4586_v18, %v4586_v18 }
  0xf5   :  { %v2803_v56 = vpop.f32.mrb[0].mxu0  ;;  %3273 = vmatpush3.bf16.msra.mxu1 %v3715_v61  ;;  %3427 = vmatprep.mubr.msk.bf16.mxu1 %vm3755_vm0, %v3754_v38 }
  0xf6   :  { %v2804_v58 = vpop.f32.mrb[1].mxu0  ;;  %3274 = vmatprep.subr.bf16.mxu1 %v3717_v42 }
  0xf7   :  { %v2805_v31 = vadd.f32 %v2804_v58, %v2803_v56  ;;  %v2806_v32 = vpop.f32.mrb[2].mxu0  ;;  %3229 = vmatpush3.bf16.msra.mxu0 %v3716_v36  ;;  %v2849_v0 = vpop.f32.mrb[0].mxu1  ;;  %v3733_v56 = vld [vmem:[%s5073_s4 + $0xf8] sm:$0xff]   ;;  %v3658_v58 = vld [vmem:[%s5077_s3 + $0x4] ss:$28 sps:$4 sm:$0xff]  }
  0xf8   :  { %v2807_v48 = vpop.f32.mrb[3].mxu0  ;;  %3230 = vmatprep.subr.bf16.mxu0 %v3718_v1  ;;  %v2850_v6 = vpop.f32.mrb[1].mxu1  ;;  %v3735_v1 = vld [vmem:[%s5073_s4 + $0xb8] sm:$0xff]  }
  0xf9   :  { %v682_v4 = vadd.f32 %v2805_v31, %v4542_v57  ;;  %v2808_v5 = vadd.f32 %v2807_v48, %v2806_v32  ;;  %v2851_v8 = vadd.f32 %v2850_v6, %v2849_v0  ;;  %v2852_v9 = vpop.f32.mrb[2].mxu1  ;;  %3275 = vmatpush3.bf16.msra.mxu1 %v3719_v10  ;;  %v3734_v31 = vld [vmem:[%s5073_s4 + $0x140] sm:$0xff]  }
  0xfa   :  { %1873 = vmatmul.mubr.bf16.gmra.mrb[108].mxu0 %v3647_v3  ;;  %v2853_v12 = vpop.f32.mrb[3].mxu1  ;;  %3276 = vmatprep.subr.bf16.mxu1 %v3722_v17 }
  0xfb   :  { %v685_v11 = vadd.f32 %v2808_v5, %v4542_v57  ;;  %3231 = vmatpush3.bf16.msra.mxu0 %v3720_v13  ;;  %1880 = vmatprep.mubr.bf16.mxu0 %v3649_v45  ;;  %v4575_v14 = vadd.f32 %v2851_v8, %v682_v4  ;;  %v2854_v15 = vadd.f32 %v2853_v12, %v2852_v9  ;;  %v3655_v45 = vld [vmem:[%s5076_s2 + $0xf8] ss:$0 sps:$4 sm:$0xff]   ;;  %v3661_v4 = vld [vmem:[%s5077_s3 + $0xc] ss:$28 sps:$4 sm:$0xff]   ;;  %v3656_v12 = vld [vmem:[%s5077_s3] ss:$28 sps:$4 sm:$0xff]  }
  0xfc   :  { %3232 = vmatprep.subr.bf16.mxu0 %v3721_v16  ;;  %3428 = vmatmul.mubr.msk.bf16.gmra.mrb[108].mxu1 %vm631_vm1, %v3648_v7  ;;  %v3662_v16 = vld [vmem:[%s5077_s3 + $0x3c] ss:$28 sps:$4 sm:$0xff]  }
  0xfd   :  { %v2809_v19 = vpop.f32.mrb[4].mxu0  ;;  %v4589_v20 = vadd.f32 %v2854_v15, %v685_v11  ;;  %3431 = vmatprep.mubr.msk.bf16.mxu1 %vm3755_vm0, %v3754_v38  ;;  %3277 = vmatpush3.bf16.msra.mxu1 %v3723_v23  ;;  %v3659_v23 = vld [vmem:[%s5077_s3 + $0x8] ss:$28 sps:$4 sm:$0xff]  }
  0xfe   :  { %v2810_v21 = vpop.f32.mrb[5].mxu0  ;;  %3278 = vmatprep.subr.bf16.mxu1 %v3725_v27 }
  0xff   :  { %v2811_v24 = vadd.f32 %v2810_v21, %v2809_v19  ;;  %v2812_v25 = vpop.f32.mrb[6].mxu0  ;;  %3233 = vmatpush3.bf16.msra.mxu0 %v3724_v26  ;;  %v2855_v29 = vpop.f32.mrb[4].mxu1  ;;  %v3665_v26 = vld [vmem:[%s5077_s3 + $0x44] ss:$28 sps:$4 sm:$0xff]  }
 0x100   :  { %v2813_v30 = vpop.f32.mrb[7].mxu0  ;;  %3234 = vmatprep.subr.bf16.mxu0 %v3726_v33  ;;  %v2856_v39 = vpop.f32.mrb[5].mxu1 }
 0x101   :  { %v690_v34 = vadd.f32 %v2811_v24, %v4542_v57  ;;  %v2814_v37 = vadd.f32 %v2813_v30, %v2812_v25  ;;  %v2857_v41 = vadd.f32 %v2856_v39, %v2855_v29  ;;  %v2858_v46 = vpop.f32.mrb[6].mxu1  ;;  %3279 = vmatpush3.bf16.msra.mxu1 %v3727_v47  ;;  %v3736_v29 = vld [vmem:[%s5073_s4 + $0x100] sm:$0xff]  }
 0x102   :  { %1881 = vmatmul.mubr.bf16.gmra.mrb[112].mxu0 %v3651_v22  ;;  %v2859_v51 = vpop.f32.mrb[7].mxu1  ;;  %3280 = vmatprep.subr.bf16.mxu1 %v3729_v60 }
 0x103   :  { %v693_v49 = vadd.f32 %v2814_v37, %v4542_v57  ;;  %1888 = vmatprep.mubr.bf16.mxu0 %v2722_v28  ;;  %3235 = vmatpush3.bf16.msra.mxu0 %v3728_v54  ;;  %v4621_v55 = vadd.f32 %v2857_v41, %v690_v34  ;;  %v2860_v59 = vadd.f32 %v2859_v51, %v2858_v46  ;;  %v3737_v34 = vld [vmem:[%s5073_s4 + $0x148] sm:$0xff]   ;;  %v3738_v41 = vld [vmem:[%s5073_s4 + $0x180] sm:$0xff]   ;;  %v3664_v46 = vld [vmem:[%s5077_s3 + $0x38] ss:$28 sps:$4 sm:$0xff]  }
 0x104   :  { %3236 = vmatprep.subr.bf16.mxu0 %v3730_v62  ;;  %3432 = vmatmul.mubr.msk.bf16.gmra.mrb[112].mxu1 %vm631_vm1, %v3652_v40  ;;  %v3739_v51 = vld [vmem:[%s5073_s4 + $0x108] sm:$0xff]   ;;  %v3668_v54 = vld [vmem:[%s5077_s3 + $0x74] ss:$28 sps:$4 sm:$0xff]  }
 0x105   :  { %v2815_v63 = vpop.f32.mrb[8].mxu0  ;;  %v4630_v35 = vadd.f32 %v2860_v59, %v693_v49  ;;  %3435 = vmatprep.mubr.msk.bf16.mxu1 %vm3755_vm0, %v3754_v38  ;;  %3281 = vmatpush3.bf16.msra.mxu1 %v3731_v50  ;;  %v3740_v62 = vld [vmem:[%s5073_s4 + $0x150] sm:$0xff]  }
 0x106   :  { %v2816_v43 = vpop.f32.mrb[9].mxu0  ;;  %3282 = vmatprep.subr.bf16.mxu1 %v3733_v56 }
 0x107   :  { %v2817_v2 = vadd.f32 %v2816_v43, %v2815_v63  ;;  %v2818_v52 = vpop.f32.mrb[10].mxu0  ;;  %3237 = vmatpush3.bf16.msra.mxu0 %v3732_v53  ;;  %v2861_v3 = vpop.f32.mrb[8].mxu1  ;;  %v3741_v53 = vld [vmem:[%s5073_s4 + $0x188] sm:$0xff]  }
 0x108   :  { %v2819_v61 = vpop.f32.mrb[11].mxu0  ;;  %3314 = vmatprep.subr.bf16.mxu0 %v3734_v31  ;;  %v2862_v42 = vpop.f32.mrb[9].mxu1 }
 0x109   :  { %v698_v32 = vadd.f32 %v2817_v2, %v4542_v57  ;;  %v2820_v36 = vadd.f32 %v2819_v61, %v2818_v52  ;;  %v2863_v0 = vadd.f32 %v2862_v42, %v2861_v3  ;;  %v2864_v48 = vpop.f32.mrb[10].mxu1  ;;  %3283 = vmatpush3.bf16.msra.mxu1 %v3735_v1  ;;  %v3671_v52 = vld [vmem:[%s5077_s3 + $0x7c] ss:$28 sps:$4 sm:$0xff]  }
 0x10a   :  { %1889 = vmatmul.mubr.bf16.gmra.mrb[116].mxu0 %v2721_v44  ;;  %v2865_v6 = vpop.f32.mrb[11].mxu1  ;;  %3439 = vmatprep.subr.bf16.mxu1 %v3754_v38  ;;  %v3667_v44 = vld [vmem:[%s5077_s3 + $0x40] ss:$28 sps:$4 sm:$0xff]  }
 0x10b   :  { %v701_v5 = vadd.f32 %v2820_v36, %v4542_v57  ;;  %2224 = vmatprep.mubr.bf16.mxu0 %v3658_v58  ;;  %v4663_v7 = vadd.f32 %v2863_v0, %v698_v32  ;;  %v2866_v8 = vadd.f32 %v2865_v6, %v2864_v48  ;;  %v3742_v58 = vld [vmem:[%s5073_s4 + $0x110] sm:$0xff]   ;;  %v3743_v61 = vld [vmem:[%s5073_s4 + $0x158] sm:$0xff]   ;;  %v3674_v48 = vld [vmem:[%s5077_s3 + $0xac] ss:$28 sps:$4 sm:$0xff]  }
 0x10c   :  { %3436 = vmatmul.mubr.msk.bf16.gmra.mrb[116].mxu1 %vm631_vm1, %v3655_v45  ;;  %v3670_v36 = vld [vmem:[%s5077_s3 + $0x70] ss:$28 sps:$4 sm:$0xff]   ;;  %v3744_v0 = vld [vmem:[%s5073_s4 + $0x118] sm:$0xff]  }
 0x10d   :  { %v2821_v9 = vpop.f32.mrb[12].mxu0  ;;  %v4666_v10 = vadd.f32 %v2866_v8, %v701_v5  ;;  %2296 = vmatprep.mubr.bf16.mxu1 %v3661_v4  ;;  %v3745_v5 = vld [vmem:[%s5073_s4 + $0x160] sm:$0xff]  }
 0x10e   :  { %v2822_v11 = vpop.f32.mrb[13].mxu0 }
 0x10f   :  { %v2823_v13 = vadd.f32 %v2822_v11, %v2821_v9  ;;  %v2824_v15 = vpop.f32.mrb[14].mxu0  ;;  %v2867_v17 = vpop.f32.mrb[12].mxu1  ;;  %v3673_v11 = vld [vmem:[%s5077_s3 + $0x78] ss:$28 sps:$4 sm:$0xff]  }
 0x110   :  { %v2825_v18 = vpop.f32.mrb[15].mxu0  ;;  %v2868_v22 = vpop.f32.mrb[13].mxu1 }
 0x111   :  { %v706_v19 = vadd.f32 %v2823_v13, %v4542_v57  ;;  %v2826_v21 = vadd.f32 %v2825_v18, %v2824_v15  ;;  %v2869_v24 = vadd.f32 %v2868_v22, %v2867_v17  ;;  %v2870_v25 = vpop.f32.mrb[14].mxu1  ;;  %v3677_v13 = vld [vmem:[%s5077_s3 + $0xb4] ss:$28 sps:$4 sm:$0xff]   ;;  %v3747_v18 = vld [vmem:[%s5073_s4 + $0x168] sm:$0xff]  }
 0x112   :  { %2225 = vmatmul.mubr.bf16.vlgmr.msra.gmra.mrb[120].mxu0 %v3656_v12  ;;  %v2871_v28 = vpop.f32.mrb[15].mxu1 }
 0x113   :  { %v709_v27 = vadd.f32 %v2826_v21, %v4542_v57  ;;  %3315 = vmatpush3.bf16.msra.mxu0 %v3736_v29  ;;  %2232 = vmatprep.mubr.bf16.mxu0 %v3662_v16  ;;  %v4685_v30 = vadd.f32 %v2869_v24, %v706_v19  ;;  %v2872_v33 = vadd.f32 %v2871_v28, %v2870_v25  ;;  %v2009_v19 = vld [vmem:[%s5077_s3 + $0xe0] sm:$0xff]  ;;  %v2010_v28 = vld [vmem:[%s5077_s3 + $0xe8] sm:$0xff] }
 0x114   :  { %3316 = vmatprep.subr.bf16.mxu0 %v3737_v34  ;;  %2297 = vmatmul.mubr.bf16.vlgmr.msra.gmra.mrb[120].mxu1 %v3659_v23  ;;  %v3676_v23 = vld [vmem:[%s5077_s3 + $0xa8] ss:$28 sps:$4 sm:$0xff]   ;;  %v3749_v34 = vld [vmem:[%s5073_s4 + $0x170] sm:$0xff]  }
 0x115   :  { %v2827_v37 = vpop.f32.mrb[16].mxu0  ;;  %v4690_v39 = vadd.f32 %v2872_v33, %v709_v27  ;;  %3440 = vmatpush3.bf16.msra.mxu1 %v3738_v41  ;;  %2304 = vmatprep.mubr.bf16.mxu1 %v3665_v26  ;;  %v3748_v26 = vld [vmem:[%s5073_s4 + $0x128] sm:$0xff]   ;;  %v2758_v27 = vcombine.high %v2009_v19, %v2009_v19 }
 0x116   :  { %v2828_v40 = vpop.f32.mrb[17].mxu0  ;;  %3441 = vmatprep.subr.bf16.mxu1 %v3754_v38 }
 0x117   :  { %v2829_v47 = vadd.f32 %v2828_v40, %v2827_v37  ;;  %v2830_v49 = vpop.f32.mrb[18].mxu0  ;;  %3317 = vmatpush3.bf16.msra.mxu0 %v3739_v51  ;;  %v2873_v59 = vpop.f32.mrb[16].mxu1 }
 0x118   :  { %v2831_v60 = vpop.f32.mrb[19].mxu0  ;;  %3318 = vmatprep.subr.bf16.mxu0 %v3740_v62  ;;  %v2874_v43 = vpop.f32.mrb[17].mxu1  ;;  %v2760_v49 = vcombine.high %v2010_v28, %v2010_v28 }
 0x119   :  { %v714_v63 = vadd.f32 %v2829_v47, %v4542_v57  ;;  %v2875_v50 = vadd.f32 %v2874_v43, %v2873_v59  ;;  %v2876_v2 = vpop.f32.mrb[18].mxu1  ;;  %3442 = vmatpush3.bf16.msra.mxu1 %v3741_v53  ;;  %v3750_v60 = vld [vmem:[%s5073_s4 + $0x130] sm:$0xff]  }
 0x11a   :  { %2233 = vmatmul.mubr.bf16.gmra.mrb[124].mxu0 %v3664_v46  ;;  %v2877_v56 = vpop.f32.mrb[19].mxu1  ;;  %v3679_v46 = vld [vmem:[%s5077_s3 + $0xb0] ss:$28 sps:$4 sm:$0xff]   ;;  %v3752_v2 = vld [vmem:[%s5073_s4 + $0x138] sm:$0xff]  }
 0x11b   :  { %3319 = vmatpush3.bf16.msra.mxu0 %v3742_v58  ;;  %2240 = vmatprep.mubr.bf16.mxu0 %v3668_v54  ;;  %v4721_v3 = vadd.f32 %v2875_v50, %v714_v63 }
 0x11c   :  { %3320 = vmatprep.subr.bf16.mxu0 %v3743_v61  ;;  %2305 = vmatmul.mubr.bf16.gmra.mrb[124].mxu1 %v3667_v44  ;;  %v2757_v44 = vcombine.low %v2009_v19, %v2009_v19 }
 0x11d   :  { %v2895_v31 = vpop.f32.mrb[20].mxu0  ;;  %2312 = vmatprep.mubr.bf16.mxu1 %v3671_v52  ;;  %v3686_v52 = vld [vmem:[%s5077_s3 + $0x14] ss:$28 sps:$4 sm:$0xff]  }
 0x11e   :  { %v2896_v32 = vpop.f32.mrb[21].mxu0 }
 0x11f   :  { %v2897_v42 = vadd.f32 %v2896_v32, %v2895_v31  ;;  %v2898_v45 = vpop.f32.mrb[22].mxu0  ;;  %3321 = vmatpush3.bf16.msra.mxu0 %v3744_v0  ;;  %v897_v4 = vpop.f32.mrb[20].mxu1  ;;  %v2759_v32 = vcombine.low %v2010_v28, %v2010_v28 }
 0x120   :  { %v2899_v1 = vpop.f32.mrb[23].mxu0  ;;  %3322 = vmatprep.subr.bf16.mxu0 %v3745_v5  ;;  %v3373_v9 = vpop.f32.mrb[21].mxu1  ;;  %v3684_v5 = vld [vmem:[%s5077_s3 + $0x10] ss:$28 sps:$4 sm:$0xff]  }
 0x121   :  { %v2900_v6 = vadd.f32 %v2899_v1, %v2898_v45  ;;  %v826_v8 = vadd.f32 %v2897_v42, %v4575_v14  ;;  %v900_v12 = vpop.f32.mrb[22].mxu1  ;;  %v3746_v14 = vld [vmem:[%s5073_s4 + $0x120] sm:$0xff]  }
 0x122   :  { %2241 = vmatmul.mubr.bf16.gmra.mrb[128].mxu0 %v3670_v36  ;;  %v3374_v17 = vpop.f32.mrb[23].mxu1 }
 0x123   :  { %v4745_v15 = vadd.f32 %v897_v4, %v826_v8  ;;  %v829_v16 = vadd.f32 %v2900_v6, %v4589_v20  ;;  %3323 = vmatpush3.bf16.msra.mxu0 %v3746_v14  ;;  %2248 = vmatprep.mubr.bf16.mxu0 %v3674_v48 }
 0x124   :  { %3324 = vmatprep.subr.bf16.mxu0 %v3747_v18  ;;  %2313 = vmatmul.mubr.bf16.gmra.mrb[128].mxu1 %v3673_v11 }
 0x125   :  { %v4757_v21 = vadd.f32 %v900_v12, %v829_v16  ;;  %v2901_v20 = vpop.f32.mrb[24].mxu0  ;;  %2320 = vmatprep.mubr.bf16.mxu1 %v3677_v13  ;;  %v3687_v16 = vld [vmem:[%s5077_s3 + $0x18] ss:$28 sps:$4 sm:$0xff]  }
 0x126   :  { %v2902_v22 = vpop.f32.mrb[25].mxu0 }
 0x127   :  { %v2903_v24 = vadd.f32 %v2902_v22, %v2901_v20  ;;  %v2904_v25 = vpop.f32.mrb[26].mxu0  ;;  %3325 = vmatpush3.bf16.msra.mxu0 %v3748_v26  ;;  %v905_v33 = vpop.f32.mrb[24].mxu1 }
 0x128   :  { %v2905_v29 = vpop.f32.mrb[27].mxu0  ;;  %3326 = vmatprep.subr.bf16.mxu0 %v3749_v34  ;;  %v3377_v41 = vpop.f32.mrb[25].mxu1 }
 0x129   :  { %v2906_v37 = vadd.f32 %v2905_v29, %v2904_v25  ;;  %v834_v40 = vadd.f32 %v2903_v24, %v4621_v55  ;;  %v908_v47 = vpop.f32.mrb[26].mxu1  ;;  %v3751_v55 = vld [vmem:[%s5073_s4 + $0x178] sm:$0xff]  }
 0x12a   :  { %2249 = vmatmul.mubr.bf16.gmra.mrb[132].mxu0 %v3676_v23  ;;  %v3378_v59 = vpop.f32.mrb[27].mxu1 }
 0x12b   :  { %v4775_v51 = vadd.f32 %v905_v33, %v834_v40  ;;  %v837_v54 = vadd.f32 %v2906_v37, %v4630_v35  ;;  %2256 = vmatprep.mubr.bf16.mxu0 %v2758_v27  ;;  %3327 = vmatpush3.bf16.msra.mxu0 %v3750_v60  ;;  %v3691_v33 = vld [vmem:[%s5077_s3 + $0x50] ss:$28 sps:$4 sm:$0xff]  }
 0x12c   :  { %3328 = vmatprep.subr.bf16.mxu0 %v3751_v55  ;;  %2321 = vmatmul.mubr.bf16.gmra.mrb[132].mxu1 %v3679_v46 }
 0x12d   :  { %v4784_v62 = vadd.f32 %v908_v47, %v837_v54  ;;  %v2907_v63 = vpop.f32.mrb[28].mxu0  ;;  %2328 = vmatprep.mubr.bf16.mxu1 %v2760_v49  ;;  %v3694_v47 = vld [vmem:[%s5077_s3 + $0x80] ss:$28 sps:$4 sm:$0xff]  }
 0x12e   :  { %v2908_v43 = vpop.f32.mrb[29].mxu0  ;;  %v3696_v54 = vld [vmem:[%s5077_s3 + $0xbc] ss:$28 sps:$4 sm:$0xff]  }
 0x12f   :  { %v2909_v35 = vadd.f32 %v2908_v43, %v2907_v63  ;;  %v2910_v50 = vpop.f32.mrb[30].mxu0  ;;  %3329 = vmatpush3.bf16.msra.mxu0 %v3752_v2  ;;  %v913_v56 = vpop.f32.mrb[28].mxu1 }
 0x130   :  { %v2911_v53 = vpop.f32.mrb[31].mxu0  ;;  %v3381_v31 = vpop.f32.mrb[29].mxu1 }
 0x131   :  { %v2912_v58 = vadd.f32 %v2911_v53, %v2910_v50  ;;  %v842_v61 = vadd.f32 %v2909_v35, %v4663_v7  ;;  %v916_v36 = vpop.f32.mrb[30].mxu1 }
 0x132   :  { %2257 = vmatmul.mubr.bf16.gmra.mrb[136].mxu0 %v2757_v44  ;;  %v3382_v0 = vpop.f32.mrb[31].mxu1  ;;  %v3695_v44 = vld [vmem:[%s5077_s3 + $0x88] ss:$28 sps:$4 sm:$0xff]  }
 0x133   :  { %v4793_v42 = vadd.f32 %v913_v56, %v842_v61  ;;  %v845_v45 = vadd.f32 %v2912_v58, %v4666_v10  ;;  %2368 = vmatprep.mubr.bf16.mxu0 %v3686_v52  ;;  %v3688_v10 = vld [vmem:[%s5077_s3 + $0x4c] ss:$28 sps:$4 sm:$0xff]   ;;  %v2011_v58 = vld [vmem:[%s5077_s3 + $0xf0] sm:$0xff] }
 0x134   :  { %2329 = vmatmul.mubr.bf16.gmra.mrb[136].mxu1 %v2759_v32 }
 0x135   :  { %v4796_v48 = vadd.f32 %v916_v36, %v845_v45  ;;  %v2913_v1 = vpop.f32.mrb[32].mxu0  ;;  %3443 = vmatprep.mubr.msk.bf16.mxu1 %vm3755_vm0, %v3754_v38  ;;  %v3698_v36 = vld [vmem:[%s5077_s3 + $0xb8] ss:$28 sps:$4 sm:$0xff]  }
 0x136   :  { %v2914_v4 = vpop.f32.mrb[33].mxu0 }
 0x137   :  { %v2915_v7 = vadd.f32 %v2914_v4, %v2913_v1  ;;  %v2916_v6 = vpop.f32.mrb[34].mxu0  ;;  %v921_v9 = vpop.f32.mrb[32].mxu1  ;;  %v2762_v1 = vcombine.high %v2011_v58, %v2011_v58 }
 0x138   :  { %v2917_v8 = vpop.f32.mrb[35].mxu0  ;;  %v3385_v13 = vpop.f32.mrb[33].mxu1 }
 0x139   :  { %v2918_v11 = vadd.f32 %v2917_v8, %v2916_v6  ;;  %v850_v12 = vadd.f32 %v2915_v7, %v4685_v30  ;;  %v924_v17 = vpop.f32.mrb[34].mxu1  ;;  %v3690_v30 = vld [vmem:[%s5077_s3 + $0x48] ss:$28 sps:$4 sm:$0xff]   ;;  %v3699_v8 = vld [vmem:[%s5077_s3 + $0xc0] ss:$28 sps:$4 sm:$0xff]  }
 0x13a   :  { %2369 = vmatmul.mubr.bf16.vlgmr.msra.gmra.mrb[140].mxu0 %v3684_v5  ;;  %v3386_v19 = vpop.f32.mrb[35].mxu1 }
 0x13b   :  { %v4810_v14 = vadd.f32 %v921_v9, %v850_v12  ;;  %v853_v18 = vadd.f32 %v2918_v11, %v4690_v39  ;;  %2376 = vmatprep.mubr.bf16.mxu0 %v3688_v10  ;;  %v3692_v39 = vld [vmem:[%s5077_s3 + $0x84] ss:$28 sps:$4 sm:$0xff]  }
 0x13c   :  { %3444 = vmatmul.mubr.msk.bf16.vlgmr.msra.gmra.mrb[140].mxu1 %vm631_vm1, %v3687_v16 }
 0x13d   :  { %v4813_v20 = vadd.f32 %v924_v17, %v853_v18  ;;  %v2919_v22 = vpop.f32.mrb[36].mxu0  ;;  %3447 = vmatprep.mubr.msk.bf16.mxu1 %vm3755_vm0, %v3754_v38 }
 0x13e   :  { %v2920_v23 = vpop.f32.mrb[37].mxu0 }
 0x13f   :  { %v2921_v24 = vadd.f32 %v2920_v23, %v2919_v22  ;;  %v2922_v25 = vpop.f32.mrb[38].mxu0  ;;  %v929_v27 = vpop.f32.mrb[36].mxu1  ;;  %v2761_v23 = vcombine.low %v2011_v58, %v2011_v58 }
 0x140   :  { %v2923_v26 = vpop.f32.mrb[39].mxu0  ;;  %v3389_v29 = vpop.f32.mrb[37].mxu1 }
 0x141   :  { %v858_v28 = vadd.f32 %v2921_v24, %v4721_v3  ;;  %v932_v34 = vpop.f32.mrb[38].mxu1  ;;  %v3702_v29 = vld [vmem:[%s5077_s3 + $0xf8] ss:$0 sps:$4 sm:$0xff]  }
 0x142   :  { %2377 = vmatmul.mubr.bf16.gmra.mrb[144].mxu0 %v3690_v30  ;;  %v3390_v40 = vpop.f32.mrb[39].mxu1 }
 0x143   :  { %v4828_v37 = vadd.f32 %v929_v27, %v858_v28  ;;  %2384 = vmatprep.mubr.bf16.mxu0 %v3692_v39 }
 0x144   :  { %3448 = vmatmul.mubr.msk.bf16.gmra.mrb[144].mxu1 %vm631_vm1, %v3691_v33 }
 0x145   :  { %v2948_v41 = vpop.f32.mrb[40].mxu0  ;;  %3451 = vmatprep.mubr.msk.bf16.mxu1 %vm3755_vm0, %v3754_v38 }
 0x146   :  { %v2949_v46 = vpop.f32.mrb[41].mxu0 }
 0x147   :  { %v2950_v3 = vadd.f32 %v2949_v46, %v2948_v41  ;;  %v2951_v49 = vpop.f32.mrb[42].mxu0  ;;  %v2994_v59 = vpop.f32.mrb[40].mxu1 }
 0x148   :  { %v2952_v60 = vpop.f32.mrb[43].mxu0  ;;  %v2995_v43 = vpop.f32.mrb[41].mxu1 }
 0x149   :  { %v1194_v55 = vadd.f32 %v2950_v3, %v4542_v57  ;;  %v2953_v63 = vadd.f32 %v2952_v60, %v2951_v49  ;;  %v2996_v35 = vadd.f32 %v2995_v43, %v2994_v59  ;;  %v2997_v50 = vpop.f32.mrb[42].mxu1 }
 0x14a   :  { %2385 = vmatmul.mubr.bf16.gmra.mrb[148].mxu0 %v3694_v47  ;;  %v2998_v52 = vpop.f32.mrb[43].mxu1 }
 0x14b   :  { %v1197_v2 = vadd.f32 %v2953_v63, %v4542_v57  ;;  %2392 = vmatprep.mubr.bf16.mxu0 %v3696_v54  ;;  %v4844_v53 = vadd.f32 %v2996_v35, %v1194_v55  ;;  %v2999_v56 = vadd.f32 %v2998_v52, %v2997_v50 }
 0x14c   :  { %3452 = vmatmul.mubr.msk.bf16.gmra.mrb[148].mxu1 %vm631_vm1, %v3695_v44 }
 0x14d   :  { %v2954_v61 = vpop.f32.mrb[44].mxu0  ;;  %v4850_v31 = vadd.f32 %v2999_v56, %v1197_v2  ;;  %3455 = vmatprep.mubr.msk.bf16.mxu1 %vm3755_vm0, %v3754_v38 }
 0x14e   :  { %v2955_v32 = vpop.f32.mrb[45].mxu0 }
 0x14f   :  { %v2956_v45 = vadd.f32 %v2955_v32, %v2954_v61  ;;  %v2957_v0 = vpop.f32.mrb[46].mxu0  ;;  %v3000_v4 = vpop.f32.mrb[44].mxu1 }
 0x150   :  { %v2958_v5 = vpop.f32.mrb[47].mxu0  ;;  %v3001_v10 = vpop.f32.mrb[45].mxu1 }
 0x151   :  { %v1202_v7 = vadd.f32 %v2956_v45, %v4542_v57  ;;  %v2959_v6 = vadd.f32 %v2958_v5, %v2957_v0  ;;  %v3002_v9 = vadd.f32 %v3001_v10, %v3000_v4  ;;  %v3003_v11 = vpop.f32.mrb[46].mxu1 }
 0x152   :  { %2393 = vmatmul.mubr.bf16.gmra.mrb[152].mxu0 %v3698_v36  ;;  %v3004_v13 = vpop.f32.mrb[47].mxu1 }
 0x153   :  { %v1205_v12 = vadd.f32 %v2959_v6, %v4542_v57  ;;  %2400 = vmatprep.mubr.bf16.mxu0 %v2762_v1  ;;  %v4862_v16 = vadd.f32 %v3002_v9, %v1202_v7  ;;  %v3005_v17 = vadd.f32 %v3004_v13, %v3003_v11 }
 0x154   :  { %3456 = vmatmul.mubr.msk.bf16.gmra.mrb[152].mxu1 %vm631_vm1, %v3699_v8 }
 0x155   :  { %v2960_v18 = vpop.f32.mrb[48].mxu0  ;;  %v4865_v19 = vadd.f32 %v3005_v17, %v1205_v12  ;;  %3459 = vmatprep.mubr.msk.bf16.mxu1 %vm3755_vm0, %v3754_v38 }
 0x156   :  { %v2961_v22 = vpop.f32.mrb[49].mxu0 }
 0x157   :  { %v2962_v30 = vadd.f32 %v2961_v22, %v2960_v18  ;;  %v2963_v24 = vpop.f32.mrb[50].mxu0  ;;  %v3006_v25 = vpop.f32.mrb[48].mxu1 }
 0x158   :  { %v2964_v39 = vpop.f32.mrb[51].mxu0  ;;  %v3007_v28 = vpop.f32.mrb[49].mxu1 }
 0x159   :  { %v1210_v26 = vadd.f32 %v2962_v30, %v4542_v57  ;;  %v2965_v27 = vadd.f32 %v2964_v39, %v2963_v24  ;;  %v3008_v33 = vadd.f32 %v3007_v28, %v3006_v25  ;;  %v3009_v34 = vpop.f32.mrb[50].mxu1  ;;  %v935_v28 = vmax.f32 %v4745_v15, 0.0 }
 0x15a   :  { %2401 = vmatmul.mubr.bf16.gmra.mrb[156].mxu0 %v2761_v23  ;;  %v3010_v41 = vpop.f32.mrb[51].mxu1 }
 0x15b   :  { %v1213_v40 = vadd.f32 %v2965_v27, %v4542_v57  ;;  %v4874_v46 = vadd.f32 %v3008_v33, %v1210_v26  ;;  %v3011_v38 = vadd.f32 %v3010_v41, %v3009_v34  ;;  %v936_v41 = vmax.f32 %v4757_v21, 0.0 }
 0x15c   :  { %3460 = vmatmul.mubr.msk.bf16.gmra.mrb[156].mxu1 %vm631_vm1, %v3702_v29  ;;  %v937_v21 = vmax.f32 %v4775_v51, 0.0 }
 0x15d   :  { %v2966_v47 = vpop.f32.mrb[52].mxu0  ;;  %v4877_v3 = vadd.f32 %v3011_v38, %v1213_v40 }
 0x15e   :  { %v2967_v49 = vpop.f32.mrb[53].mxu0 }
 0x15f   :  { %v2968_v54 = vadd.f32 %v2967_v49, %v2966_v47  ;;  %v2969_v59 = vpop.f32.mrb[54].mxu0  ;;  %v3012_v60 = vpop.f32.mrb[52].mxu1 }
 0x160   :  { %v2970_v55 = vpop.f32.mrb[55].mxu0  ;;  %v3013_v44 = vpop.f32.mrb[53].mxu1 }
 0x161   :  { %v1218_v63 = vadd.f32 %v2968_v54, %v4542_v57  ;;  %v2971_v43 = vadd.f32 %v2970_v55, %v2969_v59  ;;  %v3014_v35 = vadd.f32 %v3013_v44, %v3012_v60  ;;  %v3015_v50 = vpop.f32.mrb[54].mxu1 }
 0x162   :  { %v3016_v52 = vpop.f32.mrb[55].mxu1 }
 0x163   :  { %v1221_v2 = vadd.f32 %v2971_v43, %v4542_v57  ;;  %v4881_v56 = vadd.f32 %v3014_v35, %v1218_v63  ;;  %v3017_v58 = vadd.f32 %v3016_v52, %v3015_v50 }
 0x165   :  { %v2972_v61 = vpop.f32.mrb[56].mxu0  ;;  %v4883_v32 = vadd.f32 %v3017_v58, %v1221_v2 }
 0x166   :  { %v2973_v36 = vpop.f32.mrb[57].mxu0 }
 0x167   :  { %v2974_v45 = vadd.f32 %v2973_v36, %v2972_v61  ;;  %v2975_v0 = vpop.f32.mrb[58].mxu0  ;;  %v3018_v1 = vpop.f32.mrb[56].mxu1  ;;  %v938_v61 = vmax.f32 %v4784_v62, 0.0  ;;  %v939_v62 = vmax.f32 %v4793_v42, 0.0 }
 0x168   :  { %v2976_v4 = vpop.f32.mrb[59].mxu0  ;;  %v3019_v7 = vpop.f32.mrb[57].mxu1 }
 0x169   :  { %v1226_v5 = vadd.f32 %v2974_v45, %v4542_v57  ;;  %v3020_v6 = vadd.f32 %v3019_v7, %v3018_v1  ;;  %v3021_v10 = vpop.f32.mrb[58].mxu1 }
 0x16a   :  { %v3022_v8 = vpop.f32.mrb[59].mxu1 }
 0x16b   :  { %v4886_v9 = vadd.f32 %v3020_v6, %v1226_v5 }
 0x16d   :  { %v3040_v11 = vpop.f32.mrb[60].mxu0 }
 0x16e   :  { %v3041_v12 = vpop.f32.mrb[61].mxu0 }
 0x16f   :  { %v3042_v13 = vadd.f32 %v3041_v12, %v3040_v11  ;;  %v3043_v17 = vpop.f32.mrb[62].mxu0  ;;  %v1409_v22 = vpop.f32.mrb[60].mxu1 }
 0x170   :  { %v3044_v18 = vpop.f32.mrb[63].mxu0  ;;  %v3397_v24 = vpop.f32.mrb[61].mxu1 }
 0x171   :  { %v3045_v23 = vadd.f32 %v3044_v18, %v3043_v17  ;;  %v1338_v30 = vadd.f32 %v3042_v13, %v4844_v53  ;;  %v1412_v25 = vpop.f32.mrb[62].mxu1 }
 0x172   :  { %v3398_v27 = vpop.f32.mrb[63].mxu1 }
 0x173   :  { %v1410_v39 = vadd.f32 %v1409_v22, %v1338_v30  ;;  %v1341_v26 = vadd.f32 %v3045_v23, %v4850_v31  ;;  %v940_v22 = vmax.f32 %v4796_v48, 0.0  ;;  %v941_v48 = vmax.f32 %v4810_v14, 0.0 }
 0x175   :  { %v1447_v29 = vmax.f32 %v1410_v39, 0.0  ;;  %v1413_v33 = vadd.f32 %v1412_v25, %v1341_v26  ;;  %v3046_v34 = vpop.f32.mrb[64].mxu0 }
 0x176   :  { %v3047_v40 = vpop.f32.mrb[65].mxu0 }
 0x177   :  { %v4892_v38 = vmax.f32 %v935_v28, %v1447_v29  ;;  %v1448_v47 = vmax.f32 %v1413_v33, 0.0  ;;  %v3048_v49 = vadd.f32 %v3047_v40, %v3046_v34  ;;  %v3049_v54 = vpop.f32.mrb[66].mxu0  ;;  %v1417_v59 = vpop.f32.mrb[64].mxu1 }
 0x178   :  { %v3050_v53 = vpop.f32.mrb[67].mxu0  ;;  %v3401_v63 = vpop.f32.mrb[65].mxu1 }
 0x179   :  { %v4894_v60 = vmax.f32 %v936_v41, %v1448_v47  ;;  %v3051_v55 = vadd.f32 %v3050_v53, %v3049_v54  ;;  %v1346_v31 = vadd.f32 %v3048_v49, %v4862_v16  ;;  %v1420_v15 = vpop.f32.mrb[66].mxu1  ;;  %v942_v54 = vmax.f32 %v4813_v20, 0.0 }
 0x17a   :  { %v3402_v35 = vpop.f32.mrb[67].mxu1 }
 0x17b   :  { %v1418_v43 = vadd.f32 %v1417_v59, %v1346_v31  ;;  %v1349_v44 = vadd.f32 %v3051_v55, %v4865_v19 }
 0x17d   :  { %v1449_v50 = vmax.f32 %v1418_v43, 0.0  ;;  %v1421_v2 = vadd.f32 %v1420_v15, %v1349_v44  ;;  %v3052_v52 = vpop.f32.mrb[68].mxu0 }
 0x17e   :  { %v3053_v58 = vpop.f32.mrb[69].mxu0 }
 0x17f   :  { %v4900_v36 = vmax.f32 %v937_v21, %v1449_v50  ;;  %v1450_v45 = vmax.f32 %v1421_v2, 0.0  ;;  %v3054_v0 = vadd.f32 %v3053_v58, %v3052_v52  ;;  %v3055_v1 = vpop.f32.mrb[70].mxu0  ;;  %v1425_v4 = vpop.f32.mrb[68].mxu1  ;;  %v943_v21 = vmax.f32 %v4828_v37, 0.0 }
 0x180   :  { %v3056_v16 = vpop.f32.mrb[71].mxu0  ;;  %v3405_v6 = vpop.f32.mrb[69].mxu1 }
 0x181   :  { %v4902_v5 = vmax.f32 %v938_v61, %v1450_v45  ;;  %v3057_v7 = vadd.f32 %v3056_v16, %v3055_v1  ;;  %v1354_v19 = vadd.f32 %v3054_v0, %v4874_v46  ;;  %v1428_v51 = vpop.f32.mrb[70].mxu1 }
 0x182   :  { %v3406_v11 = vpop.f32.mrb[71].mxu1 }
 0x183   :  { %v1426_v10 = vadd.f32 %v1425_v4, %v1354_v19  ;;  %v1357_v8 = vadd.f32 %v3057_v7, %v4877_v3 }
 0x185   :  { %v1451_v12 = vmax.f32 %v1426_v10, 0.0  ;;  %v1429_v13 = vadd.f32 %v1428_v51, %v1357_v8  ;;  %v3058_v17 = vpop.f32.mrb[72].mxu0 }
 0x186   :  { %v3059_v18 = vpop.f32.mrb[73].mxu0 }
 0x187   :  { %v4908_v23 = vmax.f32 %v939_v62, %v1451_v12  ;;  %v1452_v30 = vmax.f32 %v1429_v13, 0.0  ;;  %v3060_v24 = vadd.f32 %v3059_v18, %v3058_v17  ;;  %v3061_v25 = vpop.f32.mrb[74].mxu0  ;;  %v1433_v39 = vpop.f32.mrb[72].mxu1 }
 0x188   :  { %v3062_v46 = vpop.f32.mrb[75].mxu0  ;;  %v3409_v28 = vpop.f32.mrb[73].mxu1 }
 0x189   :  { %v4910_v26 = vmax.f32 %v940_v22, %v1452_v30  ;;  %v3063_v27 = vadd.f32 %v3062_v46, %v3061_v25  ;;  %v1362_v3 = vadd.f32 %v3060_v24, %v4881_v56  ;;  %v1436_v42 = vpop.f32.mrb[74].mxu1 }
 0x18a   :  { %v3410_v34 = vpop.f32.mrb[75].mxu1 }
 0x18b   :  { %v1434_v29 = vadd.f32 %v1433_v39, %v1362_v3  ;;  %v1365_v33 = vadd.f32 %v3063_v27, %v4883_v32 }
 0x18d   :  { %v1453_v40 = vmax.f32 %v1434_v29, 0.0  ;;  %v1437_v41 = vadd.f32 %v1436_v42, %v1365_v33  ;;  %v3064_v47 = vpop.f32.mrb[76].mxu0 }
 0x18e   :  { %v3065_v49 = vpop.f32.mrb[77].mxu0 }
 0x18f   :  { %v4916_v53 = vmax.f32 %v941_v48, %v1453_v40  ;;  %v1454_v59 = vmax.f32 %v1437_v41, 0.0  ;;  %v3066_v55 = vadd.f32 %v3065_v49, %v3064_v47  ;;  %v3067_v31 = vpop.f32.mrb[78].mxu0  ;;  %v1441_v63 = vpop.f32.mrb[76].mxu1 }
 0x190   :  { %v3068_v56 = vpop.f32.mrb[79].mxu0  ;;  %v3413_v43 = vpop.f32.mrb[77].mxu1 }
 0x191   :  { %v4918_v15 = vmax.f32 %v942_v54, %v1454_v59  ;;  %v1370_v32 = vadd.f32 %v3066_v55, %v4886_v9  ;;  %v1444_v44 = vpop.f32.mrb[78].mxu1 }
 0x192   :  { %v3414_v35 = vpop.f32.mrb[79].mxu1 }
 0x193   :  { %v1442_v14 = vadd.f32 %v1441_v63, %v1370_v32 }
 0x195   :  { %v1455_v50 = vmax.f32 %v1442_v14, 0.0  ;;  %v3093_v2 = vpop.f32.mrb[80].mxu0 }
 0x196   :  { %v3094_v20 = vpop.f32.mrb[81].mxu0 }
 0x197   :  { %v4922_v52 = vmax.f32 %v943_v21, %v1455_v50  ;;  %v3095_v58 = vadd.f32 %v3094_v20, %v3093_v2  ;;  %v3096_v61 = vpop.f32.mrb[82].mxu0  ;;  %v3139_v45 = vpop.f32.mrb[80].mxu1 }
 0x198   :  { %v3097_v0 = vpop.f32.mrb[83].mxu0  ;;  %v3140_v4 = vpop.f32.mrb[81].mxu1 }
 0x199   :  { %v1715_v1 = vadd.f32 %v3095_v58, %v4542_v57  ;;  %v3098_v16 = vadd.f32 %v3097_v0, %v3096_v61  ;;  %v3141_v9 = vadd.f32 %v3140_v4, %v3139_v45  ;;  %v3142_v7 = vpop.f32.mrb[82].mxu1 }
 0x19a   :  { %v3143_v6 = vpop.f32.mrb[83].mxu1 }
 0x19b   :  { %v1718_v19 = vadd.f32 %v3098_v16, %v4542_v57  ;;  %v4926_v51 = vadd.f32 %v3141_v9, %v1715_v1  ;;  %v3144_v37 = vadd.f32 %v3143_v6, %v3142_v7 }
 0x19d   :  { %v3099_v10 = vpop.f32.mrb[84].mxu0  ;;  %v4928_v8 = vadd.f32 %v3144_v37, %v1718_v19 }
 0x19e   :  { %v3100_v11 = vpop.f32.mrb[85].mxu0 }
 0x19f   :  { %v3101_v62 = vadd.f32 %v3100_v11, %v3099_v10  ;;  %v3102_v12 = vpop.f32.mrb[86].mxu0  ;;  %v3145_v13 = vpop.f32.mrb[84].mxu1 }
 0x1a0   :  { %v3103_v17 = vpop.f32.mrb[87].mxu0  ;;  %v3146_v30 = vpop.f32.mrb[85].mxu1 }
 0x1a1   :  { %v1723_v18 = vadd.f32 %v3101_v62, %v4542_v57  ;;  %v3104_v22 = vadd.f32 %v3103_v17, %v3102_v12  ;;  %v3147_v24 = vadd.f32 %v3146_v30, %v3145_v13  ;;  %v3148_v25 = vpop.f32.mrb[86].mxu1  ;;  %v4951_v62 = vld [vmem:[%s5078_s5] ss:$0 sm:$0xff] }
 0x1a2   :  { %v3149_v39 = vpop.f32.mrb[87].mxu1 }
 0x1a3   :  { %v1726_v46 = vadd.f32 %v3104_v22, %v4542_v57  ;;  %v4932_v27 = vadd.f32 %v3147_v24, %v1723_v18  ;;  %v3150_v3 = vadd.f32 %v3149_v39, %v3148_v25 }
 0x1a5   :  { %v3105_v28 = vpop.f32.mrb[88].mxu0  ;;  %v4934_v42 = vadd.f32 %v3150_v3, %v1726_v46 }
 0x1a6   :  { %v3106_v29 = vpop.f32.mrb[89].mxu0 }
 0x1a7   :  { %v3107_v33 = vadd.f32 %v3106_v29, %v3105_v28  ;;  %v3108_v34 = vpop.f32.mrb[90].mxu0  ;;  %v3151_v48 = vpop.f32.mrb[88].mxu1 }
 0x1a8   :  { %v3109_v40 = vpop.f32.mrb[91].mxu0  ;;  %v3152_v49 = vpop.f32.mrb[89].mxu1 }
 0x1a9   :  { %v1731_v41 = vadd.f32 %v3107_v33, %v4542_v57  ;;  %v3110_v47 = vadd.f32 %v3109_v40, %v3108_v34  ;;  %v3153_v54 = vadd.f32 %v3152_v49, %v3151_v48  ;;  %v3154_v59 = vpop.f32.mrb[90].mxu1 }
 0x1aa   :  { %v3155_v31 = vpop.f32.mrb[91].mxu1 }
 0x1ab   :  { %v1734_v55 = vadd.f32 %v3110_v47, %v4542_v57  ;;  %v4938_v56 = vadd.f32 %v3153_v54, %v1731_v41  ;;  %v3156_v63 = vadd.f32 %v3155_v31, %v3154_v59 }
 0x1ad   :  { %v3111_v32 = vpop.f32.mrb[92].mxu0  ;;  %v4940_v43 = vadd.f32 %v3156_v63, %v1734_v55 }
 0x1ae   :  { %v3112_v44 = vpop.f32.mrb[93].mxu0 }
 0x1af   :  { %v3113_v14 = vadd.f32 %v3112_v44, %v3111_v32  ;;  %v3114_v35 = vpop.f32.mrb[94].mxu0  ;;  %v3157_v21 = vpop.f32.mrb[92].mxu1 }
 0x1b0   :  { %v3115_v50 = vpop.f32.mrb[95].mxu0  ;;  %v3158_v58 = vpop.f32.mrb[93].mxu1 }
 0x1b1   :  { %v1739_v2 = vadd.f32 %v3113_v14, %v4542_v57  ;;  %v3116_v20 = vadd.f32 %v3115_v50, %v3114_v35  ;;  %v3159_v61 = vadd.f32 %v3158_v58, %v3157_v21  ;;  %v3160_v45 = vpop.f32.mrb[94].mxu1 }
 0x1b2   :  { %v3161_v1 = vpop.f32.mrb[95].mxu1 }
 0x1b3   :  { %v1742_v0 = vadd.f32 %v3116_v20, %v4542_v57  ;;  %v4944_v16 = vadd.f32 %v3159_v61, %v1739_v2  ;;  %v3162_v4 = vadd.f32 %v3161_v1, %v3160_v45 }
 0x1b5   :  { %v3117_v9 = vpop.f32.mrb[96].mxu0  ;;  %v4946_v7 = vadd.f32 %v3162_v4, %v1742_v0 }
 0x1b6   :  { %v3118_v19 = vpop.f32.mrb[97].mxu0 }
 0x1b7   :  { %v3119_v6 = vadd.f32 %v3118_v19, %v3117_v9  ;;  %v3120_v37 = vpop.f32.mrb[98].mxu0  ;;  %v3163_v10 = vpop.f32.mrb[96].mxu1 }
 0x1b8   :  { %v3121_v11 = vpop.f32.mrb[99].mxu0  ;;  %v3164_v57 = vpop.f32.mrb[97].mxu1 }
 0x1b9   :  { %v1747_v12 = vadd.f32 %v4951_v62, %v3119_v6  ;;  %v3165_v13 = vadd.f32 %v3164_v57, %v3163_v10  ;;  %v3166_v17 = vpop.f32.mrb[98].mxu1 }
 0x1ba   :  { %v3167_v18 = vpop.f32.mrb[99].mxu1 }
 0x1bb   :  { %v4954_v22 = vadd.f32 %v3165_v13, %v1747_v12 }
 0x1bd   :  { %v3185_v30 = vpop.f32.mrb[100].mxu0 }
 0x1be   :  { %v3186_v24 = vpop.f32.mrb[101].mxu0 }
 0x1bf   :  { %v3187_v25 = vadd.f32 %v3186_v24, %v3185_v30  ;;  %v3188_v46 = vpop.f32.mrb[102].mxu0  ;;  %v1930_v3 = vpop.f32.mrb[100].mxu1 }
 0x1c0   :  { %v3189_v39 = vpop.f32.mrb[103].mxu0  ;;  %v3421_v33 = vpop.f32.mrb[101].mxu1 }
 0x1c1   :  { %v3190_v28 = vadd.f32 %v3189_v39, %v3188_v46  ;;  %v1859_v29 = vadd.f32 %v3187_v25, %v4926_v51  ;;  %v1933_v34 = vpop.f32.mrb[102].mxu1 }
 0x1c2   :  { %v3422_v41 = vpop.f32.mrb[103].mxu1 }
 0x1c3   :  { %v4957_v48 = vadd.f32 %v1930_v3, %v1859_v29  ;;  %v1862_v40 = vadd.f32 %v3190_v28, %v4928_v8 }
 0x1c5   :  { %v4960_v47 = vadd.f32 %v1933_v34, %v1862_v40  ;;  %v3191_v49 = vpop.f32.mrb[104].mxu0 }
 0x1c6   :  { %v3192_v54 = vpop.f32.mrb[105].mxu0 }
 0x1c7   :  { %v3193_v59 = vadd.f32 %v3192_v54, %v3191_v49  ;;  %v3194_v55 = vpop.f32.mrb[106].mxu0  ;;  %v1938_v63 = vpop.f32.mrb[104].mxu1 }
 0x1c8   :  { %v3195_v31 = vpop.f32.mrb[107].mxu0  ;;  %v3425_v14 = vpop.f32.mrb[105].mxu1 }
 0x1c9   :  { %v3196_v32 = vadd.f32 %v3195_v31, %v3194_v55  ;;  %v1867_v44 = vadd.f32 %v3193_v59, %v4932_v27  ;;  %v1941_v51 = vpop.f32.mrb[106].mxu1 }
 0x1ca   :  { %v3426_v50 = vpop.f32.mrb[107].mxu1 }
 0x1cb   :  { %v4963_v35 = vadd.f32 %v1938_v63, %v1867_v44  ;;  %v1870_v21 = vadd.f32 %v3196_v32, %v4934_v42 }
 0x1cd   :  { %v4966_v8 = vadd.f32 %v1941_v51, %v1870_v21  ;;  %v3197_v2 = vpop.f32.mrb[108].mxu0 }
 0x1ce   :  { %v3198_v20 = vpop.f32.mrb[109].mxu0 }
 0x1cf   :  { %v3199_v58 = vadd.f32 %v3198_v20, %v3197_v2  ;;  %v3200_v61 = vpop.f32.mrb[110].mxu0  ;;  %v1946_v0 = vpop.f32.mrb[108].mxu1 }
 0x1d0   :  { %v3201_v45 = vpop.f32.mrb[111].mxu0  ;;  %v3429_v9 = vpop.f32.mrb[109].mxu1 }
 0x1d1   :  { %v3202_v1 = vadd.f32 %v3201_v45, %v3200_v61  ;;  %v1875_v4 = vadd.f32 %v3199_v58, %v4938_v56  ;;  %v1949_v27 = vpop.f32.mrb[110].mxu1 }
 0x1d2   :  { %v3430_v37 = vpop.f32.mrb[111].mxu1 }
 0x1d3   :  { %v4969_v19 = vadd.f32 %v1946_v0, %v1875_v4  ;;  %v1878_v6 = vadd.f32 %v3202_v1, %v4940_v43 }
 0x1d5   :  { %v4972_v42 = vadd.f32 %v1949_v27, %v1878_v6  ;;  %v3203_v10 = vpop.f32.mrb[112].mxu0 }
 0x1d6   :  { %v3204_v11 = vpop.f32.mrb[113].mxu0 }
 0x1d7   :  { %v3205_v12 = vadd.f32 %v3204_v11, %v3203_v10  ;;  %v3206_v57 = vpop.f32.mrb[114].mxu0  ;;  %v1954_v17 = vpop.f32.mrb[112].mxu1 }
 0x1d8   :  { %v3207_v13 = vpop.f32.mrb[115].mxu0  ;;  %v3433_v24 = vpop.f32.mrb[113].mxu1 }
 0x1d9   :  { %v3208_v18 = vadd.f32 %v3207_v13, %v3206_v57  ;;  %v1883_v30 = vadd.f32 %v3205_v12, %v4944_v16  ;;  %v1957_v56 = vpop.f32.mrb[114].mxu1 }
 0x1da   :  { %v3434_v39 = vpop.f32.mrb[115].mxu1 }
 0x1db   :  { %v4975_v25 = vadd.f32 %v1954_v17, %v1883_v30  ;;  %v1886_v46 = vadd.f32 %v3208_v18, %v4946_v7 }
 0x1dd   :  { %v4978_v43 = vadd.f32 %v1957_v56, %v1886_v46  ;;  %v3209_v3 = vpop.f32.mrb[116].mxu0 }
 0x1de   :  { %v3210_v28 = vpop.f32.mrb[117].mxu0 }
 0x1df   :  { %v3211_v29 = vadd.f32 %v3210_v28, %v3209_v3  ;;  %v3212_v33 = vpop.f32.mrb[118].mxu0  ;;  %v1962_v40 = vpop.f32.mrb[116].mxu1 }
 0x1e0   :  { %v3213_v34 = vpop.f32.mrb[119].mxu0  ;;  %v3437_v49 = vpop.f32.mrb[117].mxu1 }
 0x1e1   :  { %v1891_v41 = vadd.f32 %v3211_v29, %v4954_v22  ;;  %v1965_v54 = vpop.f32.mrb[118].mxu1 }
 0x1e2   :  { %v3438_v59 = vpop.f32.mrb[119].mxu1 }
 0x1e3   :  { %v4981_v16 = vadd.f32 %v1962_v40, %v1891_v41 }
 0x1e5   :  { %v3238_v55 = vpop.f32.mrb[120].mxu0 }
 0x1e6   :  { %v3239_v31 = vpop.f32.mrb[121].mxu0 }
 0x1e7   :  { %v3240_v63 = vadd.f32 %v3239_v31, %v3238_v55  ;;  %v3241_v7 = vpop.f32.mrb[122].mxu0  ;;  %v3284_v32 = vpop.f32.mrb[120].mxu1 }
 0x1e8   :  { %v3242_v44 = vpop.f32.mrb[123].mxu0  ;;  %v3285_v21 = vpop.f32.mrb[121].mxu1 }
 0x1e9   :  { %v2227_v14 = vadd.f32 %v4951_v62, %v3240_v63  ;;  %v3243_v51 = vadd.f32 %v3242_v44, %v3241_v7  ;;  %v3286_v50 = vadd.f32 %v3285_v21, %v3284_v32  ;;  %v3287_v2 = vpop.f32.mrb[122].mxu1 }
 0x1ea   :  { %v3288_v22 = vpop.f32.mrb[123].mxu1 }
 0x1eb   :  { %v2230_v20 = vadd.f32 %v4951_v62, %v3243_v51  ;;  %v4985_v58 = vadd.f32 %v3286_v50, %v2227_v14  ;;  %v3289_v61 = vadd.f32 %v3288_v22, %v3287_v2 }
 0x1ed   :  { %v3244_v45 = vpop.f32.mrb[124].mxu0  ;;  %v4987_v0 = vadd.f32 %v3289_v61, %v2230_v20 }
 0x1ee   :  { %v3245_v1 = vpop.f32.mrb[125].mxu0 }
 0x1ef   :  { %v3246_v4 = vadd.f32 %v3245_v1, %v3244_v45  ;;  %v3247_v9 = vpop.f32.mrb[126].mxu0  ;;  %v3290_v27 = vpop.f32.mrb[124].mxu1 }
 0x1f0   :  { %v3248_v6 = vpop.f32.mrb[127].mxu0  ;;  %v3291_v11 = vpop.f32.mrb[125].mxu1 }
 0x1f1   :  { %v2235_v37 = vadd.f32 %v4951_v62, %v3246_v4  ;;  %v3249_v10 = vadd.f32 %v3248_v6, %v3247_v9  ;;  %v3292_v12 = vadd.f32 %v3291_v11, %v3290_v27  ;;  %v3293_v57 = vpop.f32.mrb[126].mxu1 }
 0x1f2   :  { %v3294_v17 = vpop.f32.mrb[127].mxu1 }
 0x1f3   :  { %v2238_v13 = vadd.f32 %v4951_v62, %v3249_v10  ;;  %v4991_v18 = vadd.f32 %v3292_v12, %v2235_v37  ;;  %v3295_v30 = vadd.f32 %v3294_v17, %v3293_v57 }
 0x1f5   :  { %v3250_v24 = vpop.f32.mrb[128].mxu0  ;;  %v4993_v56 = vadd.f32 %v3295_v30, %v2238_v13 }
 0x1f6   :  { %v3251_v46 = vpop.f32.mrb[129].mxu0 }
 0x1f7   :  { %v3252_v39 = vadd.f32 %v3251_v46, %v3250_v24  ;;  %v3253_v3 = vpop.f32.mrb[130].mxu0  ;;  %v3296_v28 = vpop.f32.mrb[128].mxu1 }
 0x1f8   :  { %v3254_v29 = vpop.f32.mrb[131].mxu0  ;;  %v3297_v40 = vpop.f32.mrb[129].mxu1 }
 0x1f9   :  { %v2243_v33 = vadd.f32 %v4951_v62, %v3252_v39  ;;  %v3255_v34 = vadd.f32 %v3254_v29, %v3253_v3  ;;  %v3298_v41 = vadd.f32 %v3297_v40, %v3296_v28  ;;  %v3299_v49 = vpop.f32.mrb[130].mxu1 }
 0x1fa   :  { %v3300_v59 = vpop.f32.mrb[131].mxu1 }
 0x1fb   :  { %v2246_v54 = vadd.f32 %v4951_v62, %v3255_v34  ;;  %v4997_v55 = vadd.f32 %v3298_v41, %v2243_v33  ;;  %v3301_v31 = vadd.f32 %v3300_v59, %v3299_v49 }
 0x1fd   :  { %v3256_v63 = vpop.f32.mrb[132].mxu0  ;;  %v4999_v7 = vadd.f32 %v3301_v31, %v2246_v54 }
 0x1fe   :  { %v3257_v32 = vpop.f32.mrb[133].mxu0 }
 0x1ff   :  { %v3258_v44 = vadd.f32 %v3257_v32, %v3256_v63  ;;  %v3259_v14 = vpop.f32.mrb[134].mxu0  ;;  %v3302_v51 = vpop.f32.mrb[132].mxu1  ;;  %v1968_v32 = vmax.f32 %v4957_v48, 0.0 }
 0x200   :  { %v3260_v21 = vpop.f32.mrb[135].mxu0  ;;  %v3303_v20 = vpop.f32.mrb[133].mxu1 }
 0x201   :  { %v2251_v50 = vadd.f32 %v4951_v62, %v3258_v44  ;;  %v3261_v2 = vadd.f32 %v3260_v21, %v3259_v14  ;;  %v3304_v22 = vadd.f32 %v3303_v20, %v3302_v51  ;;  %v3305_v61 = vpop.f32.mrb[134].mxu1 }
 0x202   :  { %v3306_v1 = vpop.f32.mrb[135].mxu1 }
 0x203   :  { %v2254_v45 = vadd.f32 %v4951_v62, %v3261_v2  ;;  %v5003_v4 = vadd.f32 %v3304_v22, %v2251_v50  ;;  %v3307_v9 = vadd.f32 %v3306_v1, %v3305_v61  ;;  %v1969_v50 = vmax.f32 %v4960_v47, 0.0 }
 0x205   :  { %v3262_v27 = vpop.f32.mrb[136].mxu0  ;;  %v5005_v6 = vadd.f32 %v3307_v9, %v2254_v45 }
 0x206   :  { %v3263_v37 = vpop.f32.mrb[137].mxu0 }
 0x207   :  { %v3264_v10 = vadd.f32 %v3263_v37, %v3262_v27  ;;  %v3265_v11 = vpop.f32.mrb[138].mxu0  ;;  %v3308_v12 = vpop.f32.mrb[136].mxu1 }
 0x208   :  { %v3266_v57 = vpop.f32.mrb[139].mxu0  ;;  %v3309_v17 = vpop.f32.mrb[137].mxu1 }
 0x209   :  { %v2259_v13 = vadd.f32 %v4951_v62, %v3264_v10  ;;  %v3310_v30 = vadd.f32 %v3309_v17, %v3308_v12  ;;  %v3311_v24 = vpop.f32.mrb[138].mxu1 }
 0x20a   :  { %v3312_v46 = vpop.f32.mrb[139].mxu1 }
 0x20b   :  { %v5008_v39 = vadd.f32 %v3310_v30, %v2259_v13  ;;  %v1970_v13 = vmax.f32 %v4963_v35, 0.0  ;;  %v1971_v46 = vmax.f32 %v4966_v8, 0.0 }
 0x20d   :  { %v3330_v3 = vpop.f32.mrb[140].mxu0 }
 0x20e   :  { %v3331_v28 = vpop.f32.mrb[141].mxu0 }
 0x20f   :  { %v3332_v29 = vadd.f32 %v3331_v28, %v3330_v3  ;;  %v3333_v33 = vpop.f32.mrb[142].mxu0  ;;  %v2442_v40 = vpop.f32.mrb[140].mxu1 }
 0x210   :  { %v3334_v34 = vpop.f32.mrb[143].mxu0  ;;  %v3445_v54 = vpop.f32.mrb[141].mxu1 }
 0x211   :  { %v3335_v41 = vadd.f32 %v3334_v34, %v3333_v33  ;;  %v2371_v49 = vadd.f32 %v3332_v29, %v4985_v58  ;;  %v2445_v59 = vpop.f32.mrb[142].mxu1 }
 0x212   :  { %v3446_v63 = vpop.f32.mrb[143].mxu1 }
 0x213   :  { %v2443_v31 = vadd.f32 %v2442_v40, %v2371_v49  ;;  %v2374_v62 = vadd.f32 %v3335_v41, %v4987_v0 }
 0x215   :  { %v2480_v44 = vmax.f32 %v2443_v31, 0.0  ;;  %v2446_v14 = vadd.f32 %v2445_v59, %v2374_v62  ;;  %v3336_v51 = vpop.f32.mrb[144].mxu0 }
 0x216   :  { %v3337_v21 = vpop.f32.mrb[145].mxu0 }
 0x217   :  { %v2489_v2 = vmax.f32 %v1968_v32, %v2480_v44  ;;  %v2481_v20 = vmax.f32 %v2446_v14, 0.0  ;;  %v3338_v22 = vadd.f32 %v3337_v21, %v3336_v51  ;;  %v3339_v61 = vpop.f32.mrb[146].mxu0  ;;  %v2450_v58 = vpop.f32.mrb[144].mxu1  ;;  %v1972_v32 = vmax.f32 %v4969_v19, 0.0 }
 0x218   :  { %v3340_v45 = vpop.f32.mrb[147].mxu0  ;;  %v3449_v37 = vpop.f32.mrb[145].mxu1  ;;  %v1973_v21 = vmax.f32 %v4972_v42, 0.0 }
 0x219   :  { %v2498_v1 = vmax.f32 %v4892_v38, %v2489_v2  ;;  %v2490_v9 = vmax.f32 %v1969_v50, %v2481_v20  ;;  %v3341_v27 = vadd.f32 %v3340_v45, %v3339_v61  ;;  %v2379_v0 = vadd.f32 %v3338_v22, %v4991_v18  ;;  %v2453_v48 = vpop.f32.mrb[146].mxu1 }
 0x21a   :  { %v3450_v57 = vpop.f32.mrb[147].mxu1 }
 0x21b   :  { %v2778_v10 = vpack.c.bf16 %v2498_v1, %v2498_v1  ;;  %v2499_v11 = vmax.f32 %v4894_v60, %v2490_v9  ;;  %v2451_v12 = vadd.f32 %v2450_v58, %v2379_v0  ;;  %v2382_v47 = vadd.f32 %v3341_v27, %v4993_v56 }
 0x21c   :  { %v1975_v57 = vmax.f32 %v4978_v43, 0.0 }
 0x21d   :  { %2545 = vst.msk [vmem:[%s5079_s6] sm:$0xf] %vm2544_vm2, %v2778_v10  ;;  %v2779_v38 = vpack.c.bf16 %v2499_v11, %v2499_v11  ;;  %v2482_v17 = vmax.f32 %v2451_v12, 0.0  ;;  %v2454_v18 = vadd.f32 %v2453_v48, %v2382_v47  ;;  %v3342_v30 = vpop.f32.mrb[148].mxu0  ;;  %v1974_v10 = vmax.f32 %v4975_v25, 0.0 }
 0x21e   :  { %v3343_v24 = vpop.f32.mrb[149].mxu0 }
 0x21f   :  { %2546 = vst.msk [vmem:[%s5079_s6 + $0x4] sm:$0xf] %vm2544_vm2, %v2779_v38  ;;  %v2491_v60 = vmax.f32 %v1970_v13, %v2482_v17  ;;  %v2483_v56 = vmax.f32 %v2454_v18, 0.0  ;;  %v3344_v35 = vadd.f32 %v3343_v24, %v3342_v30  ;;  %v3345_v3 = vpop.f32.mrb[150].mxu0  ;;  %v2458_v29 = vpop.f32.mrb[148].mxu1 }
 0x220   :  { %v3346_v28 = vpop.f32.mrb[151].mxu0  ;;  %v3453_v49 = vpop.f32.mrb[149].mxu1 }
 0x221   :  { %v2500_v33 = vmax.f32 %v4900_v36, %v2491_v60  ;;  %v2492_v34 = vmax.f32 %v1971_v46, %v2483_v56  ;;  %v3347_v40 = vadd.f32 %v3346_v28, %v3345_v3  ;;  %v2387_v41 = vadd.f32 %v3344_v35, %v4997_v55  ;;  %v2461_v54 = vpop.f32.mrb[150].mxu1 }
 0x222   :  { %v3454_v63 = vpop.f32.mrb[151].mxu1  ;;  %v1976_v28 = vmax.f32 %v4981_v16, 0.0 }
 0x223   :  { %v2780_v8 = vpack.c.bf16 %v2500_v33, %v2500_v33  ;;  %v2501_v59 = vmax.f32 %v4902_v5, %v2492_v34  ;;  %v2459_v31 = vadd.f32 %v2458_v29, %v2387_v41  ;;  %v2390_v62 = vadd.f32 %v3347_v40, %v4999_v7 }
 0x225   :  { %2547 = vst.msk [vmem:[%s5079_s6 + $0x8] sm:$0xf] %vm2544_vm2, %v2780_v8  ;;  %v2781_v36 = vpack.c.bf16 %v2501_v59, %v2501_v59  ;;  %v2484_v44 = vmax.f32 %v2459_v31, 0.0  ;;  %v2462_v14 = vadd.f32 %v2461_v54, %v2390_v62  ;;  %v3348_v55 = vpop.f32.mrb[152].mxu0 }
 0x226   :  { %v3349_v51 = vpop.f32.mrb[153].mxu0 }
 0x227   :  { %2548 = vst.msk [vmem:[%s5079_s6 + $0xc] sm:$0xf] %vm2544_vm2, %v2781_v36  ;;  %v2493_v5 = vmax.f32 %v1972_v32, %v2484_v44  ;;  %v2485_v7 = vmax.f32 %v2462_v14, 0.0  ;;  %v3350_v19 = vadd.f32 %v3349_v51, %v3348_v55  ;;  %v3351_v50 = vpop.f32.mrb[154].mxu0  ;;  %v2466_v20 = vpop.f32.mrb[152].mxu1 }
 0x228   :  { %v3352_v2 = vpop.f32.mrb[155].mxu0  ;;  %v3457_v1 = vpop.f32.mrb[153].mxu1 }
 0x229   :  { %v2502_v22 = vmax.f32 %v4908_v23, %v2493_v5  ;;  %v2494_v61 = vmax.f32 %v1973_v21, %v2485_v7  ;;  %v3353_v45 = vadd.f32 %v3352_v2, %v3351_v50  ;;  %v2395_v58 = vadd.f32 %v3350_v19, %v5003_v4  ;;  %v2469_v9 = vpop.f32.mrb[154].mxu1 }
 0x22a   :  { %v3458_v48 = vpop.f32.mrb[155].mxu1 }
 0x22b   :  { %v2782_v42 = vpack.c.bf16 %v2502_v22, %v2502_v22  ;;  %v2503_v27 = vmax.f32 %v4910_v26, %v2494_v61  ;;  %v2467_v0 = vadd.f32 %v2466_v20, %v2395_v58  ;;  %v2398_v37 = vadd.f32 %v3353_v45, %v5005_v6 }
 0x22d   :  { %2549 = vst.msk [vmem:[%s5079_s6 + $0x10] sm:$0xf] %vm2544_vm2, %v2782_v42  ;;  %v2783_v23 = vpack.c.bf16 %v2503_v27, %v2503_v27  ;;  %v2486_v11 = vmax.f32 %v2467_v0, 0.0  ;;  %v2470_v12 = vadd.f32 %v2469_v9, %v2398_v37  ;;  %v3354_v4 = vpop.f32.mrb[156].mxu0 }
 0x22e   :  { %v3355_v47 = vpop.f32.mrb[157].mxu0 }
 0x22f   :  { %2550 = vst.msk [vmem:[%s5079_s6 + $0x14] sm:$0xf] %vm2544_vm2, %v2783_v23  ;;  %v2495_v26 = vmax.f32 %v1974_v10, %v2486_v11  ;;  %v2487_v6 = vmax.f32 %v2470_v12, 0.0  ;;  %v3356_v25 = vadd.f32 %v3355_v47, %v3354_v4  ;;  %v3357_v13 = vpop.f32.mrb[158].mxu0  ;;  %v2474_v17 = vpop.f32.mrb[156].mxu1 }
 0x230   :  { %v3358_v38 = vpop.f32.mrb[159].mxu0  ;;  %v3461_v46 = vpop.f32.mrb[157].mxu1 }
 0x231   :  { %v2504_v18 = vmax.f32 %v4916_v53, %v2495_v26  ;;  %v2496_v30 = vmax.f32 %v1975_v57, %v2487_v6  ;;  %v2403_v24 = vadd.f32 %v3356_v25, %v5008_v39  ;;  %v2477_v60 = vpop.f32.mrb[158].mxu1 }
 0x232   :  { %v3462_v3 = vpop.f32.mrb[159].mxu1 }
 0x233   :  { %v2784_v56 = vpack.c.bf16 %v2504_v18, %v2504_v18  ;;  %v2505_v43 = vmax.f32 %v4918_v15, %v2496_v30  ;;  %v2475_v35 = vadd.f32 %v2474_v17, %v2403_v24 }
 0x235   :  { %2551 = vst.msk [vmem:[%s5079_s6 + $0x18] sm:$0xf] %vm2544_vm2, %v2784_v56  ;;  %v2785_v29 = vpack.c.bf16 %v2505_v43, %v2505_v43  ;;  %v2488_v33 = vmax.f32 %v2475_v35, 0.0 }
 0x237   :  { %2552 = vst.msk [vmem:[%s5079_s6 + $0x1c] sm:$0xf] %vm2544_vm2, %v2785_v29  ;;  %v2497_v53 = vmax.f32 %v1976_v28, %v2488_v33 }
 0x239   :  { %v2506_v39 = vmax.f32 %v4922_v52, %v2497_v53 }
 0x23b   :  { %v2786_v15 = vpack.c.bf16 %v2506_v39, %v2506_v39 }
 0x23d   :  { %2553 = vst.msk [vmem:[%s5079_s6 + $0x20] sm:$0xf] %vm2544_vm2, %v2786_v15 }

// kernel: malan_net_forward.5
= control target key start
LH: loop header
LB: loop body
LE: loop exit
PB: predicated region body
PF: predicated region fallthrough
CT: control target
= control target key end

     0   :  { %v2518_v21 = vmov 1966171168   ;;  %v334_v23 = vlaneseq  ;;  %vm2520_vm0 = vmmov 0   ;;  %vm1923_vm1 = vcmask 1024   ;;  %s3106_s1 = inlined_call_operand.vmem [shape: bf16[2304,128], index: 1, kind: input, shape index: {}]   ;;  %s3107_s0 = inlined_call_operand.vmem [shape: bf16[2,2304], index: 0, kind: input, shape index: {}]   ;;  %s3108_s3 = inlined_call_operand.vmem [shape: bf16[128,128], index: 3, kind: input, shape index: {}]   ;;  %s3109_s2 = inlined_call_operand.vmem [shape: f32[1,128], index: 2, kind: input, shape index: {}]   ;;  %s3110_s5 = inlined_call_operand.vmem [shape: bf16[128,1], index: 5, kind: input, shape index: {}]   ;;  %s3111_s6 = inlined_call_operand.<no memory space> [shape: f32[1,1], index: 6, kind: input, shape index: {}]   ;;  %s3112_s4 = inlined_call_operand.vmem [shape: f32[1,128], index: 4, kind: input, shape index: {}]   ;;  %s3113_s7 = inlined_call_operand.vmem [shape: f32[2,1], index: 7, kind: output, shape index: {}]  }
   0x1   :  { %v2352_v0 = vld [vmem:[%s3106_s1 + $0x40] sm:$0xff]   ;;  %v2356_v4 = vld [vmem:[%s3106_s1 + $0x48] sm:$0xff]   ;;  %v2360_v8 = vld [vmem:[%s3106_s1 + $0x50] sm:$0xff]   ;;  %v332_v22 = vunpack.c.l.s4 %v2518_v21 }
   0x2   :  { %v2353_v1 = vld [vmem:[%s3106_s1] sm:$0xff]   ;;  %2093 = vmatprep.subr.bf16.mxu0 %v2352_v0  ;;  %v2357_v5 = vld [vmem:[%s3106_s1 + $0x8] sm:$0xff]   ;;  %v2361_v9 = vld [vmem:[%s3106_s1 + $0x10] sm:$0xff]   ;;  %v335_v29 = vshrl.u32 %v334_v23, 7 }
   0x3   :  { %v2354_v2 = vld [vmem:[%s3106_s1 + $0xc0] sm:$0xff]   ;;  %2094 = vmatpush3.bf16.msra.mxu0 %v2353_v1  ;;  %v2358_v6 = vld [vmem:[%s3106_s1 + $0xc8] sm:$0xff]   ;;  %v2362_v10 = vld [vmem:[%s3106_s1 + $0xd0] sm:$0xff]   ;;  %v333_v28 = vunpack.c.0.s8 %v332_v22 }
   0x4   :  { %v2355_v3 = vld [vmem:[%s3106_s1 + $0x80] sm:$0xff]   ;;  %2115 = vmatprep.subr.bf16.mxu1 %v2354_v2  ;;  %2095 = vmatprep.subr.bf16.mxu0 %v2356_v4  ;;  %v2359_v7 = vld [vmem:[%s3106_s1 + $0x88] sm:$0xff]   ;;  %v2363_v11 = vld [vmem:[%s3106_s1 + $0x90] sm:$0xff]  }
   0x5   :  { %2116 = vmatpush3.bf16.msra.mxu1 %v2355_v3  ;;  %v2364_v12 = vld [vmem:[%s3106_s1 + $0x58] sm:$0xff]   ;;  %v2368_v16 = vld [vmem:[%s3106_s1 + $0x60] sm:$0xff]   ;;  %v2372_v20 = vld [vmem:[%s3106_s1 + $0x68] sm:$0xff]   ;;  %v2648_v34 = vsub.s32 %v333_v28, %v335_v29 }
   0x6   :  { %2117 = vmatprep.subr.bf16.mxu1 %v2358_v6  ;;  %v2365_v13 = vld [vmem:[%s3106_s1 + $0x18] sm:$0xff]   ;;  %v2369_v17 = vld [vmem:[%s3106_s1 + $0x20] sm:$0xff]   ;;  %v2373_v24 = vld [vmem:[%s3106_s1 + $0x28] sm:$0xff]  }
   0x7   :  { %2096 = vmatpush3.bf16.msra.mxu0 %v2357_v5  ;;  %v2366_v14 = vld [vmem:[%s3106_s1 + $0xd8] sm:$0xff]   ;;  %v2370_v18 = vld [vmem:[%s3106_s1 + $0xe0] sm:$0xff]   ;;  %v2374_v25 = vld [vmem:[%s3106_s1 + $0xe8] sm:$0xff]  }
   0x8   :  { %2097 = vmatprep.subr.bf16.mxu0 %v2360_v8  ;;  %v2367_v15 = vld [vmem:[%s3106_s1 + $0x98] sm:$0xff]   ;;  %v2371_v19 = vld [vmem:[%s3106_s1 + $0xa0] sm:$0xff]   ;;  %v2375_v26 = vld [vmem:[%s3106_s1 + $0xa8] sm:$0xff]  }
   0x9   :  { %2118 = vmatpush3.bf16.msra.mxu1 %v2359_v7  ;;  %v2376_v27 = vld [vmem:[%s3106_s1 + $0x70] sm:$0xff]   ;;  %v2380_v33 = vld [vmem:[%s3106_s1 + $0x78] sm:$0xff]   ;;  %v29_v37 = vld [vmem:[%s3107_s0] sm:$0xff] }
   0xa   :  { %2119 = vmatprep.subr.bf16.mxu1 %v2362_v10  ;;  %v2377_v30 = vld [vmem:[%s3106_s1 + $0x30] sm:$0xff]   ;;  %v2381_v35 = vld [vmem:[%s3106_s1 + $0x38] sm:$0xff]   ;;  %v330_v38 = vcombine.high %v29_v37, %v29_v37  ;;  %v337_v39 = vrot.slane %v29_v37, %v2648_v34  ;;  %v2385_v41 = vld [vmem:[%s3106_s1 + $0x140] sm:$0xff]  }
   0xb   :  { %2098 = vmatpush3.bf16.msra.mxu0 %v2361_v9  ;;  %v2378_v31 = vld [vmem:[%s3106_s1 + $0xf0] sm:$0xff]   ;;  %v2382_v36 = vld [vmem:[%s3106_s1 + $0xf8] sm:$0xff]   ;;  %v2387_v45 = vld [vmem:[%s3106_s1 + $0x1c0] sm:$0xff]  }
   0xc   :  { %2099 = vmatprep.subr.bf16.mxu0 %v2364_v12  ;;  %v2379_v32 = vld [vmem:[%s3106_s1 + $0xb0] sm:$0xff]   ;;  %v2384_v40 = vld [vmem:[%s3106_s1 + $0xb8] sm:$0xff]   ;;  %v345_v42 = vcombine.high %v337_v39, %v337_v39  ;;  %v353_v43 = vrot.slane %v337_v39, %v2648_v34  ;;  %v2668_v44 = vrot.slane %v330_v38, %v2648_v34  ;;  %v2386_v47 = vld [vmem:[%s3106_s1 + $0x100] sm:$0xff]  }
   0xd   :  { %2120 = vmatpush3.bf16.msra.mxu1 %v2363_v11  ;;  %v2389_v50 = vld [vmem:[%s3106_s1 + $0x148] sm:$0xff]   ;;  %v2388_v52 = vld [vmem:[%s3106_s1 + $0x180] sm:$0xff]   ;;  %v2393_v57 = vld [vmem:[%s3106_s1 + $0x150] sm:$0xff]  }
   0xe   :  { %2121 = vmatprep.subr.bf16.mxu1 %v2366_v14  ;;  %v367_v46 = vrot.slane %v345_v42, %v2648_v34  ;;  %v346_v48 = vcombine.high %v2668_v44, %v2668_v44  ;;  %v375_v49 = vcombine.high %v353_v43, %v353_v43  ;;  %v2391_v54 = vld [vmem:[%s3106_s1 + $0x1c8] sm:$0xff]   ;;  %v2395_v59 = vld [vmem:[%s3106_s1 + $0x1d0] sm:$0xff]   ;;  %v2397_v61 = vld [vmem:[%s3106_s1 + $0x158] sm:$0xff]  }
   0xf   :  { %2100 = vmatpush3.bf16.msra.mxu0 %v2365_v13  ;;  %v2390_v55 = vld [vmem:[%s3106_s1 + $0x108] sm:$0xff]   ;;  %v2394_v60 = vld [vmem:[%s3106_s1 + $0x110] sm:$0xff]   ;;  %v2399_v63 = vld [vmem:[%s3106_s1 + $0x1d8] sm:$0xff]  }
  0x10   :  { %2101 = vmatprep.subr.bf16.mxu0 %v2368_v16  ;;  %1364 = vmatprep.mubr.bf16.mxu0 %v367_v46  ;;  %v377_v51 = vcombine.high %v367_v46, %v367_v46  ;;  %v374_v53 = vrot.slane %v346_v48, %v2648_v34  ;;  %v2392_v58 = vld [vmem:[%s3106_s1 + $0x188] sm:$0xff]   ;;  %v2396_v62 = vld [vmem:[%s3106_s1 + $0x190] sm:$0xff]   ;;  %v2398_v0 = vld [vmem:[%s3106_s1 + $0x118] sm:$0xff]  }
  0x11   :  { %2122 = vmatpush3.bf16.msra.mxu1 %v2367_v15  ;;  %v2401_v1 = vld [vmem:[%s3106_s1 + $0x160] sm:$0xff]   ;;  %v2400_v2 = vld [vmem:[%s3106_s1 + $0x198] sm:$0xff]   ;;  %v2405_v5 = vld [vmem:[%s3106_s1 + $0x168] sm:$0xff]  }
  0x12   :  { %2123 = vmatprep.subr.bf16.mxu1 %v2370_v18  ;;  %1404 = vmatprep.mubr.bf16.mxu1 %v377_v51  ;;  %v378_v56 = vcombine.high %v374_v53, %v374_v53  ;;  %v2403_v3 = vld [vmem:[%s3106_s1 + $0x1e0] sm:$0xff]   ;;  %v2407_v7 = vld [vmem:[%s3106_s1 + $0x1e8] sm:$0xff]   ;;  %v2409_v9 = vld [vmem:[%s3106_s1 + $0x170] sm:$0xff]  }
  0x13   :  { %2102 = vmatpush3.bf16.msra.mxu0 %v2369_v17  ;;  %v2402_v4 = vld [vmem:[%s3106_s1 + $0x120] sm:$0xff]   ;;  %v2406_v8 = vld [vmem:[%s3106_s1 + $0x128] sm:$0xff]   ;;  %v2411_v11 = vld [vmem:[%s3106_s1 + $0x1f0] sm:$0xff]   ;;  %v360_v17 = vrot.slane %v2668_v44, %v2648_v34 }
  0x14   :  { %2103 = vmatprep.subr.bf16.mxu0 %v2372_v20  ;;  %v2404_v6 = vld [vmem:[%s3106_s1 + $0x1a0] sm:$0xff]   ;;  %v2408_v10 = vld [vmem:[%s3106_s1 + $0x1a8] sm:$0xff]   ;;  %v2410_v12 = vld [vmem:[%s3106_s1 + $0x130] sm:$0xff]  }
  0x15   :  { %2124 = vmatpush3.bf16.msra.mxu1 %v2371_v19  ;;  %v2413_v13 = vld [vmem:[%s3106_s1 + $0x178] sm:$0xff]   ;;  %v2412_v14 = vld [vmem:[%s3106_s1 + $0x1b0] sm:$0xff]   ;;  %v2417_v18 = vld [vmem:[%s3106_s1 + $0x240] sm:$0xff]   ;;  %v376_v22 = vcombine.high %v360_v17, %v360_v17 }
  0x16   :  { %2125 = vmatprep.subr.bf16.mxu1 %v2374_v25  ;;  %v2415_v15 = vld [vmem:[%s3106_s1 + $0x1f8] sm:$0xff]   ;;  %v2419_v20 = vld [vmem:[%s3106_s1 + $0x2c0] sm:$0xff]   ;;  %v2421_v23 = vld [vmem:[%s3106_s1 + $0x248] sm:$0xff]  }
  0x17   :  { %2104 = vmatpush3.bf16.msra.mxu0 %v2373_v24  ;;  %v2414_v16 = vld [vmem:[%s3106_s1 + $0x138] sm:$0xff]   ;;  %v2418_v21 = vld [vmem:[%s3106_s1 + $0x200] sm:$0xff]   ;;  %v2423_v25 = vld [vmem:[%s3106_s1 + $0x2c8] sm:$0xff]  }
  0x18   :  { %2105 = vmatprep.subr.bf16.mxu0 %v2376_v27  ;;  %v2416_v19 = vld [vmem:[%s3106_s1 + $0x1b8] sm:$0xff]   ;;  %v2420_v24 = vld [vmem:[%s3106_s1 + $0x280] sm:$0xff]   ;;  %v2425_v27 = vld [vmem:[%s3106_s1 + $0x250] sm:$0xff]  }
  0x19   :  { %2126 = vmatpush3.bf16.msra.mxu1 %v2375_v26  ;;  %v2422_v26 = vld [vmem:[%s3106_s1 + $0x208] sm:$0xff]   ;;  %v2427_v29 = vld [vmem:[%s3106_s1 + $0x2d0] sm:$0xff]   ;;  %v2432_v37 = vld [vmem:[%s3106_s1 + $0x298] sm:$0xff]  }
  0x1a   :  { %2127 = vmatprep.subr.bf16.mxu1 %v2378_v31  ;;  %v2424_v28 = vld [vmem:[%s3106_s1 + $0x288] sm:$0xff]   ;;  %v2429_v31 = vld [vmem:[%s3106_s1 + $0x258] sm:$0xff]   ;;  %v2435_v38 = vld [vmem:[%s3106_s1 + $0x2e0] sm:$0xff]  }
  0x1b   :  { %2106 = vmatpush3.bf16.msra.mxu0 %v2377_v30  ;;  %v2426_v30 = vld [vmem:[%s3106_s1 + $0x210] sm:$0xff]   ;;  %v2434_v39 = vld [vmem:[%s3106_s1 + $0x220] sm:$0xff]   ;;  %v2439_v42 = vld [vmem:[%s3106_s1 + $0x2e8] sm:$0xff]  }
  0x1c   :  { %2107 = vmatprep.subr.bf16.mxu0 %v2380_v33  ;;  %v2431_v33 = vld [vmem:[%s3106_s1 + $0x2d8] sm:$0xff]   ;;  %v2441_v44 = vld [vmem:[%s3106_s1 + $0x270] sm:$0xff]   ;;  %v30_v51 = vld [vmem:[%s3107_s0 + $0x8] sm:$0xff] }
  0x1d   :  { %2128 = vmatpush3.bf16.msra.mxu1 %v2379_v32  ;;  %v2428_v32 = vld [vmem:[%s3106_s1 + $0x290] sm:$0xff]   ;;  %v2445_v48 = vld [vmem:[%s3106_s1 + $0x278] sm:$0xff]  }
  0x1e   :  { %2129 = vmatprep.subr.bf16.mxu1 %v2382_v36  ;;  %v2433_v36 = vld [vmem:[%s3106_s1 + $0x260] sm:$0xff]   ;;  %v2443_v46 = vld [vmem:[%s3106_s1 + $0x2f0] sm:$0xff]  }
  0x1f   :  { %2108 = vmatpush3.bf16.msra.mxu0 %v2381_v35  ;;  %v2430_v35 = vld [vmem:[%s3106_s1 + $0x218] sm:$0xff]  }
  0x20   :  { %2137 = vmatprep.subr.bf16.mxu0 %v2385_v41  ;;  %v2436_v41 = vld [vmem:[%s3106_s1 + $0x2a0] sm:$0xff]  }
  0x21   :  { %2130 = vmatpush3.bf16.msra.mxu1 %v2384_v40  ;;  %v2437_v40 = vld [vmem:[%s3106_s1 + $0x268] sm:$0xff]  }
  0x22   :  { %2159 = vmatprep.subr.bf16.mxu1 %v2387_v45  ;;  %1365 = vmatmul.mubr.bf16.vlgmr.msra.gmra.mrb[0].mxu0 %v353_v43  ;;  %v2438_v43 = vld [vmem:[%s3106_s1 + $0x228] sm:$0xff]  }
  0x23   :  { %2138 = vmatpush3.bf16.msra.mxu0 %v2386_v47  ;;  %1444 = vmatprep.mubr.bf16.mxu0 %v374_v53  ;;  %v2440_v45 = vld [vmem:[%s3106_s1 + $0x2a8] sm:$0xff]   ;;  %v2442_v47 = vld [vmem:[%s3106_s1 + $0x230] sm:$0xff]   ;;  %v386_v53 = vrot.slane %v30_v51, %v2648_v34 }
  0x24   :  { %1405 = vmatmul.mubr.bf16.vlgmr.msra.gmra.mrb[0].mxu1 %v375_v49  ;;  %2139 = vmatprep.subr.bf16.mxu0 %v2389_v50  ;;  %v2444_v49 = vld [vmem:[%s3106_s1 + $0x2b0] sm:$0xff]   ;;  %v2447_v50 = vld [vmem:[%s3106_s1 + $0x2f8] sm:$0xff]  }
  0x25   :  { %2160 = vmatpush3.bf16.msra.mxu1 %v2388_v52  ;;  %1484 = vmatprep.mubr.bf16.mxu1 %v378_v56  ;;  %v2446_v52 = vld [vmem:[%s3106_s1 + $0x238] sm:$0xff]   ;;  %v394_v56 = vcombine.high %v386_v53, %v386_v53 }
  0x26   :  { %2161 = vmatprep.subr.bf16.mxu1 %v2391_v54  ;;  %v379_v54 = vcombine.high %v30_v51, %v30_v51  ;;  %v2494_v51 = vld [vmem:[%s3106_s1 + $0x470] sm:$0xff]  }
  0x27   :  { %2140 = vmatpush3.bf16.msra.mxu0 %v2390_v55  ;;  %v2449_v55 = vld [vmem:[%s3106_s1 + $0x340] sm:$0xff]  }
  0x28   :  { %2141 = vmatprep.subr.bf16.mxu0 %v2393_v57  ;;  %v2448_v57 = vld [vmem:[%s3106_s1 + $0x2b8] sm:$0xff]  }
  0x29   :  { %2162 = vmatpush3.bf16.msra.mxu1 %v2392_v58  ;;  %v402_v58 = vrot.slane %v386_v53, %v2648_v34  ;;  %v2496_v53 = vld [vmem:[%s3106_s1 + $0x478] sm:$0xff]  }
  0x2a   :  { %2163 = vmatprep.subr.bf16.mxu1 %v2395_v59  ;;  %v2874_v59 = vrot.slane %v379_v54, %v2648_v34  ;;  %v2497_v54 = vld [vmem:[%s3106_s1 + $0x438] sm:$0xff]  }
  0x2b   :  { %2142 = vmatpush3.bf16.msra.mxu0 %v2394_v60  ;;  %v2451_v60 = vld [vmem:[%s3106_s1 + $0x3c0] sm:$0xff]  }
  0x2c   :  { %2143 = vmatprep.subr.bf16.mxu0 %v2397_v61  ;;  %v416_v61 = vrot.slane %v394_v56, %v2648_v34  ;;  %v2519_v56 = vmov 0.0  }
  0x2d   :  { %2164 = vmatpush3.bf16.msra.mxu1 %v2396_v62  ;;  %v2450_v62 = vld [vmem:[%s3106_s1 + $0x300] sm:$0xff]  }
  0x2e   :  { %2165 = vmatprep.subr.bf16.mxu1 %v2399_v63  ;;  %v395_v63 = vcombine.high %v2874_v59, %v2874_v59 }
  0x2f   :  { %2144 = vmatpush3.bf16.msra.mxu0 %v2398_v0  ;;  %v424_v0 = vcombine.high %v402_v58, %v402_v58 }
  0x30   :  { %2145 = vmatprep.subr.bf16.mxu0 %v2401_v1  ;;  %v2453_v1 = vld [vmem:[%s3106_s1 + $0x348] sm:$0xff]  }
  0x31   :  { %2166 = vmatpush3.bf16.msra.mxu1 %v2400_v2  ;;  %v426_v2 = vcombine.high %v416_v61, %v416_v61 }
  0x32   :  { %2167 = vmatprep.subr.bf16.mxu1 %v2403_v3  ;;  %v2452_v3 = vld [vmem:[%s3106_s1 + $0x380] sm:$0xff]  }
  0x33   :  { %2146 = vmatpush3.bf16.msra.mxu0 %v2402_v4  ;;  %v423_v4 = vrot.slane %v395_v63, %v2648_v34  ;;  %v1929_v63 = vld [vmem:[%s3109_s2] ss:$0 sm:$0xff] }
  0x34   :  { %2147 = vmatprep.subr.bf16.mxu0 %v2405_v5  ;;  %v2455_v5 = vld [vmem:[%s3106_s1 + $0x3c8] sm:$0xff]  }
  0x35   :  { %2168 = vmatpush3.bf16.msra.mxu1 %v2404_v6  ;;  %v2454_v6 = vld [vmem:[%s3106_s1 + $0x308] sm:$0xff]  }
  0x36   :  { %2169 = vmatprep.subr.bf16.mxu1 %v2407_v7  ;;  %v427_v7 = vcombine.high %v423_v4, %v423_v4 }
  0x37   :  { %2148 = vmatpush3.bf16.msra.mxu0 %v2406_v8  ;;  %v2457_v8 = vld [vmem:[%s3106_s1 + $0x350] sm:$0xff]  }
  0x38   :  { %2149 = vmatprep.subr.bf16.mxu0 %v2409_v9  ;;  %v2456_v9 = vld [vmem:[%s3106_s1 + $0x388] sm:$0xff]  }
  0x39   :  { %2170 = vmatpush3.bf16.msra.mxu1 %v2408_v10  ;;  %v2459_v10 = vld [vmem:[%s3106_s1 + $0x3d0] sm:$0xff]  }
  0x3a   :  { %2171 = vmatprep.subr.bf16.mxu1 %v2411_v11  ;;  %v2458_v11 = vld [vmem:[%s3106_s1 + $0x310] sm:$0xff]  }
  0x3b   :  { %2150 = vmatpush3.bf16.msra.mxu0 %v2410_v12  ;;  %v2461_v12 = vld [vmem:[%s3106_s1 + $0x358] sm:$0xff]  }
  0x3c   :  { %2151 = vmatprep.subr.bf16.mxu0 %v2413_v13  ;;  %v2460_v13 = vld [vmem:[%s3106_s1 + $0x390] sm:$0xff]  }
  0x3d   :  { %2172 = vmatpush3.bf16.msra.mxu1 %v2412_v14  ;;  %v2463_v14 = vld [vmem:[%s3106_s1 + $0x3d8] sm:$0xff]  }
  0x3e   :  { %2173 = vmatprep.subr.bf16.mxu1 %v2415_v15  ;;  %v2462_v15 = vld [vmem:[%s3106_s1 + $0x318] sm:$0xff]  }
  0x3f   :  { %2152 = vmatpush3.bf16.msra.mxu0 %v2414_v16  ;;  %v2465_v16 = vld [vmem:[%s3106_s1 + $0x360] sm:$0xff]  }
  0x40   :  { %2181 = vmatprep.subr.bf16.mxu0 %v2417_v18  ;;  %v2467_v18 = vld [vmem:[%s3106_s1 + $0x3e0] sm:$0xff]  }
  0x41   :  { %2174 = vmatpush3.bf16.msra.mxu1 %v2416_v19  ;;  %v2466_v19 = vld [vmem:[%s3106_s1 + $0x320] sm:$0xff]  }
  0x42   :  { %1445 = vmatmul.mubr.bf16.vlgmr.msra.gmra.mrb[4].mxu0 %v360_v17  ;;  %2203 = vmatprep.subr.bf16.mxu1 %v2419_v20  ;;  %v2464_v17 = vld [vmem:[%s3106_s1 + $0x398] sm:$0xff]   ;;  %v2469_v20 = vld [vmem:[%s3106_s1 + $0x368] sm:$0xff]  }
  0x43   :  { %2182 = vmatpush3.bf16.msra.mxu0 %v2418_v21  ;;  %1524 = vmatprep.mubr.bf16.mxu0 %v416_v61  ;;  %v2468_v21 = vld [vmem:[%s3106_s1 + $0x3a0] sm:$0xff]   ;;  %v2503_v61 = vld [vmem:[%s3108_s3 + $0x28] sm:$0xff]  }
  0x44   :  { %1485 = vmatmul.mubr.bf16.vlgmr.msra.gmra.mrb[4].mxu1 %v376_v22  ;;  %2183 = vmatprep.subr.bf16.mxu0 %v2421_v23  ;;  %v2471_v22 = vld [vmem:[%s3106_s1 + $0x3e8] sm:$0xff]  }
  0x45   :  { %2204 = vmatpush3.bf16.msra.mxu1 %v2420_v24  ;;  %1564 = vmatprep.mubr.bf16.mxu1 %v426_v2  ;;  %v2470_v23 = vld [vmem:[%s3106_s1 + $0x328] sm:$0xff]   ;;  %v2473_v24 = vld [vmem:[%s3106_s1 + $0x370] sm:$0xff]  }
  0x46   :  { %2205 = vmatprep.subr.bf16.mxu1 %v2423_v25  ;;  %v2472_v25 = vld [vmem:[%s3106_s1 + $0x3a8] sm:$0xff]  }
  0x47   :  { %2184 = vmatpush3.bf16.msra.mxu0 %v2422_v26  ;;  %v2475_v26 = vld [vmem:[%s3106_s1 + $0x3f0] sm:$0xff]  }
  0x48   :  { %2185 = vmatprep.subr.bf16.mxu0 %v2425_v27  ;;  %v2474_v27 = vld [vmem:[%s3106_s1 + $0x330] sm:$0xff]  }
  0x49   :  { %2206 = vmatpush3.bf16.msra.mxu1 %v2424_v28  ;;  %v2477_v28 = vld [vmem:[%s3106_s1 + $0x378] sm:$0xff]  }
  0x4a   :  { %2207 = vmatprep.subr.bf16.mxu1 %v2427_v29  ;;  %v2476_v29 = vld [vmem:[%s3106_s1 + $0x3b0] sm:$0xff]  }
  0x4b   :  { %2186 = vmatpush3.bf16.msra.mxu0 %v2426_v30  ;;  %v2479_v30 = vld [vmem:[%s3106_s1 + $0x3f8] sm:$0xff]  }
  0x4c   :  { %2187 = vmatprep.subr.bf16.mxu0 %v2429_v31  ;;  %v2478_v31 = vld [vmem:[%s3106_s1 + $0x338] sm:$0xff]  }
  0x4d   :  { %2208 = vmatpush3.bf16.msra.mxu1 %v2428_v32  ;;  %v409_v32 = vrot.slane %v2874_v59, %v2648_v34  ;;  %v2501_v59 = vld [vmem:[%s3108_s3 + $0x18] sm:$0xff]  }
  0x4e   :  { %2209 = vmatprep.subr.bf16.mxu1 %v2431_v33  ;;  %v2482_v33 = vld [vmem:[%s3106_s1 + $0x440] sm:$0xff]  }
  0x4f   :  { %2188 = vmatpush3.bf16.msra.mxu0 %v2430_v35  ;;  %v2481_v35 = vld [vmem:[%s3106_s1 + $0x3b8] sm:$0xff]  }
  0x50   :  { %2189 = vmatprep.subr.bf16.mxu0 %v2433_v36  ;;  %v2483_v36 = vld [vmem:[%s3106_s1 + $0x400] sm:$0xff]  }
  0x51   :  { %2210 = vmatpush3.bf16.msra.mxu1 %v2432_v37  ;;  %v425_v37 = vcombine.high %v409_v32, %v409_v32 }
  0x52   :  { %2211 = vmatprep.subr.bf16.mxu1 %v2435_v38  ;;  %v2484_v38 = vld [vmem:[%s3106_s1 + $0x448] sm:$0xff]  }
  0x53   :  { %2190 = vmatpush3.bf16.msra.mxu0 %v2434_v39  ;;  %v2485_v39 = vld [vmem:[%s3106_s1 + $0x408] sm:$0xff]  }
  0x54   :  { %2191 = vmatprep.subr.bf16.mxu0 %v2437_v40  ;;  %v2486_v40 = vld [vmem:[%s3106_s1 + $0x450] sm:$0xff]  }
  0x55   :  { %2212 = vmatpush3.bf16.msra.mxu1 %v2436_v41  ;;  %v2487_v41 = vld [vmem:[%s3106_s1 + $0x410] sm:$0xff]  }
  0x56   :  { %2213 = vmatprep.subr.bf16.mxu1 %v2439_v42  ;;  %v2488_v42 = vld [vmem:[%s3106_s1 + $0x458] sm:$0xff]  }
  0x57   :  { %2192 = vmatpush3.bf16.msra.mxu0 %v2438_v43  ;;  %v2489_v43 = vld [vmem:[%s3106_s1 + $0x418] sm:$0xff]  }
  0x58   :  { %2193 = vmatprep.subr.bf16.mxu0 %v2441_v44  ;;  %v2490_v44 = vld [vmem:[%s3106_s1 + $0x460] sm:$0xff]  }
  0x59   :  { %2214 = vmatpush3.bf16.msra.mxu1 %v2440_v45  ;;  %v1930_v45 = vld.sshfl [vmem:[%s3107_s0 + $0x10] sm:$0x11 pattern:$0x75316420] }
  0x5a   :  { %2215 = vmatprep.subr.bf16.mxu1 %v2443_v46  ;;  %v435_v46 = vcombine.high %v1930_v45, %v1930_v45 }
  0x5b   :  { %2194 = vmatpush3.bf16.msra.mxu0 %v2442_v47  ;;  %v2491_v47 = vld [vmem:[%s3106_s1 + $0x420] sm:$0xff]  }
  0x5c   :  { %2195 = vmatprep.subr.bf16.mxu0 %v2445_v48  ;;  %v449_v48 = vrot.slane %v435_v46, %v2648_v34 }
  0x5d   :  { %2216 = vmatpush3.bf16.msra.mxu1 %v2444_v49  ;;  %v2492_v49 = vld [vmem:[%s3106_s1 + $0x468] sm:$0xff]  }
  0x5e   :  { %2217 = vmatprep.subr.bf16.mxu1 %v2447_v50  ;;  %v2493_v50 = vld [vmem:[%s3106_s1 + $0x428] sm:$0xff]  }
  0x5f   :  { %2196 = vmatpush3.bf16.msra.mxu0 %v2446_v52  ;;  %v2495_v52 = vld [vmem:[%s3106_s1 + $0x430] sm:$0xff]  }
  0x60   :  { %2225 = vmatprep.subr.bf16.mxu0 %v2449_v55  ;;  %v442_v55 = vrot.slane %v1930_v45, %v2648_v34  ;;  %v2500_v34 = vld [vmem:[%s3108_s3 + $0x10] sm:$0xff]  }
  0x61   :  { %2218 = vmatpush3.bf16.msra.mxu1 %v2448_v57  ;;  %v2498_v57 = vld [vmem:[%s3108_s3] sm:$0xff]  }
  0x62   :  { %1525 = vmatmul.mubr.bf16.vlgmr.msra.gmra.mrb[8].mxu0 %v402_v58  ;;  %2247 = vmatprep.subr.bf16.mxu1 %v2451_v60  ;;  %v2499_v58 = vld [vmem:[%s3108_s3 + $0x8] sm:$0xff]   ;;  %v2502_v60 = vld [vmem:[%s3108_s3 + $0x20] sm:$0xff]  }
  0x63   :  { %2226 = vmatpush3.bf16.msra.mxu0 %v2450_v62  ;;  %1604 = vmatprep.mubr.bf16.mxu0 %v423_v4 }
  0x64   :  { %1565 = vmatmul.mubr.bf16.vlgmr.msra.gmra.mrb[8].mxu1 %v424_v0  ;;  %2227 = vmatprep.subr.bf16.mxu0 %v2453_v1  ;;  %v2504_v1 = vld [vmem:[%s3108_s3 + $0x30] sm:$0xff]  }
  0x65   :  { %2248 = vmatpush3.bf16.msra.mxu1 %v2452_v3  ;;  %1644 = vmatprep.mubr.bf16.mxu1 %v427_v7 }
  0x66   :  { %2249 = vmatprep.subr.bf16.mxu1 %v2455_v5 }
  0x67   :  { %2228 = vmatpush3.bf16.msra.mxu0 %v2454_v6 }
  0x68   :  { %2229 = vmatprep.subr.bf16.mxu0 %v2457_v8 }
  0x69   :  { %2250 = vmatpush3.bf16.msra.mxu1 %v2456_v9 }
  0x6a   :  { %2251 = vmatprep.subr.bf16.mxu1 %v2459_v10 }
  0x6b   :  { %2230 = vmatpush3.bf16.msra.mxu0 %v2458_v11  ;;  %v2505_v11 = vld [vmem:[%s3108_s3 + $0x38] sm:$0xff]  }
  0x6c   :  { %2231 = vmatprep.subr.bf16.mxu0 %v2461_v12 }
  0x6d   :  { %2252 = vmatpush3.bf16.msra.mxu1 %v2460_v13  ;;  %v2506_v13 = vld [vmem:[%s3110_s5] sm:$0xff]  }
  0x6e   :  { %2253 = vmatprep.subr.bf16.mxu1 %v2463_v14  ;;  %v2507_v14 = vld [vmem:[%s3110_s5 + $0x8] sm:$0xff]  }
  0x6f   :  { %2232 = vmatpush3.bf16.msra.mxu0 %v2462_v15  ;;  %v2508_v15 = vld [vmem:[%s3110_s5 + $0x10] sm:$0xff]  }
  0x70   :  { %2233 = vmatprep.subr.bf16.mxu0 %v2465_v16  ;;  %v2509_v16 = vld [vmem:[%s3110_s5 + $0x18] sm:$0xff]  }
  0x71   :  { %2254 = vmatpush3.bf16.msra.mxu1 %v2464_v17  ;;  %v2510_v17 = vld [vmem:[%s3110_s5 + $0x20] sm:$0xff]  }
  0x72   :  { %2255 = vmatprep.subr.bf16.mxu1 %v2467_v18  ;;  %v2511_v18 = vld [vmem:[%s3110_s5 + $0x28] sm:$0xff]  }
  0x73   :  { %2234 = vmatpush3.bf16.msra.mxu0 %v2466_v19 }
  0x74   :  { %2235 = vmatprep.subr.bf16.mxu0 %v2469_v20 }
  0x75   :  { %2256 = vmatpush3.bf16.msra.mxu1 %v2468_v21 }
  0x76   :  { %2257 = vmatprep.subr.bf16.mxu1 %v2471_v22 }
  0x77   :  { %2236 = vmatpush3.bf16.msra.mxu0 %v2470_v23 }
  0x78   :  { %2237 = vmatprep.subr.bf16.mxu0 %v2473_v24 }
  0x79   :  { %2258 = vmatpush3.bf16.msra.mxu1 %v2472_v25 }
  0x7a   :  { %2259 = vmatprep.subr.bf16.mxu1 %v2475_v26 }
  0x7b   :  { %2238 = vmatpush3.bf16.msra.mxu0 %v2474_v27 }
  0x7c   :  { %2239 = vmatprep.subr.bf16.mxu0 %v2477_v28 }
  0x7d   :  { %2260 = vmatpush3.bf16.msra.mxu1 %v2476_v29 }
  0x7e   :  { %2261 = vmatprep.subr.bf16.mxu1 %v2479_v30 }
  0x7f   :  { %2240 = vmatpush3.bf16.msra.mxu0 %v2478_v31 }
  0x80   :  { %2269 = vmatprep.subr.bf16.mxu0 %v2482_v33 }
  0x81   :  { %2262 = vmatpush3.bf16.msra.mxu1 %v2481_v35 }
  0x82   :  { %1605 = vmatmul.mubr.bf16.vlgmr.msra.gmra.mrb[12].mxu0 %v409_v32  ;;  %2309 = vmatprep.subr.bf16.mxu1 %v2519_v56 }
  0x83   :  { %2270 = vmatpush3.bf16.msra.mxu0 %v2483_v36  ;;  %1684 = vmatprep.mubr.bf16.mxu0 %v449_v48 }
  0x84   :  { %1645 = vmatmul.mubr.bf16.vlgmr.msra.gmra.mrb[12].mxu1 %v425_v37  ;;  %2271 = vmatprep.subr.bf16.mxu0 %v2484_v38 }
  0x85   :  { %2310 = vmatpush3.bf16.msra.mxu1 %v2498_v57  ;;  %2325 = vmatprep.mubr.msk.bf16.mxu1 %vm2520_vm0, %v2519_v56 }
  0x86   :  { %2311 = vmatprep.subr.bf16.mxu1 %v2519_v56 }
  0x87   :  { %2272 = vmatpush3.bf16.msra.mxu0 %v2485_v39 }
  0x88   :  { %2273 = vmatprep.subr.bf16.mxu0 %v2486_v40 }
  0x89   :  { %2312 = vmatpush3.bf16.msra.mxu1 %v2499_v58 }
  0x8a   :  { %2313 = vmatprep.subr.bf16.mxu1 %v2519_v56 }
  0x8b   :  { %2274 = vmatpush3.bf16.msra.mxu0 %v2487_v41 }
  0x8c   :  { %2275 = vmatprep.subr.bf16.mxu0 %v2488_v42 }
  0x8d   :  { %2314 = vmatpush3.bf16.msra.mxu1 %v2500_v34 }
  0x8e   :  { %2315 = vmatprep.subr.bf16.mxu1 %v2519_v56 }
  0x8f   :  { %2276 = vmatpush3.bf16.msra.mxu0 %v2489_v43 }
  0x90   :  { %2277 = vmatprep.subr.bf16.mxu0 %v2490_v44 }
  0x91   :  { %2316 = vmatpush3.bf16.msra.mxu1 %v2501_v59 }
  0x92   :  { %2317 = vmatprep.subr.bf16.mxu1 %v2519_v56 }
  0x93   :  { %2278 = vmatpush3.bf16.msra.mxu0 %v2491_v47 }
  0x94   :  { %2279 = vmatprep.subr.bf16.mxu0 %v2492_v49 }
  0x95   :  { %2318 = vmatpush3.bf16.msra.mxu1 %v2502_v60 }
  0x96   :  { %2319 = vmatprep.subr.bf16.mxu1 %v2519_v56 }
  0x97   :  { %2280 = vmatpush3.bf16.msra.mxu0 %v2493_v50 }
  0x98   :  { %2281 = vmatprep.subr.bf16.mxu0 %v2494_v51 }
  0x99   :  { %2320 = vmatpush3.bf16.msra.mxu1 %v2503_v61 }
  0x9a   :  { %2321 = vmatprep.subr.bf16.mxu1 %v2519_v56 }
  0x9b   :  { %2282 = vmatpush3.bf16.msra.mxu0 %v2495_v52 }
  0x9c   :  { %2283 = vmatprep.subr.bf16.mxu0 %v2496_v53 }
  0x9d   :  { %2322 = vmatpush3.bf16.msra.mxu1 %v2504_v1  ;;  %v2513_v1 = vld [vmem:[%s3110_s5 + $0x38] sm:$0xff]  }
  0x9e   :  { %2323 = vmatprep.subr.bf16.mxu1 %v2519_v56 }
  0x9f   :  { %2284 = vmatpush3.bf16.msra.mxu0 %v2497_v54 }
  0xa0   :  { %2329 = vmatprep.subr.bf16.mxu0 %v2519_v56 }
  0xa1   :  { %2324 = vmatpush3.bf16.msra.mxu1 %v2505_v11 }
  0xa2   :  { %1685 = vmatmul.mubr.bf16.vlgmr.msra.gmra.mrb[16].mxu0 %v442_v55 }
  0xa3   :  { %2345 = vmatprep.mubr.msk.bf16.mxu0 %vm2520_vm0, %v2519_v56  ;;  %2330 = vmatpush3.bf16.msra.mxu0 %v2506_v13 }
  0xa4   :  { %2331 = vmatprep.subr.bf16.mxu0 %v2519_v56 }
  0xa7   :  { %2332 = vmatpush3.bf16.msra.mxu0 %v2507_v14 }
  0xa8   :  { %2333 = vmatprep.subr.bf16.mxu0 %v2519_v56 }
  0xab   :  { %2334 = vmatpush3.bf16.msra.mxu0 %v2508_v15 }
  0xac   :  { %2335 = vmatprep.subr.bf16.mxu0 %v2519_v56 }
  0xaf   :  { %2336 = vmatpush3.bf16.msra.mxu0 %v2509_v16 }
  0xb0   :  { %2337 = vmatprep.subr.bf16.mxu0 %v2519_v56 }
  0xb3   :  { %2338 = vmatpush3.bf16.msra.mxu0 %v2510_v17 }
  0xb4   :  { %2339 = vmatprep.subr.bf16.mxu0 %v2519_v56 }
  0xb7   :  { %2340 = vmatpush3.bf16.msra.mxu0 %v2511_v18 }
  0xb8   :  { %2341 = vmatprep.subr.bf16.mxu0 %v2519_v56 }
  0xf5   :  { %v2109_v62 = vpop.f32.mrb[0].mxu0 }
  0xf6   :  { %v2110_v0 = vpop.f32.mrb[1].mxu0 }
  0xf7   :  { %v2111_v2 = vadd.f32 %v2110_v0, %v2109_v62  ;;  %v2112_v3 = vpop.f32.mrb[2].mxu0  ;;  %v2131_v4 = vpop.f32.mrb[0].mxu1  ;;  %v2512_v0 = vld [vmem:[%s3110_s5 + $0x30] sm:$0xff]  }
  0xf8   :  { %v2113_v5 = vpop.f32.mrb[3].mxu0  ;;  %v2132_v6 = vpop.f32.mrb[1].mxu1  ;;  %2342 = vmatpush3.bf16.msra.mxu0 %v2512_v0  ;;  %v2075_v3 = vld [vmem:[%s3112_s4] ss:$0 sm:$0xff] }
  0xf9   :  { %v1367_v7 = vadd.f32 %v2111_v2, %v1929_v63  ;;  %v2133_v8 = vadd.f32 %v2132_v6, %v2131_v4  ;;  %v2134_v9 = vpop.f32.mrb[2].mxu1  ;;  %2343 = vmatprep.subr.bf16.mxu0 %v2519_v56  ;;  %v12_v2 = vstv %s3111_s6 }
  0xfa   :  { %v2135_v10 = vpop.f32.mrb[3].mxu1  ;;  %13 = vst [vmem:[#allocation2] sm:$0x1] %v12_v2 }
  0xfb   :  { %v1407_v12 = vadd.f32 %v2133_v8, %v1367_v7 }
  0xfc   :  { %2344 = vmatpush3.bf16.msra.mxu0 %v2513_v1 }
 0x101   :  { %v2084_v10 = vld [vmem:[#allocation2] ss:$0 sm:$0xff] }
 0x115   :  { %v2153_v19 = vpop.f32.mrb[4].mxu0 }
 0x116   :  { %v2154_v20 = vpop.f32.mrb[5].mxu0 }
 0x117   :  { %v2155_v21 = vadd.f32 %v2154_v20, %v2153_v19  ;;  %v2156_v22 = vpop.f32.mrb[6].mxu0  ;;  %v2175_v23 = vpop.f32.mrb[4].mxu1 }
 0x118   :  { %v2157_v24 = vpop.f32.mrb[7].mxu0  ;;  %v2176_v25 = vpop.f32.mrb[5].mxu1 }
 0x119   :  { %v1447_v26 = vadd.f32 %v2155_v21, %v1407_v12  ;;  %v2177_v27 = vadd.f32 %v2176_v25, %v2175_v23  ;;  %v2178_v28 = vpop.f32.mrb[6].mxu1 }
 0x11a   :  { %v2179_v29 = vpop.f32.mrb[7].mxu1 }
 0x11b   :  { %v1487_v30 = vadd.f32 %v2177_v27, %v1447_v26 }
 0x135   :  { %v2197_v31 = vpop.f32.mrb[8].mxu0 }
 0x136   :  { %v2198_v32 = vpop.f32.mrb[9].mxu0 }
 0x137   :  { %v2199_v33 = vadd.f32 %v2198_v32, %v2197_v31  ;;  %v2200_v35 = vpop.f32.mrb[10].mxu0  ;;  %v2219_v36 = vpop.f32.mrb[8].mxu1 }
 0x138   :  { %v2201_v37 = vpop.f32.mrb[11].mxu0  ;;  %v2220_v38 = vpop.f32.mrb[9].mxu1 }
 0x139   :  { %v1527_v39 = vadd.f32 %v2199_v33, %v1487_v30  ;;  %v2221_v40 = vadd.f32 %v2220_v38, %v2219_v36  ;;  %v2222_v41 = vpop.f32.mrb[10].mxu1 }
 0x13a   :  { %v2223_v42 = vpop.f32.mrb[11].mxu1 }
 0x13b   :  { %v1567_v43 = vadd.f32 %v2221_v40, %v1527_v39 }
 0x155   :  { %v2241_v44 = vpop.f32.mrb[12].mxu0 }
 0x156   :  { %v2242_v45 = vpop.f32.mrb[13].mxu0 }
 0x157   :  { %v2243_v46 = vadd.f32 %v2242_v45, %v2241_v44  ;;  %v2244_v47 = vpop.f32.mrb[14].mxu0  ;;  %v2263_v48 = vpop.f32.mrb[12].mxu1 }
 0x158   :  { %v2245_v49 = vpop.f32.mrb[15].mxu0  ;;  %v2264_v50 = vpop.f32.mrb[13].mxu1 }
 0x159   :  { %v1607_v51 = vadd.f32 %v2243_v46, %v1567_v43  ;;  %v2265_v52 = vadd.f32 %v2264_v50, %v2263_v48  ;;  %v2266_v53 = vpop.f32.mrb[14].mxu1 }
 0x15a   :  { %v2267_v54 = vpop.f32.mrb[15].mxu1 }
 0x15b   :  { %v1647_v55 = vadd.f32 %v2265_v52, %v1607_v51 }
 0x175   :  { %v2285_v57 = vpop.f32.mrb[16].mxu0 }
 0x176   :  { %v2286_v58 = vpop.f32.mrb[17].mxu0 }
 0x177   :  { %v2287_v34 = vadd.f32 %v2286_v58, %v2285_v57  ;;  %v2288_v59 = vpop.f32.mrb[18].mxu0 }
 0x178   :  { %v2289_v60 = vpop.f32.mrb[19].mxu0 }
 0x179   :  { %v1687_v61 = vadd.f32 %v2287_v34, %v1647_v55 }
 0x17b   :  { %v1692_v62 = vmax.f32 %v1687_v61, 0.0 }
 0x17d   :  { %v1693_v63 = vpack.c.bf16 %v1692_v62, %v1692_v62 }
 0x17f   :  { %2326 = vmatmul.mubr.bf16.vlgmr.msra.gmra.mrb[16].mxu1 %v1693_v63 }
 0x252   :  { %v1799_v4 = vpop.f32.mrb[16].mxu1 }
 0x253   :  { %v1800_v5 = vadd.f32 %v2075_v3, %v1799_v4  ;;  %v2327_v6 = vpop.f32.mrb[17].mxu1 }
 0x254   :  { %v1802_v7 = vpop.f32.mrb[18].mxu1 }
 0x255   :  { %v1805_v8 = vmax.f32 %v1800_v5, 0.0  ;;  %v2328_v56 = vpop.f32.mrb[19].mxu1 }
 0x257   :  { %v1806_v9 = vpack.c.bf16 %v1805_v8, %v1805_v8 }
 0x259   :  { %2346 = vmatmul.mubr.bf16.vlgmr.msra.gmra.mrb[20].mxu0 %v1806_v9 }
 0x32c   :  { %v1912_v11 = vpop.f32.mrb[20].mxu0 }
 0x32d   :  { %v1913_v12 = vadd.f32 %v2084_v10, %v1912_v11  ;;  %v2347_v13 = vpop.f32.mrb[21].mxu0 }
 0x32e   :  { %v1915_v14 = vpop.f32.mrb[22].mxu0 }
 0x32f   :  { %v1918_v15 = vsub.f32 0.0, %v1913_v12  ;;  %v2348_v16 = vpop.f32.mrb[23].mxu0 }
 0x331   :  { %v1919_v17 = vmul.f32 1.442695, %v1918_v15 }
 0x333   :  { %2514 = vpow2.f32 %v1919_v17 }
 0x33d   :  { %v2515_v18 = vpop.eup %2514 }
 0x33e   :  { %v1921_v19 = vadd.f32 1.0, %v2515_v18 }
 0x340   :  { %2516 = vrcp.f32 %v1921_v19 }
 0x34a   :  { %v2517_v20 = vpop.eup %2516 }
 0x34b   :  { %1924 = vst.msk [vmem:[%s3113_s7] sm:$0x3] %vm1923_vm1, %v2517_v20 }

</bundles_post_ra>
